<compile_context>
chip_gen: v7x
topology: tpu7x:2x2x1
jax: 0.10.0
libtpu: 0.0.40
codegen_flags: <defaults>
</compile_context>

<pallas_src>
import functools
import math

import jax
import jax.numpy as jnp
from jax import lax
from jax.experimental import pallas as pl
from jax.experimental.pallas import tpu as pltpu


# -----------------------------------------------------------------------------
# M-tile selection: large (mem-bound pipeline efficiency), but prefer >= 2 grid
# steps so both v7x TensorCores get work.  tm must be a multiple of 8 (sublane)
# or equal to M.
# -----------------------------------------------------------------------------
def _pick_m_tile(M, max_tile=512):
    if M <= max_tile:
        if M % 16 == 0 and M // 2 >= 8:
            return M // 2            # 2 grid steps -> megacore-friendly on v7x
        return M
    for t in (max_tile, 256, 128, 64, 32, 16, 8):
        if M % t == 0:
            return t
    return M


# -----------------------------------------------------------------------------
# Kernel 1: matmul + bias (+ optional GELU, + optional fused residual).
# K and N are untiled (weights VMEM-resident); grid is 1-D over M.
# No accumulator scratch needed -- single dot with f32 accumulation.
# -----------------------------------------------------------------------------
def _linear_kernel(*refs, activation, has_residual):
    if has_residual:
        x_ref, w_ref, b_ref, r_ref, o_ref = refs
    else:
        x_ref, w_ref, b_ref, o_ref = refs
        r_ref = None
    y = jnp.dot(x_ref[...], w_ref[...], preferred_element_type=jnp.float32)
    y = y + b_ref[...].astype(jnp.float32)
    if activation == "gelu":
        y = jax.nn.gelu(y, approximate=True)
    if has_residual:
        y = y + r_ref[...].astype(jnp.float32)
    o_ref[...] = y.astype(o_ref.dtype)


def linear_resident(x, w, b, residual=None, activation=None,
                    out_dtype=jnp.bfloat16):
    """x:[M,K] @ w:[K,N] + b:[1,N] (+ residual:[M,N]); w,b resident in VMEM."""
    M, K = x.shape
    _, N = w.shape
    tm = _pick_m_tile(M)
    grid = (M // tm,)

    in_specs = [
        pl.BlockSpec((tm, K), lambda i: (i, 0)),
        pl.BlockSpec((K, N), lambda i: (0, 0)),       # resident weight
        pl.BlockSpec((1, N), lambda i: (0, 0)),       # resident bias
    ]
    args = [x, w, b]
    if residual is not None:
        in_specs.append(pl.BlockSpec((tm, N), lambda i: (i, 0)))
        args.append(residual)

    return pl.pallas_call(
        functools.partial(_linear_kernel, activation=activation,
                          has_residual=residual is not None),
        grid=grid,
        in_specs=in_specs,
        out_specs=pl.BlockSpec((tm, N), lambda i: (i, 0)),
        out_shape=jax.ShapeDtypeStruct((M, N), out_dtype),
        compiler_params=pltpu.CompilerParams(
            dimension_semantics=("parallel",)),
    )(*args)


# -----------------------------------------------------------------------------
# Kernel 2: fused LayerNorm + matmul + bias (+ GELU or masked-lane sigmoid).
# K and N untiled, 1-D grid over M; LN stats computed once per row tile.
# -----------------------------------------------------------------------------
def _ln_mm_kernel(x_ref, g_ref, bln_ref, w_ref, b_ref, o_ref, *,
                  activation, sigmoid_lanes):
    x = x_ref[...].astype(jnp.float32)
    mu = jnp.mean(x, axis=-1, keepdims=True)
    var = jnp.mean(jnp.square(x - mu), axis=-1, keepdims=True)
    xn = (x - mu) * lax.rsqrt(var + 1e-5)
    xn = xn * g_ref[...] + bln_ref[...]
    y = jnp.dot(xn.astype(w_ref.dtype), w_ref[...],
                preferred_element_type=jnp.float32)
    y = y + b_ref[...].astype(jnp.float32)
    if activation == "gelu":
        y = jax.nn.gelu(y, approximate=True)
    if sigmoid_lanes is not None:
        lane = lax.broadcasted_iota(jnp.int32, y.shape, dimension=1)
        y = jnp.where(lane < sigmoid_lanes, jax.nn.sigmoid(y), y)
    o_ref[...] = y.astype(o_ref.dtype)


def ln_linear(x, g, bln, w, b, activation=None, sigmoid_lanes=None,
              out_dtype=jnp.bfloat16):
    M, K = x.shape
    _, N = w.shape
    tm = _pick_m_tile(M)
    grid = (M // tm,)
    return pl.pallas_call(
        functools.partial(_ln_mm_kernel, activation=activation,
                          sigmoid_lanes=sigmoid_lanes),
        grid=grid,
        in_specs=[
            pl.BlockSpec((tm, K), lambda i: (i, 0)),
            pl.BlockSpec((1, K), lambda i: (0, 0)),
            pl.BlockSpec((1, K), lambda i: (0, 0)),
            pl.BlockSpec((K, N), lambda i: (0, 0)),   # resident weight
            pl.BlockSpec((1, N), lambda i: (0, 0)),   # resident bias
        ],
        out_specs=pl.BlockSpec((tm, N), lambda i: (i, 0)),
        out_shape=jax.ShapeDtypeStruct((M, N), out_dtype),
        compiler_params=pltpu.CompilerParams(
            dimension_semantics=("parallel",)),
    )(x, g, bln, w, b)


# -----------------------------------------------------------------------------
# Kernel 3: attention.  One grid step per batch element processes ALL heads
# with static lane slices of the fused QKV block (layout [q heads|k heads|v heads]).
# -----------------------------------------------------------------------------
def _attn_kernel(qkv_ref, o_ref, *, num_heads, head_dim, scale):
    D = num_heads * head_dim
    outs = []
    for h in range(num_heads):                       # static unrolled head loop
        q = qkv_ref[0, :, h * head_dim:(h + 1) * head_dim]
        k = qkv_ref[0, :, D + h * head_dim:D + (h + 1) * head_dim]
        v = qkv_ref[0, :, 2 * D + h * head_dim:2 * D + (h + 1) * head_dim]
        s = lax.dot_general(q, k, (((1,), (1,)), ((), ())),
                            preferred_element_type=jnp.float32) * scale
        s = s - jnp.max(s, axis=-1, keepdims=True)
        p = jnp.exp(s)
        p = p * pl.reciprocal(jnp.sum(p, axis=-1, keepdims=True), approx=True)
        o = jnp.dot(p.astype(v.dtype), v, preferred_element_type=jnp.float32)
        outs.append(o.astype(o_ref.dtype))
    o_ref[0] = jnp.concatenate(outs, axis=-1)        # single lane-dense store


def attention_fused_heads(qkv, num_heads, out_dtype=jnp.bfloat16):
    """qkv: [B, T, 3*D] (lane layout [q | k | v], each split into heads).
    Returns [B, T, D] with heads merged in-lane -- no HBM transposes."""
    B, T, threeD = qkv.shape
    D = threeD // 3
    dh = D // num_heads
    scale = 1.0 / math.sqrt(dh)
    # TODO(synk): for production T (thousands of tokens) switch to a flash-style
    # KV-blocked online-softmax kernel (f32 [tq,dh] acc + m/l scratch in VMEM);
    # the dense TxT f32 scores won't fit v7x's 64 MiB VMEM at large T.
    return pl.pallas_call(
        functools.partial(_attn_kernel, num_heads=num_heads, head_dim=dh,
                          scale=scale),
        grid=(B,),
        in_specs=[pl.BlockSpec((1, T, 3 * D), lambda b: (b, 0, 0))],
        out_specs=pl.BlockSpec((1, T, D), lambda b: (b, 0, 0)),
        out_shape=jax.ShapeDtypeStruct((B, T, D), out_dtype),
        compiler_params=pltpu.CompilerParams(
            dimension_semantics=("parallel",)),
    )(qkv)


# -----------------------------------------------------------------------------
# Patchify / unpatchify (XLA transposes; done on bf16 to halve HBM traffic)
# -----------------------------------------------------------------------------
def patchify(x, p):
    # x: [B, V, C, H, W] -> [B, V*(H/p)*(W/p), C*p*p]
    B, V, C, H, W = x.shape
    x = x.reshape(B, V, C, H // p, p, W // p, p)
    x = x.transpose(0, 1, 3, 5, 2, 4, 6)
    return x.reshape(B, V * (H // p) * (W // p), C * p * p)


def unpatchify(tok, V, C, H, W, p):
    # tok: [B, T, C*p*p] -> [B, V, C, H, W]
    B = tok.shape[0]
    x = tok.reshape(B, V, H // p, W // p, C, p, p)
    x = x.transpose(0, 1, 4, 2, 5, 3, 6)
    return x.reshape(B, V, C, H, W)


# -----------------------------------------------------------------------------
# Transformer layer (fused LN+QKV, attention, fused-residual Wo, fused LN+W1+GELU,
# fused-residual W2)
# -----------------------------------------------------------------------------
def transformer_layer(x, lp, *, num_heads):
    Bt, T, D = x.shape
    x2 = x.reshape(Bt * T, D)
    qkv = ln_linear(x2, lp["ln1_g"], lp["ln1_b"], lp["Wqkv"], lp["bqkv"])
    attn = attention_fused_heads(qkv.reshape(Bt, T, 3 * D), num_heads)
    x2 = linear_resident(attn.reshape(Bt * T, D), lp["Wo"], lp["bo"],
                         residual=x2)
    h = ln_linear(x2, lp["ln2_g"], lp["ln2_b"], lp["W1"], lp["b1"],
                  activation="gelu")
    # TODO(synk): for deep stacks carry the residual stream in f32 between
    # kernels; bf16 carry is fine at 2 layers.
    x2 = linear_resident(h, lp["W2"], lp["b2"], residual=x2)
    return x2.reshape(Bt, T, D)


# -----------------------------------------------------------------------------
# LVSMHead forward -- target views batched (B -> B*N_tgt), source tokens
# embedded once, final LN+W_out+sigmoid fused and applied to target tokens only.
# -----------------------------------------------------------------------------
@functools.partial(jax.jit, static_argnames=("patch", "num_heads", "predict_weight"))
def _lvsm_head_compute(gs_features, src_plucker, tgt_plucker, params, *,
                       patch, num_heads, predict_weight):
    B, N_src, C_feat, H, W = gs_features.shape
    N_tgt = tgt_plucker.shape[1]
    C_in = C_feat + 6
    D = params["W_in"].shape[1]
    p2 = patch * patch
    T_per = (H // patch) * (W // patch)

    # --- source-view tokens: patchify + W_in ONCE (bf16 before the transpose) ---
    gs_feat_pl = jnp.concatenate(
        [gs_features, src_plucker], axis=2).astype(jnp.bfloat16)      # [B,Nsrc,Cin,H,W]
    src_tok = patchify(gs_feat_pl, patch)                             # [B,Tsrc,Cin*p*p]
    T_src = src_tok.shape[1]
    src_emb = linear_resident(src_tok.reshape(B * T_src, -1),
                              params["W_in"], params["b_in"])
    src_emb = src_emb.reshape(B, 1, T_src, D)

    # --- target-view tokens: zero gs features + target plucker ---
    zero_gs = jnp.zeros((B, N_tgt, C_feat, H, W), jnp.bfloat16)
    tgt_pix = jnp.concatenate(
        [zero_gs, tgt_plucker.astype(jnp.bfloat16)], axis=2)          # [B,Ntgt,Cin,H,W]
    tgt_tok = patchify(tgt_pix.reshape(B * N_tgt, 1, C_in, H, W), patch)
    tgt_emb = linear_resident(tgt_tok.reshape(B * N_tgt * T_per, -1),
                              params["W_in"], params["b_in"])
    tgt_emb = tgt_emb.reshape(B, N_tgt, T_per, D)

    # --- sequence per target view: [src tokens (token-level broadcast) | tgt tokens] ---
    x = jnp.concatenate(
        [jnp.broadcast_to(src_emb, (B, N_tgt, T_src, D)), tgt_emb], axis=2)
    Bt = B * N_tgt
    T = T_src + T_per
    x = x.reshape(Bt, T, D)

    for lp in params["layers"]:
        x = transformer_layer(x, lp, num_heads=num_heads)

    # --- final LN + W_out on TARGET tokens only, sigmoid fused on RGB lanes ---
    tgt_x = x[:, T_src:, :].reshape(Bt * T_per, D)
    out_tok = ln_linear(tgt_x, params["ln_f_g"], params["ln_f_b"],
                        params["W_out"], params["b_out"],
                        sigmoid_lanes=3 * p2, out_dtype=jnp.float32)
    C_out = params["W_out"].shape[1] // p2
    out_img = unpatchify(out_tok.reshape(Bt, T_per, -1), 1, C_out, H, W, patch)
    out_img = out_img.reshape(B, N_tgt, C_out, H, W)
    frame = out_img[:, :, :3]
    weight = out_img[:, :, 3:4] if predict_weight else None
    return frame, weight


def lvsm_head_forward(inputs, params, *, patch, num_heads, predict_weight):
    src_plucker = jnp.stack(
        [inputs["cameras_list"][idx] for idx in inputs["gs_idx"]], axis=1)
    tgt_plucker = jnp.stack(
        [inputs["cameras_list"][idx] for idx in inputs["tgt_idx"]], axis=1)
    frame, weight = _lvsm_head_compute(
        inputs["gs_features"], src_plucker, tgt_plucker, params,
        patch=patch, num_heads=num_heads, predict_weight=predict_weight)
    inputs["lvsm_prediction"] = frame
    if predict_weight:
        inputs["lvsm_weight"] = weight
    return inputs


# -----------------------------------------------------------------------------
# Deterministic parameter init (bf16 weights, f32 biases / LN params)
# -----------------------------------------------------------------------------
def init_params(key, c_in, c_out, *, patch, d_model, n_layers, d_mlp):
    def nrm(k, shape, scale=0.02):
        return (scale * jax.random.normal(k, shape, dtype=jnp.float32)
                ).astype(jnp.bfloat16)

    tok_in = c_in * patch * patch
    tok_out = c_out * patch * patch
    keys = iter(jax.random.split(key, 64))

    params = {
        "W_in": nrm(next(keys), (tok_in, d_model)),
        "b_in": jnp.zeros((1, d_model), jnp.float32),
        "ln_f_g": jnp.ones((1, d_model), jnp.float32),
        "ln_f_b": jnp.zeros((1, d_model), jnp.float32),
        "W_out": nrm(next(keys), (d_model, tok_out)),
        "b_out": jnp.zeros((1, tok_out), jnp.float32),
        "layers": [],
    }
    for _ in range(n_layers):
        params["layers"].append({
            "ln1_g": jnp.ones((1, d_model), jnp.float32),
            "ln1_b": jnp.zeros((1, d_model), jnp.float32),
            "Wqkv": nrm(next(keys), (d_model, 3 * d_model)),
            "bqkv": jnp.zeros((1, 3 * d_model), jnp.float32),
            "Wo": nrm(next(keys), (d_model, d_model)),
            "bo": jnp.zeros((1, d_model), jnp.float32),
            "ln2_g": jnp.ones((1, d_model), jnp.float32),
            "ln2_b": jnp.zeros((1, d_model), jnp.float32),
            "W1": nrm(next(keys), (d_model, d_mlp)),
            "b1": jnp.zeros((1, d_mlp), jnp.float32),
            "W2": nrm(next(keys), (d_mlp, d_model)),
            "b2": jnp.zeros((1, d_model), jnp.float32),
        })
    return params


# -----------------------------------------------------------------------------
# Pure-JAX f32 reference (same math, original un-restructured dataflow)
# -----------------------------------------------------------------------------
def _reference_forward(gs_features, src_plucker, tgt_plucker, params, *,
                       patch, num_heads):
    def ln(x, g, b):
        mu = x.mean(-1, keepdims=True)
        var = ((x - mu) ** 2).mean(-1, keepdims=True)
        return (x - mu) / jnp.sqrt(var + 1e-5) * g + b

    def dense(x, w, b):
        return x @ w.astype(jnp.float32) + b

    B, N_src, C_feat, H, W = gs_features.shape
    N_tgt = tgt_plucker.shape[1]
    gs_feat_pl = jnp.concatenate([gs_features, src_plucker], axis=2)
    C_in = gs_feat_pl.shape[2]
    zero_gs = jnp.zeros_like(gs_features[:, 0])
    tgt_emb = jnp.concatenate(
        [jnp.broadcast_to(zero_gs[:, None], (B, N_tgt, C_feat, H, W)), tgt_plucker], axis=2)
    src = jnp.broadcast_to(gs_feat_pl[:, None], (B, N_tgt, N_src, C_in, H, W))
    feats = jnp.concatenate([src, tgt_emb[:, :, None]], axis=2).reshape(
        B * N_tgt, N_src + 1, C_in, H, W)

    tok = patchify(feats, patch)
    Bt, T, _ = tok.shape
    D = params["W_in"].shape[1]
    dh = D // num_heads
    x = dense(tok.reshape(Bt * T, -1), params["W_in"], params["b_in"]).reshape(Bt, T, D)
    for lp in params["layers"]:
        xn = ln(x.reshape(Bt * T, D), lp["ln1_g"], lp["ln1_b"])
        qkv = dense(xn, lp["Wqkv"], lp["bqkv"]).reshape(Bt, T, 3, num_heads, dh)
        q, k, v = (qkv[:, :, i].transpose(0, 2, 1, 3) for i in range(3))
        s = jnp.einsum("bhqd,bhkd->bhqk", q, k) / math.sqrt(dh)
        p = jax.nn.softmax(s, axis=-1)
        o = jnp.einsum("bhqk,bhkd->bhqd", p, v).transpose(0, 2, 1, 3).reshape(Bt * T, D)
        x = x + dense(o, lp["Wo"], lp["bo"]).reshape(Bt, T, D)
        xn = ln(x.reshape(Bt * T, D), lp["ln2_g"], lp["ln2_b"])
        h = jax.nn.gelu(dense(xn, lp["W1"], lp["b1"]), approximate=True)
        x = x + dense(h, lp["W2"], lp["b2"]).reshape(Bt, T, D)
    xn = ln(x.reshape(Bt * T, D), params["ln_f_g"], params["ln_f_b"])
    out_tok = dense(xn, params["W_out"], params["b_out"])
    C_out = params["W_out"].shape[1] // (patch * patch)
    out = unpatchify(out_tok.reshape(Bt, T, -1), N_src + 1, C_out, H, W, patch)
    last = out[:, -1].reshape(B, N_tgt, -1, H, W)
    return jax.nn.sigmoid(last[:, :, :3]), last[:, :, 3:4]


# -----------------------------------------------------------------------------
# Main
# -----------------------------------------------------------------------------
if __name__ == "__main__":
    B = 2
    CH_FEATURE = 4
    H = W = 16
    N_CAMERAS = 4
    GS_IDX = [0, 1]        # source views
    TGT_IDX = [2, 3]       # target views
    PREDICT_WEIGHT = True

    # Lane-dense synthetic-transformer config: d_model=256, head_dim=128,
    # d_mlp=512, token dims (640 / 256) are multiples of 128.
    PATCH = 8
    D_MODEL = 256
    N_HEADS = 2
    N_LAYERS = 2
    D_MLP = 512

    c_in = CH_FEATURE + 6                      # matches the __init__ assert
    c_out = 3 + int(PREDICT_WEIGHT)            # matches the __init__ assert

    key = jax.random.PRNGKey(0)
    k_feat, k_cam, k_params = jax.random.split(key, 3)

    gs_features = jax.random.normal(
        k_feat, (B, len(GS_IDX), CH_FEATURE, H, W), dtype=jnp.float32)
    cam_keys = jax.random.split(k_cam, N_CAMERAS)
    cameras_list = [
        jax.random.normal(cam_keys[i], (B, 6, H, W), dtype=jnp.float32)
        for i in range(N_CAMERAS)
    ]

    params = init_params(
        k_params, c_in, c_out,
        patch=PATCH, d_model=D_MODEL, n_layers=N_LAYERS, d_mlp=D_MLP)

    inputs = {
        "gs_features": gs_features,
        "cameras_list": cameras_list,   # each entry plays the role of camera.plucker_ray
        "gs_idx": GS_IDX,
        "tgt_idx": TGT_IDX,
    }

    outputs = lvsm_head_forward(
        inputs, params,
        patch=PATCH, num_heads=N_HEADS, predict_weight=PREDICT_WEIGHT)

    pred = jax.block_until_ready(outputs["lvsm_prediction"])
    wt = jax.block_until_ready(outputs["lvsm_weight"])

    assert pred.shape == (B, len(TGT_IDX), 3, H, W), pred.shape
    assert wt.shape == (B, len(TGT_IDX), 1, H, W), wt.shape
    assert bool(jnp.all(jnp.isfinite(pred))) and bool(jnp.all(jnp.isfinite(wt)))
    assert bool(jnp.all(pred >= 0.0)) and bool(jnp.all(pred <= 1.0))

    # Numerical sanity check against a pure-JAX f32 reference (bf16 path allows
    # a loose tolerance).
    src_pl = jnp.stack([cameras_list[i] for i in GS_IDX], axis=1)
    tgt_pl = jnp.stack([cameras_list[i] for i in TGT_IDX], axis=1)
    frame_ref, weight_ref = _reference_forward(
        gs_features, src_pl, tgt_pl, params, patch=PATCH, num_heads=N_HEADS)
    err_f = float(jnp.max(jnp.abs(pred - frame_ref)))
    err_w = float(jnp.max(jnp.abs(wt - weight_ref)))
    assert err_f < 5e-2, ("prediction mismatch", err_f)
    assert err_w < 1e-1, ("weight mismatch", err_w)

    print("KERNEL_OK")
</pallas_src>

<mosaic_0001>
module attributes {stable_mosaic.version = 11 : i64} {
  func.func @_linear_kernel(%arg0: i32, %arg1: memref<8x640xbf16, #tpu.memory_space<vmem>>, %arg2: memref<640x256xbf16, #tpu.memory_space<vmem>>, %arg3: memref<1x256xf32, #tpu.memory_space<vmem>>, %arg4: memref<8x256xbf16, #tpu.memory_space<vmem>>) attributes {dimension_semantics = [#tpu.dimension_semantics<parallel>], iteration_bounds = array<i64: 2>, scalar_prefetch = 0 : i64, scratch_operands = 0 : i64, tpu.core_type = #tpu.core_type<tc>, window_params = [{transform_indices = @transform_0, window_bounds = array<i64: 8, 640>}, {pipeline_mode = #tpu.pipeline_mode<synchronous>, transform_indices = @transform_1, window_bounds = array<i64: 640, 256>}, {pipeline_mode = #tpu.pipeline_mode<synchronous>, transform_indices = @transform_2, window_bounds = array<i64: 1, 256>}, {transform_indices = @transform_3, window_bounds = array<i64: 8, 256>}]} {
    %c0 = arith.constant 0 : index
    %c0_0 = arith.constant 0 : index
    %0 = vector.load %arg1[%c0, %c0_0] : memref<8x640xbf16, #tpu.memory_space<vmem>>, vector<8x640xbf16>
    %c0_1 = arith.constant 0 : index
    %c0_2 = arith.constant 0 : index
    %1 = vector.load %arg2[%c0_1, %c0_2] : memref<640x256xbf16, #tpu.memory_space<vmem>>, vector<640x256xbf16>
    %cst = arith.constant dense<0.000000e+00> : vector<8x256xf32>
    %2 = tpu.matmul %0, %1, %cst {dimension_numbers = #tpu.dot_dimension_numbers<[1], [0], [0], [1], [0, 0, 1, 1], [], []>} : vector<8x640xbf16>, vector<640x256xbf16>, vector<8x256xf32> -> vector<8x256xf32>
    %c0_3 = arith.constant 0 : index
    %c0_4 = arith.constant 0 : index
    %3 = vector.load %arg3[%c0_3, %c0_4] : memref<1x256xf32, #tpu.memory_space<vmem>>, vector<1x256xf32>
    %4 = vector.broadcast %3 : vector<1x256xf32> to vector<8x256xf32>
    %5 = arith.addf %2, %4 : vector<8x256xf32>
    %6 = arith.truncf %5 : vector<8x256xf32> to vector<8x256xbf16>
    %c0_5 = arith.constant 0 : index
    %c0_6 = arith.constant 0 : index
    %7 = vector.load %arg4[%c0_5, %c0_6] : memref<8x256xbf16, #tpu.memory_space<vmem>>, vector<8x256xbf16>
    tpu.vector_store %arg4[%c0_5, %c0_6], %6 {strides = array<i32>} : memref<8x256xbf16, #tpu.memory_space<vmem>>, vector<8x256xbf16>,
    return
  }
  func.func @transform_0(%arg0: i32) -> (i32, i32) {
    %c0_i32 = arith.constant 0 : i32
    %c0_i32_0 = arith.constant 0 : i32
    return %arg0, %c0_i32 : i32, i32
  }
  func.func @transform_1(%arg0: i32) -> (i32, i32) {
    %c0_i32 = arith.constant 0 : i32
    %c0_i32_0 = arith.constant 0 : i32
    %c0_i32_1 = arith.constant 0 : i32
    return %c0_i32, %c0_i32_0 : i32, i32
  }
  func.func @transform_2(%arg0: i32) -> (i32, i32) {
    %c0_i32 = arith.constant 0 : i32
    %c0_i32_0 = arith.constant 0 : i32
    %c0_i32_1 = arith.constant 0 : i32
    return %c0_i32, %c0_i32_0 : i32, i32
  }
  func.func @transform_3(%arg0: i32) -> (i32, i32) {
    %c0_i32 = arith.constant 0 : i32
    %c0_i32_0 = arith.constant 0 : i32
    return %arg0, %c0_i32 : i32, i32
  }
}

module attributes {stable_mosaic.version = 11 : i64} {
  func.func @_ln_mm_kernel(%arg0: i32, %arg1: memref<24x256xbf16, #tpu.memory_space<vmem>>, %arg2: memref<1x256xf32, #tpu.memory_space<vmem>>, %arg3: memref<1x256xf32, #tpu.memory_space<vmem>>, %arg4: memref<256x768xbf16, #tpu.memory_space<vmem>>, %arg5: memref<1x768xf32, #tpu.memory_space<vmem>>, %arg6: memref<24x768xbf16, #tpu.memory_space<vmem>>) attributes {dimension_semantics = [#tpu.dimension_semantics<parallel>], iteration_bounds = array<i64: 2>, scalar_prefetch = 0 : i64, scratch_operands = 0 : i64, tpu.core_type = #tpu.core_type<tc>, window_params = [{transform_indices = @transform_0, window_bounds = array<i64: 24, 256>}, {pipeline_mode = #tpu.pipeline_mode<synchronous>, transform_indices = @transform_1, window_bounds = array<i64: 1, 256>}, {pipeline_mode = #tpu.pipeline_mode<synchronous>, transform_indices = @transform_2, window_bounds = array<i64: 1, 256>}, {pipeline_mode = #tpu.pipeline_mode<synchronous>, transform_indices = @transform_3, window_bounds = array<i64: 256, 768>}, {pipeline_mode = #tpu.pipeline_mode<synchronous>, transform_indices = @transform_4, window_bounds = array<i64: 1, 768>}, {transform_indices = @transform_5, window_bounds = array<i64: 24, 768>}]} {
    %c0 = arith.constant 0 : index
    %c0_0 = arith.constant 0 : index
    %0 = vector.load %arg1[%c0, %c0_0] : memref<24x256xbf16, #tpu.memory_space<vmem>>, vector<24x256xbf16>
    %1 = arith.extf %0 : vector<24x256xbf16> to vector<24x256xf32>
    %cst = arith.constant dense<0.000000e+00> : vector<24xf32>
    %2 = vector.multi_reduction <add>, %1, %cst [1] : vector<24x256xf32> to vector<24xf32>
    %3 = vector.shape_cast %2 : vector<24xf32> to vector<24x1xf32>
    %cst_1 = arith.constant 2.560000e+02 : f32
    %4 = vector.broadcast %cst_1 : f32 to vector<24x1xf32>
    %5 = arith.divf %3, %4 : vector<24x1xf32>
    %6 = vector.broadcast %5 : vector<24x1xf32> to vector<24x256xf32>
    %7 = arith.subf %1, %6 : vector<24x256xf32>
    %8 = arith.mulf %7, %7 : vector<24x256xf32>
    %cst_2 = arith.constant dense<0.000000e+00> : vector<24xf32>
    %9 = vector.multi_reduction <add>, %8, %cst_2 [1] : vector<24x256xf32> to vector<24xf32>
    %10 = vector.shape_cast %9 : vector<24xf32> to vector<24x1xf32>
    %cst_3 = arith.constant 2.560000e+02 : f32
    %11 = vector.broadcast %cst_3 : f32 to vector<24x1xf32>
    %12 = arith.divf %10, %11 : vector<24x1xf32>
    %13 = vector.broadcast %5 : vector<24x1xf32> to vector<24x256xf32>
    %14 = arith.subf %1, %13 : vector<24x256xf32>
    %cst_4 = arith.constant 9.99999974E-6 : f32
    %15 = vector.broadcast %cst_4 : f32 to vector<24x1xf32>
    %16 = arith.addf %12, %15 : vector<24x1xf32>
    %17 = math.rsqrt %16 : vector<24x1xf32>
    %18 = vector.broadcast %17 : vector<24x1xf32> to vector<24x256xf32>
    %19 = arith.mulf %14, %18 : vector<24x256xf32>
    %c0_5 = arith.constant 0 : index
    %c0_6 = arith.constant 0 : index
    %20 = vector.load %arg2[%c0_5, %c0_6] : memref<1x256xf32, #tpu.memory_space<vmem>>, vector<1x256xf32>
    %21 = vector.broadcast %20 : vector<1x256xf32> to vector<24x256xf32>
    %22 = arith.mulf %19, %21 : vector<24x256xf32>
    %c0_7 = arith.constant 0 : index
    %c0_8 = arith.constant 0 : index
    %23 = vector.load %arg3[%c0_7, %c0_8] : memref<1x256xf32, #tpu.memory_space<vmem>>, vector<1x256xf32>
    %24 = vector.broadcast %23 : vector<1x256xf32> to vector<24x256xf32>
    %25 = arith.addf %22, %24 : vector<24x256xf32>
    %26 = arith.truncf %25 : vector<24x256xf32> to vector<24x256xbf16>
    %c0_9 = arith.constant 0 : index
    %c0_10 = arith.constant 0 : index
    %27 = vector.load %arg4[%c0_9, %c0_10] : memref<256x768xbf16, #tpu.memory_space<vmem>>, vector<256x768xbf16>
    %cst_11 = arith.constant dense<0.000000e+00> : vector<24x768xf32>
    %28 = tpu.matmul %26, %27, %cst_11 {dimension_numbers = #tpu.dot_dimension_numbers<[1], [0], [0], [1], [0, 0, 1, 1], [], []>} : vector<24x256xbf16>, vector<256x768xbf16>, vector<24x768xf32> -> vector<24x768xf32>
    %c0_12 = arith.constant 0 : index
    %c0_13 = arith.constant 0 : index
    %29 = vector.load %arg5[%c0_12, %c0_13] : memref<1x768xf32, #tpu.memory_space<vmem>>, vector<1x768xf32>
    %30 = vector.broadcast %29 : vector<1x768xf32> to vector<24x768xf32>
    %31 = arith.addf %28, %30 : vector<24x768xf32>
    %32 = arith.truncf %31 : vector<24x768xf32> to vector<24x768xbf16>
    %c0_14 = arith.constant 0 : index
    %c0_15 = arith.constant 0 : index
    %33 = vector.load %arg6[%c0_14, %c0_15] : memref<24x768xbf16, #tpu.memory_space<vmem>>, vector<24x768xbf16>
    tpu.vector_store %arg6[%c0_14, %c0_15], %32 {strides = array<i32>} : memref<24x768xbf16, #tpu.memory_space<vmem>>, vector<24x768xbf16>,
    return
  }
  func.func @transform_0(%arg0: i32) -> (i32, i32) {
    %c0_i32 = arith.constant 0 : i32
    %c0_i32_0 = arith.constant 0 : i32
    return %arg0, %c0_i32 : i32, i32
  }
  func.func @transform_1(%arg0: i32) -> (i32, i32) {
    %c0_i32 = arith.constant 0 : i32
    %c0_i32_0 = arith.constant 0 : i32
    %c0_i32_1 = arith.constant 0 : i32
    return %c0_i32, %c0_i32_0 : i32, i32
  }
  func.func @transform_2(%arg0: i32) -> (i32, i32) {
    %c0_i32 = arith.constant 0 : i32
    %c0_i32_0 = arith.constant 0 : i32
    %c0_i32_1 = arith.constant 0 : i32
    return %c0_i32, %c0_i32_0 : i32, i32
  }
  func.func @transform_3(%arg0: i32) -> (i32, i32) {
    %c0_i32 = arith.constant 0 : i32
    %c0_i32_0 = arith.constant 0 : i32
    %c0_i32_1 = arith.constant 0 : i32
    return %c0_i32, %c0_i32_0 : i32, i32
  }
  func.func @transform_4(%arg0: i32) -> (i32, i32) {
    %c0_i32 = arith.constant 0 : i32
    %c0_i32_0 = arith.constant 0 : i32
    %c0_i32_1 = arith.constant 0 : i32
    return %c0_i32, %c0_i32_0 : i32, i32
  }
  func.func @transform_5(%arg0: i32) -> (i32, i32) {
    %c0_i32 = arith.constant 0 : i32
    %c0_i32_0 = arith.constant 0 : i32
    return %arg0, %c0_i32 : i32, i32
  }
}

module attributes {stable_mosaic.version = 11 : i64} {
  func.func @_attn_kernel(%arg0: i32, %arg1: memref<1x12x768xbf16, #tpu.memory_space<vmem>>, %arg2: memref<1x12x256xbf16, #tpu.memory_space<vmem>>) attributes {dimension_semantics = [#tpu.dimension_semantics<parallel>], iteration_bounds = array<i64: 4>, scalar_prefetch = 0 : i64, scratch_operands = 0 : i64, tpu.core_type = #tpu.core_type<tc>, window_params = [{transform_indices = @transform_0, window_bounds = array<i64: 1, 12, 768>}, {transform_indices = @transform_1, window_bounds = array<i64: 1, 12, 256>}]} {
    %c0 = arith.constant 0 : index
    %c0_0 = arith.constant 0 : index
    %c0_1 = arith.constant 0 : index
    %0 = vector.load %arg1[%c0, %c0_0, %c0_1] : memref<1x12x768xbf16, #tpu.memory_space<vmem>>, vector<1x12x128xbf16>
    %1 = vector.shape_cast %0 : vector<1x12x128xbf16> to vector<12x128xbf16>
    %c0_2 = arith.constant 0 : index
    %c0_3 = arith.constant 0 : index
    %c256 = arith.constant 256 : index
    %2 = vector.load %arg1[%c0_2, %c0_3, %c256] : memref<1x12x768xbf16, #tpu.memory_space<vmem>>, vector<1x12x128xbf16>
    %3 = vector.shape_cast %2 : vector<1x12x128xbf16> to vector<12x128xbf16>
    %c0_4 = arith.constant 0 : index
    %c0_5 = arith.constant 0 : index
    %c512 = arith.constant 512 : index
    %4 = vector.load %arg1[%c0_4, %c0_5, %c512] : memref<1x12x768xbf16, #tpu.memory_space<vmem>>, vector<1x12x128xbf16>
    %5 = vector.shape_cast %4 : vector<1x12x128xbf16> to vector<12x128xbf16>
    %cst = arith.constant dense<0.000000e+00> : vector<12x12xf32>
    %6 = tpu.matmul %1, %3, %cst {dimension_numbers = #tpu.dot_dimension_numbers<[1], [1], [0], [0], [0, 0, 1, 0], [], []>} : vector<12x128xbf16>, vector<12x128xbf16>, vector<12x12xf32> -> vector<12x12xf32>
    %cst_6 = arith.constant 0.0883883461 : f32
    %7 = vector.broadcast %cst_6 : f32 to vector<12x12xf32>
    %8 = arith.mulf %6, %7 : vector<12x12xf32>
    %cst_7 = arith.constant dense<0xFF800000> : vector<12xf32>
    %9 = vector.multi_reduction <maximumf>, %8, %cst_7 [1] : vector<12x12xf32> to vector<12xf32>
    %10 = vector.shape_cast %9 : vector<12xf32> to vector<12x1xf32>
    %11 = vector.broadcast %10 : vector<12x1xf32> to vector<12x12xf32>
    %12 = arith.subf %8, %11 : vector<12x12xf32>
    %13 = math.exp %12 : vector<12x12xf32>
    %cst_8 = arith.constant dense<0.000000e+00> : vector<12xf32>
    %14 = vector.multi_reduction <add>, %13, %cst_8 [1] : vector<12x12xf32> to vector<12xf32>
    %15 = vector.shape_cast %14 : vector<12xf32> to vector<12x1xf32>
    %16 = tpu.reciprocal %15 {approx = true} : vector<12x1xf32> -> vector<12x1xf32>
    %17 = vector.broadcast %16 : vector<12x1xf32> to vector<12x12xf32>
    %18 = arith.mulf %13, %17 : vector<12x12xf32>
    %19 = arith.truncf %18 : vector<12x12xf32> to vector<12x12xbf16>
    %cst_9 = arith.constant dense<0.000000e+00> : vector<12x128xf32>
    %20 = tpu.matmul %19, %5, %cst_9 {dimension_numbers = #tpu.dot_dimension_numbers<[1], [0], [0], [1], [0, 0, 1, 1], [], []>} : vector<12x12xbf16>, vector<12x128xbf16>, vector<12x128xf32> -> vector<12x128xf32>
    %21 = arith.truncf %20 : vector<12x128xf32> to vector<12x128xbf16>
    %c0_10 = arith.constant 0 : index
    %c0_11 = arith.constant 0 : index
    %c128 = arith.constant 128 : index
    %22 = vector.load %arg1[%c0_10, %c0_11, %c128] : memref<1x12x768xbf16, #tpu.memory_space<vmem>>, vector<1x12x128xbf16>
    %23 = vector.shape_cast %22 : vector<1x12x128xbf16> to vector<12x128xbf16>
    %c0_12 = arith.constant 0 : index
    %c0_13 = arith.constant 0 : index
    %c384 = arith.constant 384 : index
    %24 = vector.load %arg1[%c0_12, %c0_13, %c384] : memref<1x12x768xbf16, #tpu.memory_space<vmem>>, vector<1x12x128xbf16>
    %25 = vector.shape_cast %24 : vector<1x12x128xbf16> to vector<12x128xbf16>
    %c0_14 = arith.constant 0 : index
    %c0_15 = arith.constant 0 : index
    %c640 = arith.constant 640 : index
    %26 = vector.load %arg1[%c0_14, %c0_15, %c640] : memref<1x12x768xbf16, #tpu.memory_space<vmem>>, vector<1x12x128xbf16>
    %27 = vector.shape_cast %26 : vector<1x12x128xbf16> to vector<12x128xbf16>
    %cst_16 = arith.constant dense<0.000000e+00> : vector<12x12xf32>
    %28 = tpu.matmul %23, %25, %cst_16 {dimension_numbers = #tpu.dot_dimension_numbers<[1], [1], [0], [0], [0, 0, 1, 0], [], []>} : vector<12x128xbf16>, vector<12x128xbf16>, vector<12x12xf32> -> vector<12x12xf32>
    %cst_17 = arith.constant 0.0883883461 : f32
    %29 = vector.broadcast %cst_17 : f32 to vector<12x12xf32>
    %30 = arith.mulf %28, %29 : vector<12x12xf32>
    %cst_18 = arith.constant dense<0xFF800000> : vector<12xf32>
    %31 = vector.multi_reduction <maximumf>, %30, %cst_18 [1] : vector<12x12xf32> to vector<12xf32>
    %32 = vector.shape_cast %31 : vector<12xf32> to vector<12x1xf32>
    %33 = vector.broadcast %32 : vector<12x1xf32> to vector<12x12xf32>
    %34 = arith.subf %30, %33 : vector<12x12xf32>
    %35 = math.exp %34 : vector<12x12xf32>
    %cst_19 = arith.constant dense<0.000000e+00> : vector<12xf32>
    %36 = vector.multi_reduction <add>, %35, %cst_19 [1] : vector<12x12xf32> to vector<12xf32>
    %37 = vector.shape_cast %36 : vector<12xf32> to vector<12x1xf32>
    %38 = tpu.reciprocal %37 {approx = true} : vector<12x1xf32> -> vector<12x1xf32>
    %39 = vector.broadcast %38 : vector<12x1xf32> to vector<12x12xf32>
    %40 = arith.mulf %35, %39 : vector<12x12xf32>
    %41 = arith.truncf %40 : vector<12x12xf32> to vector<12x12xbf16>
    %cst_20 = arith.constant dense<0.000000e+00> : vector<12x128xf32>
    %42 = tpu.matmul %41, %27, %cst_20 {dimension_numbers = #tpu.dot_dimension_numbers<[1], [0], [0], [1], [0, 0, 1, 1], [], []>} : vector<12x12xbf16>, vector<12x128xbf16>, vector<12x128xf32> -> vector<12x128xf32>
    %43 = arith.truncf %42 : vector<12x128xf32> to vector<12x128xbf16>
    %44 = tpu.concatenate %21, %43 in 1 : vector<12x128xbf16>, vector<12x128xbf16> -> vector<12x256xbf16>
    %c0_21 = arith.constant 0 : index
    %c0_22 = arith.constant 0 : index
    %c0_23 = arith.constant 0 : index
    %45 = vector.load %arg2[%c0_21, %c0_22, %c0_23] : memref<1x12x256xbf16, #tpu.memory_space<vmem>>, vector<1x12x256xbf16>
    %46 = vector.shape_cast %45 : vector<1x12x256xbf16> to vector<12x256xbf16>
    %47 = vector.shape_cast %44 : vector<12x256xbf16> to vector<1x12x256xbf16>
    tpu.vector_store %arg2[%c0_21, %c0_22, %c0_23], %47 {strides = array<i32>} : memref<1x12x256xbf16, #tpu.memory_space<vmem>>, vector<1x12x256xbf16>,
    return
  }
  func.func @transform_0(%arg0: i32) -> (i32, i32, i32) {
    %c0_i32 = arith.constant 0 : i32
    %c0_i32_0 = arith.constant 0 : i32
    %c0_i32_1 = arith.constant 0 : i32
    return %arg0, %c0_i32, %c0_i32_0 : i32, i32, i32
  }
  func.func @transform_1(%arg0: i32) -> (i32, i32, i32) {
    %c0_i32 = arith.constant 0 : i32
    %c0_i32_0 = arith.constant 0 : i32
    %c0_i32_1 = arith.constant 0 : i32
    return %arg0, %c0_i32, %c0_i32_0 : i32, i32, i32
  }
}

module attributes {stable_mosaic.version = 11 : i64} {
  func.func @_linear_kernel(%arg0: i32, %arg1: memref<24x256xbf16, #tpu.memory_space<vmem>>, %arg2: memref<256x256xbf16, #tpu.memory_space<vmem>>, %arg3: memref<1x256xf32, #tpu.memory_space<vmem>>, %arg4: memref<24x256xbf16, #tpu.memory_space<vmem>>, %arg5: memref<24x256xbf16, #tpu.memory_space<vmem>>) attributes {dimension_semantics = [#tpu.dimension_semantics<parallel>], iteration_bounds = array<i64: 2>, scalar_prefetch = 0 : i64, scratch_operands = 0 : i64, tpu.core_type = #tpu.core_type<tc>, window_params = [{transform_indices = @transform_0, window_bounds = array<i64: 24, 256>}, {pipeline_mode = #tpu.pipeline_mode<synchronous>, transform_indices = @transform_1, window_bounds = array<i64: 256, 256>}, {pipeline_mode = #tpu.pipeline_mode<synchronous>, transform_indices = @transform_2, window_bounds = array<i64: 1, 256>}, {transform_indices = @transform_3, window_bounds = array<i64: 24, 256>}, {transform_indices = @transform_4, window_bounds = array<i64: 24, 256>}]} {
    %c0 = arith.constant 0 : index
    %c0_0 = arith.constant 0 : index
    %0 = vector.load %arg1[%c0, %c0_0] : memref<24x256xbf16, #tpu.memory_space<vmem>>, vector<24x256xbf16>
    %c0_1 = arith.constant 0 : index
    %c0_2 = arith.constant 0 : index
    %1 = vector.load %arg2[%c0_1, %c0_2] : memref<256x256xbf16, #tpu.memory_space<vmem>>, vector<256x256xbf16>
    %cst = arith.constant dense<0.000000e+00> : vector<24x256xf32>
    %2 = tpu.matmul %0, %1, %cst {dimension_numbers = #tpu.dot_dimension_numbers<[1], [0], [0], [1], [0, 0, 1, 1], [], []>} : vector<24x256xbf16>, vector<256x256xbf16>, vector<24x256xf32> -> vector<24x256xf32>
    %c0_3 = arith.constant 0 : index
    %c0_4 = arith.constant 0 : index
    %3 = vector.load %arg3[%c0_3, %c0_4] : memref<1x256xf32, #tpu.memory_space<vmem>>, vector<1x256xf32>
    %4 = vector.broadcast %3 : vector<1x256xf32> to vector<24x256xf32>
    %5 = arith.addf %2, %4 : vector<24x256xf32>
    %c0_5 = arith.constant 0 : index
    %c0_6 = arith.constant 0 : index
    %6 = vector.load %arg4[%c0_5, %c0_6] : memref<24x256xbf16, #tpu.memory_space<vmem>>, vector<24x256xbf16>
    %7 = arith.extf %6 : vector<24x256xbf16> to vector<24x256xf32>
    %8 = arith.addf %5, %7 : vector<24x256xf32>
    %9 = arith.truncf %8 : vector<24x256xf32> to vector<24x256xbf16>
    %c0_7 = arith.constant 0 : index
    %c0_8 = arith.constant 0 : index
    %10 = vector.load %arg5[%c0_7, %c0_8] : memref<24x256xbf16, #tpu.memory_space<vmem>>, vector<24x256xbf16>
    tpu.vector_store %arg5[%c0_7, %c0_8], %9 {strides = array<i32>} : memref<24x256xbf16, #tpu.memory_space<vmem>>, vector<24x256xbf16>,
    return
  }
  func.func @transform_0(%arg0: i32) -> (i32, i32) {
    %c0_i32 = arith.constant 0 : i32
    %c0_i32_0 = arith.constant 0 : i32
    return %arg0, %c0_i32 : i32, i32
  }
  func.func @transform_1(%arg0: i32) -> (i32, i32) {
    %c0_i32 = arith.constant 0 : i32
    %c0_i32_0 = arith.constant 0 : i32
    %c0_i32_1 = arith.constant 0 : i32
    return %c0_i32, %c0_i32_0 : i32, i32
  }
  func.func @transform_2(%arg0: i32) -> (i32, i32) {
    %c0_i32 = arith.constant 0 : i32
    %c0_i32_0 = arith.constant 0 : i32
    %c0_i32_1 = arith.constant 0 : i32
    return %c0_i32, %c0_i32_0 : i32, i32
  }
  func.func @transform_3(%arg0: i32) -> (i32, i32) {
    %c0_i32 = arith.constant 0 : i32
    %c0_i32_0 = arith.constant 0 : i32
    return %arg0, %c0_i32 : i32, i32
  }
  func.func @transform_4(%arg0: i32) -> (i32, i32) {
    %c0_i32 = arith.constant 0 : i32
    %c0_i32_0 = arith.constant 0 : i32
    return %arg0, %c0_i32 : i32, i32
  }
}

module attributes {stable_mosaic.version = 11 : i64} {
  func.func @_ln_mm_kernel(%arg0: i32, %arg1: memref<24x256xbf16, #tpu.memory_space<vmem>>, %arg2: memref<1x256xf32, #tpu.memory_space<vmem>>, %arg3: memref<1x256xf32, #tpu.memory_space<vmem>>, %arg4: memref<256x512xbf16, #tpu.memory_space<vmem>>, %arg5: memref<1x512xf32, #tpu.memory_space<vmem>>, %arg6: memref<24x512xbf16, #tpu.memory_space<vmem>>) attributes {dimension_semantics = [#tpu.dimension_semantics<parallel>], iteration_bounds = array<i64: 2>, scalar_prefetch = 0 : i64, scratch_operands = 0 : i64, tpu.core_type = #tpu.core_type<tc>, window_params = [{transform_indices = @transform_0, window_bounds = array<i64: 24, 256>}, {pipeline_mode = #tpu.pipeline_mode<synchronous>, transform_indices = @transform_1, window_bounds = array<i64: 1, 256>}, {pipeline_mode = #tpu.pipeline_mode<synchronous>, transform_indices = @transform_2, window_bounds = array<i64: 1, 256>}, {pipeline_mode = #tpu.pipeline_mode<synchronous>, transform_indices = @transform_3, window_bounds = array<i64: 256, 512>}, {pipeline_mode = #tpu.pipeline_mode<synchronous>, transform_indices = @transform_4, window_bounds = array<i64: 1, 512>}, {transform_indices = @transform_5, window_bounds = array<i64: 24, 512>}]} {
    %c0 = arith.constant 0 : index
    %c0_0 = arith.constant 0 : index
    %0 = vector.load %arg1[%c0, %c0_0] : memref<24x256xbf16, #tpu.memory_space<vmem>>, vector<24x256xbf16>
    %1 = arith.extf %0 : vector<24x256xbf16> to vector<24x256xf32>
    %cst = arith.constant dense<0.000000e+00> : vector<24xf32>
    %2 = vector.multi_reduction <add>, %1, %cst [1] : vector<24x256xf32> to vector<24xf32>
    %3 = vector.shape_cast %2 : vector<24xf32> to vector<24x1xf32>
    %cst_1 = arith.constant 2.560000e+02 : f32
    %4 = vector.broadcast %cst_1 : f32 to vector<24x1xf32>
    %5 = arith.divf %3, %4 : vector<24x1xf32>
    %6 = vector.broadcast %5 : vector<24x1xf32> to vector<24x256xf32>
    %7 = arith.subf %1, %6 : vector<24x256xf32>
    %8 = arith.mulf %7, %7 : vector<24x256xf32>
    %cst_2 = arith.constant dense<0.000000e+00> : vector<24xf32>
    %9 = vector.multi_reduction <add>, %8, %cst_2 [1] : vector<24x256xf32> to vector<24xf32>
    %10 = vector.shape_cast %9 : vector<24xf32> to vector<24x1xf32>
    %cst_3 = arith.constant 2.560000e+02 : f32
    %11 = vector.broadcast %cst_3 : f32 to vector<24x1xf32>
    %12 = arith.divf %10, %11 : vector<24x1xf32>
    %13 = vector.broadcast %5 : vector<24x1xf32> to vector<24x256xf32>
    %14 = arith.subf %1, %13 : vector<24x256xf32>
    %cst_4 = arith.constant 9.99999974E-6 : f32
    %15 = vector.broadcast %cst_4 : f32 to vector<24x1xf32>
    %16 = arith.addf %12, %15 : vector<24x1xf32>
    %17 = math.rsqrt %16 : vector<24x1xf32>
    %18 = vector.broadcast %17 : vector<24x1xf32> to vector<24x256xf32>
    %19 = arith.mulf %14, %18 : vector<24x256xf32>
    %c0_5 = arith.constant 0 : index
    %c0_6 = arith.constant 0 : index
    %20 = vector.load %arg2[%c0_5, %c0_6] : memref<1x256xf32, #tpu.memory_space<vmem>>, vector<1x256xf32>
    %21 = vector.broadcast %20 : vector<1x256xf32> to vector<24x256xf32>
    %22 = arith.mulf %19, %21 : vector<24x256xf32>
    %c0_7 = arith.constant 0 : index
    %c0_8 = arith.constant 0 : index
    %23 = vector.load %arg3[%c0_7, %c0_8] : memref<1x256xf32, #tpu.memory_space<vmem>>, vector<1x256xf32>
    %24 = vector.broadcast %23 : vector<1x256xf32> to vector<24x256xf32>
    %25 = arith.addf %22, %24 : vector<24x256xf32>
    %26 = arith.truncf %25 : vector<24x256xf32> to vector<24x256xbf16>
    %c0_9 = arith.constant 0 : index
    %c0_10 = arith.constant 0 : index
    %27 = vector.load %arg4[%c0_9, %c0_10] : memref<256x512xbf16, #tpu.memory_space<vmem>>, vector<256x512xbf16>
    %cst_11 = arith.constant dense<0.000000e+00> : vector<24x512xf32>
    %28 = tpu.matmul %26, %27, %cst_11 {dimension_numbers = #tpu.dot_dimension_numbers<[1], [0], [0], [1], [0, 0, 1, 1], [], []>} : vector<24x256xbf16>, vector<256x512xbf16>, vector<24x512xf32> -> vector<24x512xf32>
    %c0_12 = arith.constant 0 : index
    %c0_13 = arith.constant 0 : index
    %29 = vector.load %arg5[%c0_12, %c0_13] : memref<1x512xf32, #tpu.memory_space<vmem>>, vector<1x512xf32>
    %30 = vector.broadcast %29 : vector<1x512xf32> to vector<24x512xf32>
    %31 = arith.addf %28, %30 : vector<24x512xf32>
    %32 = arith.mulf %31, %31 : vector<24x512xf32>
    %33 = arith.mulf %31, %32 : vector<24x512xf32>
    %cst_14 = arith.constant 4.471500e-02 : f32
    %34 = vector.broadcast %cst_14 : f32 to vector<24x512xf32>
    %35 = arith.mulf %34, %33 : vector<24x512xf32>
    %36 = arith.addf %31, %35 : vector<24x512xf32>
    %cst_15 = arith.constant 0.797884583 : f32
    %37 = vector.broadcast %cst_15 : f32 to vector<24x512xf32>
    %38 = arith.mulf %37, %36 : vector<24x512xf32>
    %39 = math.tanh %38 : vector<24x512xf32>
    %cst_16 = arith.constant 1.000000e+00 : f32
    %40 = vector.broadcast %cst_16 : f32 to vector<24x512xf32>
    %41 = arith.addf %40, %39 : vector<24x512xf32>
    %cst_17 = arith.constant 5.000000e-01 : f32
    %42 = vector.broadcast %cst_17 : f32 to vector<24x512xf32>
    %43 = arith.mulf %42, %41 : vector<24x512xf32>
    %44 = arith.mulf %31, %43 : vector<24x512xf32>
    %45 = arith.truncf %44 : vector<24x512xf32> to vector<24x512xbf16>
    %c0_18 = arith.constant 0 : index
    %c0_19 = arith.constant 0 : index
    %46 = vector.load %arg6[%c0_18, %c0_19] : memref<24x512xbf16, #tpu.memory_space<vmem>>, vector<24x512xbf16>
    tpu.vector_store %arg6[%c0_18, %c0_19], %45 {strides = array<i32>} : memref<24x512xbf16, #tpu.memory_space<vmem>>, vector<24x512xbf16>,
    return
  }
  func.func @transform_0(%arg0: i32) -> (i32, i32) {
    %c0_i32 = arith.constant 0 : i32
    %c0_i32_0 = arith.constant 0 : i32
    return %arg0, %c0_i32 : i32, i32
  }
  func.func @transform_1(%arg0: i32) -> (i32, i32) {
    %c0_i32 = arith.constant 0 : i32
    %c0_i32_0 = arith.constant 0 : i32
    %c0_i32_1 = arith.constant 0 : i32
    return %c0_i32, %c0_i32_0 : i32, i32
  }
  func.func @transform_2(%arg0: i32) -> (i32, i32) {
    %c0_i32 = arith.constant 0 : i32
    %c0_i32_0 = arith.constant 0 : i32
    %c0_i32_1 = arith.constant 0 : i32
    return %c0_i32, %c0_i32_0 : i32, i32
  }
  func.func @transform_3(%arg0: i32) -> (i32, i32) {
    %c0_i32 = arith.constant 0 : i32
    %c0_i32_0 = arith.constant 0 : i32
    %c0_i32_1 = arith.constant 0 : i32
    return %c0_i32, %c0_i32_0 : i32, i32
  }
  func.func @transform_4(%arg0: i32) -> (i32, i32) {
    %c0_i32 = arith.constant 0 : i32
    %c0_i32_0 = arith.constant 0 : i32
    %c0_i32_1 = arith.constant 0 : i32
    return %c0_i32, %c0_i32_0 : i32, i32
  }
  func.func @transform_5(%arg0: i32) -> (i32, i32) {
    %c0_i32 = arith.constant 0 : i32
    %c0_i32_0 = arith.constant 0 : i32
    return %arg0, %c0_i32 : i32, i32
  }
}

module attributes {stable_mosaic.version = 11 : i64} {
  func.func @_linear_kernel(%arg0: i32, %arg1: memref<24x512xbf16, #tpu.memory_space<vmem>>, %arg2: memref<512x256xbf16, #tpu.memory_space<vmem>>, %arg3: memref<1x256xf32, #tpu.memory_space<vmem>>, %arg4: memref<24x256xbf16, #tpu.memory_space<vmem>>, %arg5: memref<24x256xbf16, #tpu.memory_space<vmem>>) attributes {dimension_semantics = [#tpu.dimension_semantics<parallel>], iteration_bounds = array<i64: 2>, scalar_prefetch = 0 : i64, scratch_operands = 0 : i64, tpu.core_type = #tpu.core_type<tc>, window_params = [{transform_indices = @transform_0, window_bounds = array<i64: 24, 512>}, {pipeline_mode = #tpu.pipeline_mode<synchronous>, transform_indices = @transform_1, window_bounds = array<i64: 512, 256>}, {pipeline_mode = #tpu.pipeline_mode<synchronous>, transform_indices = @transform_2, window_bounds = array<i64: 1, 256>}, {transform_indices = @transform_3, window_bounds = array<i64: 24, 256>}, {transform_indices = @transform_4, window_bounds = array<i64: 24, 256>}]} {
    %c0 = arith.constant 0 : index
    %c0_0 = arith.constant 0 : index
    %0 = vector.load %arg1[%c0, %c0_0] : memref<24x512xbf16, #tpu.memory_space<vmem>>, vector<24x512xbf16>
    %c0_1 = arith.constant 0 : index
    %c0_2 = arith.constant 0 : index
    %1 = vector.load %arg2[%c0_1, %c0_2] : memref<512x256xbf16, #tpu.memory_space<vmem>>, vector<512x256xbf16>
    %cst = arith.constant dense<0.000000e+00> : vector<24x256xf32>
    %2 = tpu.matmul %0, %1, %cst {dimension_numbers = #tpu.dot_dimension_numbers<[1], [0], [0], [1], [0, 0, 1, 1], [], []>} : vector<24x512xbf16>, vector<512x256xbf16>, vector<24x256xf32> -> vector<24x256xf32>
    %c0_3 = arith.constant 0 : index
    %c0_4 = arith.constant 0 : index
    %3 = vector.load %arg3[%c0_3, %c0_4] : memref<1x256xf32, #tpu.memory_space<vmem>>, vector<1x256xf32>
    %4 = vector.broadcast %3 : vector<1x256xf32> to vector<24x256xf32>
    %5 = arith.addf %2, %4 : vector<24x256xf32>
    %c0_5 = arith.constant 0 : index
    %c0_6 = arith.constant 0 : index
    %6 = vector.load %arg4[%c0_5, %c0_6] : memref<24x256xbf16, #tpu.memory_space<vmem>>, vector<24x256xbf16>
    %7 = arith.extf %6 : vector<24x256xbf16> to vector<24x256xf32>
    %8 = arith.addf %5, %7 : vector<24x256xf32>
    %9 = arith.truncf %8 : vector<24x256xf32> to vector<24x256xbf16>
    %c0_7 = arith.constant 0 : index
    %c0_8 = arith.constant 0 : index
    %10 = vector.load %arg5[%c0_7, %c0_8] : memref<24x256xbf16, #tpu.memory_space<vmem>>, vector<24x256xbf16>
    tpu.vector_store %arg5[%c0_7, %c0_8], %9 {strides = array<i32>} : memref<24x256xbf16, #tpu.memory_space<vmem>>, vector<24x256xbf16>,
    return
  }
  func.func @transform_0(%arg0: i32) -> (i32, i32) {
    %c0_i32 = arith.constant 0 : i32
    %c0_i32_0 = arith.constant 0 : i32
    return %arg0, %c0_i32 : i32, i32
  }
  func.func @transform_1(%arg0: i32) -> (i32, i32) {
    %c0_i32 = arith.constant 0 : i32
    %c0_i32_0 = arith.constant 0 : i32
    %c0_i32_1 = arith.constant 0 : i32
    return %c0_i32, %c0_i32_0 : i32, i32
  }
  func.func @transform_2(%arg0: i32) -> (i32, i32) {
    %c0_i32 = arith.constant 0 : i32
    %c0_i32_0 = arith.constant 0 : i32
    %c0_i32_1 = arith.constant 0 : i32
    return %c0_i32, %c0_i32_0 : i32, i32
  }
  func.func @transform_3(%arg0: i32) -> (i32, i32) {
    %c0_i32 = arith.constant 0 : i32
    %c0_i32_0 = arith.constant 0 : i32
    return %arg0, %c0_i32 : i32, i32
  }
  func.func @transform_4(%arg0: i32) -> (i32, i32) {
    %c0_i32 = arith.constant 0 : i32
    %c0_i32_0 = arith.constant 0 : i32
    return %arg0, %c0_i32 : i32, i32
  }
}

module attributes {stable_mosaic.version = 11 : i64} {
  func.func @_ln_mm_kernel(%arg0: i32, %arg1: memref<8x256xbf16, #tpu.memory_space<vmem>>, %arg2: memref<1x256xf32, #tpu.memory_space<vmem>>, %arg3: memref<1x256xf32, #tpu.memory_space<vmem>>, %arg4: memref<256x256xbf16, #tpu.memory_space<vmem>>, %arg5: memref<1x256xf32, #tpu.memory_space<vmem>>, %arg6: memref<8x256xf32, #tpu.memory_space<vmem>>) attributes {dimension_semantics = [#tpu.dimension_semantics<parallel>], iteration_bounds = array<i64: 2>, scalar_prefetch = 0 : i64, scratch_operands = 0 : i64, tpu.core_type = #tpu.core_type<tc>, window_params = [{transform_indices = @transform_0, window_bounds = array<i64: 8, 256>}, {pipeline_mode = #tpu.pipeline_mode<synchronous>, transform_indices = @transform_1, window_bounds = array<i64: 1, 256>}, {pipeline_mode = #tpu.pipeline_mode<synchronous>, transform_indices = @transform_2, window_bounds = array<i64: 1, 256>}, {pipeline_mode = #tpu.pipeline_mode<synchronous>, transform_indices = @transform_3, window_bounds = array<i64: 256, 256>}, {pipeline_mode = #tpu.pipeline_mode<synchronous>, transform_indices = @transform_4, window_bounds = array<i64: 1, 256>}, {transform_indices = @transform_5, window_bounds = array<i64: 8, 256>}]} {
    %c0 = arith.constant 0 : index
    %c0_0 = arith.constant 0 : index
    %0 = vector.load %arg1[%c0, %c0_0] : memref<8x256xbf16, #tpu.memory_space<vmem>>, vector<8x256xbf16>
    %1 = arith.extf %0 : vector<8x256xbf16> to vector<8x256xf32>
    %cst = arith.constant dense<0.000000e+00> : vector<8xf32>
    %2 = vector.multi_reduction <add>, %1, %cst [1] : vector<8x256xf32> to vector<8xf32>
    %3 = vector.shape_cast %2 : vector<8xf32> to vector<8x1xf32>
    %cst_1 = arith.constant 2.560000e+02 : f32
    %4 = vector.broadcast %cst_1 : f32 to vector<8x1xf32>
    %5 = arith.divf %3, %4 : vector<8x1xf32>
    %6 = vector.broadcast %5 : vector<8x1xf32> to vector<8x256xf32>
    %7 = arith.subf %1, %6 : vector<8x256xf32>
    %8 = arith.mulf %7, %7 : vector<8x256xf32>
    %cst_2 = arith.constant dense<0.000000e+00> : vector<8xf32>
    %9 = vector.multi_reduction <add>, %8, %cst_2 [1] : vector<8x256xf32> to vector<8xf32>
    %10 = vector.shape_cast %9 : vector<8xf32> to vector<8x1xf32>
    %cst_3 = arith.constant 2.560000e+02 : f32
    %11 = vector.broadcast %cst_3 : f32 to vector<8x1xf32>
    %12 = arith.divf %10, %11 : vector<8x1xf32>
    %13 = vector.broadcast %5 : vector<8x1xf32> to vector<8x256xf32>
    %14 = arith.subf %1, %13 : vector<8x256xf32>
    %cst_4 = arith.constant 9.99999974E-6 : f32
    %15 = vector.broadcast %cst_4 : f32 to vector<8x1xf32>
    %16 = arith.addf %12, %15 : vector<8x1xf32>
    %17 = math.rsqrt %16 : vector<8x1xf32>
    %18 = vector.broadcast %17 : vector<8x1xf32> to vector<8x256xf32>
    %19 = arith.mulf %14, %18 : vector<8x256xf32>
    %c0_5 = arith.constant 0 : index
    %c0_6 = arith.constant 0 : index
    %20 = vector.load %arg2[%c0_5, %c0_6] : memref<1x256xf32, #tpu.memory_space<vmem>>, vector<1x256xf32>
    %21 = vector.broadcast %20 : vector<1x256xf32> to vector<8x256xf32>
    %22 = arith.mulf %19, %21 : vector<8x256xf32>
    %c0_7 = arith.constant 0 : index
    %c0_8 = arith.constant 0 : index
    %23 = vector.load %arg3[%c0_7, %c0_8] : memref<1x256xf32, #tpu.memory_space<vmem>>, vector<1x256xf32>
    %24 = vector.broadcast %23 : vector<1x256xf32> to vector<8x256xf32>
    %25 = arith.addf %22, %24 : vector<8x256xf32>
    %26 = arith.truncf %25 : vector<8x256xf32> to vector<8x256xbf16>
    %c0_9 = arith.constant 0 : index
    %c0_10 = arith.constant 0 : index
    %27 = vector.load %arg4[%c0_9, %c0_10] : memref<256x256xbf16, #tpu.memory_space<vmem>>, vector<256x256xbf16>
    %cst_11 = arith.constant dense<0.000000e+00> : vector<8x256xf32>
    %28 = tpu.matmul %26, %27, %cst_11 {dimension_numbers = #tpu.dot_dimension_numbers<[1], [0], [0], [1], [0, 0, 1, 1], [], []>} : vector<8x256xbf16>, vector<256x256xbf16>, vector<8x256xf32> -> vector<8x256xf32>
    %c0_12 = arith.constant 0 : index
    %c0_13 = arith.constant 0 : index
    %29 = vector.load %arg5[%c0_12, %c0_13] : memref<1x256xf32, #tpu.memory_space<vmem>>, vector<1x256xf32>
    %30 = vector.broadcast %29 : vector<1x256xf32> to vector<8x256xf32>
    %31 = arith.addf %28, %30 : vector<8x256xf32>
    %32 = tpu.iota {dimensions = array<i32: 1>} : vector<8x256xi32>
    %c192_i32 = arith.constant 192 : i32
    %33 = vector.broadcast %c192_i32 : i32 to vector<8x256xi32>
    %34 = arith.cmpi slt, %32, %33 : vector<8x256xi32>
    %35 = arith.negf %31 : vector<8x256xf32>
    %36 = math.exp %35 : vector<8x256xf32>
    %cst_14 = arith.constant 1.000000e+00 : f32
    %37 = vector.broadcast %cst_14 : f32 to vector<8x256xf32>
    %38 = arith.addf %37, %36 : vector<8x256xf32>
    %39 = arith.divf %37, %38 : vector<8x256xf32>
    %40 = arith.select %34, %39, %31 : vector<8x256xi1>, vector<8x256xf32>
    %c0_15 = arith.constant 0 : index
    %c0_16 = arith.constant 0 : index
    %41 = vector.load %arg6[%c0_15, %c0_16] : memref<8x256xf32, #tpu.memory_space<vmem>>, vector<8x256xf32>
    tpu.vector_store %arg6[%c0_15, %c0_16], %40 {strides = array<i32>} : memref<8x256xf32, #tpu.memory_space<vmem>>, vector<8x256xf32>,
    return
  }
  func.func @transform_0(%arg0: i32) -> (i32, i32) {
    %c0_i32 = arith.constant 0 : i32
    %c0_i32_0 = arith.constant 0 : i32
    return %arg0, %c0_i32 : i32, i32
  }
  func.func @transform_1(%arg0: i32) -> (i32, i32) {
    %c0_i32 = arith.constant 0 : i32
    %c0_i32_0 = arith.constant 0 : i32
    %c0_i32_1 = arith.constant 0 : i32
    return %c0_i32, %c0_i32_0 : i32, i32
  }
  func.func @transform_2(%arg0: i32) -> (i32, i32) {
    %c0_i32 = arith.constant 0 : i32
    %c0_i32_0 = arith.constant 0 : i32
    %c0_i32_1 = arith.constant 0 : i32
    return %c0_i32, %c0_i32_0 : i32, i32
  }
  func.func @transform_3(%arg0: i32) -> (i32, i32) {
    %c0_i32 = arith.constant 0 : i32
    %c0_i32_0 = arith.constant 0 : i32
    %c0_i32_1 = arith.constant 0 : i32
    return %c0_i32, %c0_i32_0 : i32, i32
  }
  func.func @transform_4(%arg0: i32) -> (i32, i32) {
    %c0_i32 = arith.constant 0 : i32
    %c0_i32_0 = arith.constant 0 : i32
    %c0_i32_1 = arith.constant 0 : i32
    return %c0_i32, %c0_i32_0 : i32, i32
  }
  func.func @transform_5(%arg0: i32) -> (i32, i32) {
    %c0_i32 = arith.constant 0 : i32
    %c0_i32_0 = arith.constant 0 : i32
    return %arg0, %c0_i32 : i32, i32
  }
}

</mosaic_0001>

<bundles_post_ra>
// kernel: _lvsm_head_compute.13
= control target key start
LH: loop header
LB: loop body
LE: loop exit
PB: predicated region body
PF: predicated region fallthrough
CT: control target
= control target key end

     0   :  { %s1142_s12 = smov 0   ;;  %s1421_s0 = inlined_call_operand.vmem [shape: bf16[16,640], index: 0, kind: input, shape index: {}]   ;;  %s1422_s1 = inlined_call_operand.vmem [shape: bf16[640,256], index: 1, kind: input, shape index: {}]   ;;  %s1423_s2 = inlined_call_operand.vmem [shape: f32[1,256], index: 2, kind: input, shape index: {}]   ;;  %s1424_s3 = inlined_call_operand.vmem [shape: bf16[16,256], index: 3, kind: output, shape index: {}]  }
   0x1 LB: > { %s872_s13 = sadd.s32 4294967295, %s1119_s12   ;;  %p876_p0 = scmp.ge.s32.totalorder %s1119_s12, 1  ;;  %s1119_s12 = sphi %s1142_s12, %s13_s12  }
   0x2   : > { %p137_p1 = scmp.lt.s32.totalorder %s1119_s12, 3 }
   0x4   : > { %p138_p2 = pnand %p876_p0, %p137_p1 }
   0x5   : > { %v988_v0 = vld [vmem:[%s1422_s1 + $0x104] ss:$8 sps:$4 sm:$0xff] (!%p138_p2)   ;;  %v990_v1 = vld [vmem:[%s1422_s1 + $0x100] ss:$8 sps:$4 sm:$0xff] (!%p138_p2)   ;;  %v991_v2 = vld [vmem:[%s1422_s1 + $0x114] ss:$8 sps:$4 sm:$0xff] (!%p138_p2)  }
   0x6   : > { %141 = sbr.rel (%p138_p2) target bundleno = 320 (0x140), region = 32  ;;  %726 = vmatprep.subr.bf16.mxu0 (!%p138_p2), %v988_v0  ;;  %v993_v3 = vld [vmem:[%s1422_s1 + $0x110] ss:$8 sps:$4 sm:$0xff] (!%p138_p2)   ;;  %v994_v4 = vld [vmem:[%s1422_s1 + $0x124] ss:$8 sps:$4 sm:$0xff] (!%p138_p2)   ;;  %p161_p3 = scmp.lt.s32.totalorder (!%p138_p2), %s872_s13, 1 }
   0x7   : > { %727 = vmatpush1.bf16.msra.mxu0 (!%p138_p2), %v990_v1  ;;  %v996_v5 = vld [vmem:[%s1422_s1 + $0x120] ss:$8 sps:$4 sm:$0xff] (!%p138_p2)   ;;  %v997_v6 = vld [vmem:[%s1422_s1 + $0x134] ss:$8 sps:$4 sm:$0xff] (!%p138_p2)   ;;  %v1009_v7 = vld [vmem:[%s1422_s1 + $0x4] ss:$8 sps:$4 sm:$0xff] (!%p138_p2)  }
   0x8   : > { %728 = vmatprep.subr.bf16.mxu0 (!%p138_p2), %v991_v2  ;;  %v1011_v8 = vld [vmem:[%s1422_s1] ss:$8 sps:$4 sm:$0xff] (!%p138_p2)   ;;  %v999_v9 = vld [vmem:[%s1422_s1 + $0x130] ss:$8 sps:$4 sm:$0xff] (!%p138_p2)   ;;  %v1000_v10 = vld [vmem:[%s1422_s1 + $0x144] ss:$8 sps:$4 sm:$0xff] (!%p138_p2)   ;;  %685 = vmatprep.subr.bf16.mxu1 (!%p138_p2), %v1009_v7 }
   0x9   : > { %v1015_v11 = vld [vmem:[%s1422_s1 + $0x14] ss:$8 sps:$4 sm:$0xff] (!%p138_p2)   ;;  %686 = vmatpush1.bf16.msra.mxu1 (!%p138_p2), %v1011_v8  ;;  %v1017_v12 = vld [vmem:[%s1422_s1 + $0x10] ss:$8 sps:$4 sm:$0xff] (!%p138_p2)   ;;  %v1002_v13 = vld [vmem:[%s1422_s1 + $0x140] ss:$8 sps:$4 sm:$0xff] (!%p138_p2)  }
   0xa   : > { %687 = vmatprep.subr.bf16.mxu1 (!%p138_p2), %v1015_v11  ;;  %v1021_v14 = vld [vmem:[%s1422_s1 + $0x24] ss:$8 sps:$4 sm:$0xff] (!%p138_p2)   ;;  %v1003_v15 = vld [vmem:[%s1422_s1 + $0x154] ss:$8 sps:$4 sm:$0xff] (!%p138_p2)   ;;  %v1023_v16 = vld [vmem:[%s1422_s1 + $0x20] ss:$8 sps:$4 sm:$0xff] (!%p138_p2)  }
   0xb   : > { %729 = vmatpush1.bf16.msra.mxu0 (!%p138_p2), %v993_v3  ;;  %v1027_v17 = vld [vmem:[%s1422_s1 + $0x34] ss:$8 sps:$4 sm:$0xff] (!%p138_p2)   ;;  %v1005_v18 = vld [vmem:[%s1422_s1 + $0x150] ss:$8 sps:$4 sm:$0xff] (!%p138_p2)   ;;  %v1006_v19 = vld [vmem:[%s1422_s1 + $0x164] ss:$8 sps:$4 sm:$0xff] (!%p138_p2)  }
   0xc   : > { %730 = vmatprep.subr.bf16.mxu0 (!%p138_p2), %v994_v4  ;;  %v1029_v20 = vld [vmem:[%s1422_s1 + $0x30] ss:$8 sps:$4 sm:$0xff] (!%p138_p2)   ;;  %v1033_v21 = vld [vmem:[%s1422_s1 + $0x44] ss:$8 sps:$4 sm:$0xff] (!%p138_p2)   ;;  %v1008_v22 = vld [vmem:[%s1422_s1 + $0x160] ss:$8 sps:$4 sm:$0xff] (!%p138_p2)  }
   0xd   : > { %688 = vmatpush1.bf16.msra.mxu1 %v1017_v12  ;;  %s1426_s13 = smov (!%p161_p3, %s872_s13), 1  ;;  %v1012_v23 = vld [vmem:[%s1422_s1 + $0x174] ss:$8 sps:$4 sm:$0xff]   ;;  %v1035_v24 = vld [vmem:[%s1422_s1 + $0x40] ss:$8 sps:$4 sm:$0xff]   ;;  %v1121_v8 = vmov 0  }
   0xe   : > { %689 = vmatprep.subr.bf16.mxu1 %v1021_v14  ;;  %v1039_v25 = vld [vmem:[%s1422_s1 + $0x54] ss:$8 sps:$4 sm:$0xff]   ;;  %v1014_v26 = vld [vmem:[%s1422_s1 + $0x170] ss:$8 sps:$4 sm:$0xff]   ;;  %s978_s18 = smul.u32 20, %s1426_s13 }
   0xf   : > { %731 = vmatpush1.bf16.msra.mxu0 %v996_v5  ;;  %v1018_v27 = vld [vmem:[%s1422_s1 + $0x184] ss:$8 sps:$4 sm:$0xff]   ;;  %v1041_v28 = vld [vmem:[%s1422_s1 + $0x50] ss:$8 sps:$4 sm:$0xff]   ;;  %v1020_v30 = vld [vmem:[%s1422_s1 + $0x180] ss:$8 sps:$4 sm:$0xff]  }
  0x10   : > { %732 = vmatprep.subr.bf16.mxu0 %v997_v6  ;;  %v1045_v29 = vld [vmem:[%s1422_s1 + $0x64] ss:$8 sps:$4 sm:$0xff]   ;;  %s1253_s29 = scalar_lea.vmem %s1421_s0, %s978_s18  ;;  %v1024_v31 = vld [vmem:[%s1422_s1 + $0x194] ss:$8 sps:$4 sm:$0xff]   ;;  %v1047_v32 = vld [vmem:[%s1422_s1 + $0x60] ss:$8 sps:$4 sm:$0xff]  }
  0x11   : > { %690 = vmatpush1.bf16.msra.mxu1 %v1023_v16  ;;  %v1051_v33 = vld [vmem:[%s1422_s1 + $0x74] ss:$8 sps:$4 sm:$0xff]   ;;  %v1265_v34 = vld [vmem:[%s1253_s29 + $0x8] sm:$0xff]  ;;  %v1026_v35 = vld [vmem:[%s1422_s1 + $0x190] ss:$8 sps:$4 sm:$0xff]  }
  0x12   : > { %691 = vmatprep.subr.bf16.mxu1 %v1027_v17  ;;  %v883_v36 = vcombine.high %v1265_v34, %v1265_v34  ;;  %v1030_v37 = vld [vmem:[%s1422_s1 + $0x1a4] ss:$8 sps:$4 sm:$0xff]   ;;  %v1053_v38 = vld [vmem:[%s1422_s1 + $0x70] ss:$8 sps:$4 sm:$0xff]   ;;  %v1032_v40 = vld [vmem:[%s1422_s1 + $0x1a0] ss:$8 sps:$4 sm:$0xff]   ;;  %v882_v1 = vcombine.low %v1265_v34, %v1265_v34 }
  0x13   : > { %733 = vmatpush1.bf16.msra.mxu0 %v999_v9  ;;  %v1057_v39 = vld [vmem:[%s1422_s1 + $0x84] ss:$8 sps:$4 sm:$0xff]   ;;  %v1036_v41 = vld [vmem:[%s1422_s1 + $0x1b4] ss:$8 sps:$4 sm:$0xff]   ;;  %v1059_v42 = vld [vmem:[%s1422_s1 + $0x80] ss:$8 sps:$4 sm:$0xff]  }
  0x14   : > { %734 = vmatprep.subr.bf16.mxu0 %v1000_v10  ;;  %758 = vmatprep.mubr.bf16.mxu0 %v883_v36  ;;  %v1063_v43 = vld [vmem:[%s1422_s1 + $0x94] ss:$8 sps:$4 sm:$0xff]   ;;  %v1038_v44 = vld [vmem:[%s1422_s1 + $0x1b0] ss:$8 sps:$4 sm:$0xff]   ;;  %v1042_v45 = vld [vmem:[%s1422_s1 + $0x1c4] ss:$8 sps:$4 sm:$0xff]  }
  0x15   : > { %692 = vmatpush1.bf16.msra.mxu1 %v1029_v20  ;;  %v1065_v46 = vld [vmem:[%s1422_s1 + $0x90] ss:$8 sps:$4 sm:$0xff]   ;;  %v1072_v47 = vld [vmem:[%s1422_s1 + $0xa4] ss:$8 sps:$4 sm:$0xff]   ;;  %v1044_v48 = vld [vmem:[%s1422_s1 + $0x1c0] ss:$8 sps:$4 sm:$0xff]  }
  0x16   : > { %693 = vmatprep.subr.bf16.mxu1 %v1033_v21  ;;  %v1048_v49 = vld [vmem:[%s1422_s1 + $0x1d4] ss:$8 sps:$4 sm:$0xff]   ;;  %v1074_v50 = vld [vmem:[%s1422_s1 + $0xa0] ss:$8 sps:$4 sm:$0xff]   ;;  %v1050_v52 = vld [vmem:[%s1422_s1 + $0x1d0] ss:$8 sps:$4 sm:$0xff]  }
  0x17   : > { %735 = vmatpush1.bf16.msra.mxu0 %v1002_v13  ;;  %v1078_v51 = vld [vmem:[%s1422_s1 + $0xb4] ss:$8 sps:$4 sm:$0xff]   ;;  %v1054_v53 = vld [vmem:[%s1422_s1 + $0x1e4] ss:$8 sps:$4 sm:$0xff]   ;;  %v1080_v54 = vld [vmem:[%s1422_s1 + $0xb0] ss:$8 sps:$4 sm:$0xff]  }
  0x18   : > { %736 = vmatprep.subr.bf16.mxu0 %v1003_v15  ;;  %v172_v55 = vld [vmem:[%s1253_s29] sm:$0xff]  ;;  %v1060_v59 = vld [vmem:[%s1422_s1 + $0x1f4] ss:$8 sps:$4 sm:$0xff]   ;;  %v1062_v62 = vld [vmem:[%s1422_s1 + $0x1f0] ss:$8 sps:$4 sm:$0xff]  }
  0x19   : > { %694 = vmatpush1.bf16.msra.mxu1 %v1035_v24  ;;  %v1084_v56 = vld [vmem:[%s1422_s1 + $0xc4] ss:$8 sps:$4 sm:$0xff]   ;;  %v881_v57 = vcombine.high %v172_v55, %v172_v55  ;;  %v1056_v58 = vld [vmem:[%s1422_s1 + $0x1e0] ss:$8 sps:$4 sm:$0xff]   ;;  %v1090_v61 = vld [vmem:[%s1422_s1 + $0xd4] ss:$8 sps:$4 sm:$0xff]   ;;  %v880_v13 = vcombine.low %v172_v55, %v172_v55 }
  0x1a   : > { %695 = vmatprep.subr.bf16.mxu1 %v1039_v25  ;;  %v1086_v60 = vld [vmem:[%s1422_s1 + $0xc0] ss:$8 sps:$4 sm:$0xff]   ;;  %v1071_v63 = vld [vmem:[%s1422_s1 + $0x204] ss:$8 sps:$4 sm:$0xff]   ;;  %v1092_v0 = vld [vmem:[%s1422_s1 + $0xd0] ss:$8 sps:$4 sm:$0xff]  }
  0x1b   : > { %737 = vmatpush1.bf16.msra.mxu0 %v1005_v18  ;;  %717 = vmatprep.mubr.bf16.mxu1 %v881_v57  ;;  %v1096_v2 = vld [vmem:[%s1422_s1 + $0xe4] ss:$8 sps:$4 sm:$0xff]   ;;  %v1069_v3 = vld [vmem:[%s1422_s1 + $0x200] ss:$8 sps:$4 sm:$0xff]   ;;  %v1077_v4 = vld [vmem:[%s1422_s1 + $0x214] ss:$8 sps:$4 sm:$0xff]  }
  0x1c   : > { %738 = vmatprep.subr.bf16.mxu0 %v1006_v19  ;;  %v1098_v5 = vld [vmem:[%s1422_s1 + $0xe0] ss:$8 sps:$4 sm:$0xff]   ;;  %v1102_v6 = vld [vmem:[%s1422_s1 + $0xf4] ss:$8 sps:$4 sm:$0xff]   ;;  %v1075_v7 = vld [vmem:[%s1422_s1 + $0x210] ss:$8 sps:$4 sm:$0xff]  }
  0x1d   : > { %696 = vmatpush1.bf16.msra.mxu1 %v1041_v28  ;;  %v1083_v9 = vld [vmem:[%s1422_s1 + $0x224] ss:$8 sps:$4 sm:$0xff]   ;;  %v1104_v10 = vld [vmem:[%s1422_s1 + $0xf0] ss:$8 sps:$4 sm:$0xff]   ;;  %v1081_v11 = vld [vmem:[%s1422_s1 + $0x220] ss:$8 sps:$4 sm:$0xff]  }
  0x1e   : > { %697 = vmatprep.subr.bf16.mxu1 %v1045_v29  ;;  %v1089_v12 = vld [vmem:[%s1422_s1 + $0x234] ss:$8 sps:$4 sm:$0xff]   ;;  %v1087_v14 = vld [vmem:[%s1422_s1 + $0x230] ss:$8 sps:$4 sm:$0xff]   ;;  %v1095_v15 = vld [vmem:[%s1422_s1 + $0x244] ss:$8 sps:$4 sm:$0xff]  }
  0x1f   : > { %739 = vmatpush1.bf16.msra.mxu0 %v1008_v22  ;;  %v1093_v16 = vld [vmem:[%s1422_s1 + $0x240] ss:$8 sps:$4 sm:$0xff]   ;;  %v1101_v17 = vld [vmem:[%s1422_s1 + $0x254] ss:$8 sps:$4 sm:$0xff]   ;;  %v1099_v18 = vld [vmem:[%s1422_s1 + $0x250] ss:$8 sps:$4 sm:$0xff]  }
  0x20   : > { %740 = vmatprep.subr.bf16.mxu0 %v1012_v23  ;;  %v1107_v19 = vld [vmem:[%s1422_s1 + $0x264] ss:$8 sps:$4 sm:$0xff]   ;;  %v1105_v20 = vld [vmem:[%s1422_s1 + $0x260] ss:$8 sps:$4 sm:$0xff]   ;;  %v1112_v21 = vld [vmem:[%s1422_s1 + $0x274] ss:$8 sps:$4 sm:$0xff]  }
  0x21   : > { %698 = vmatpush1.bf16.msra.mxu1 %v1047_v32  ;;  %v1110_v22 = vld [vmem:[%s1422_s1 + $0x270] ss:$8 sps:$4 sm:$0xff]  }
  0x22   : > { %699 = vmatprep.subr.bf16.mxu1 %v1051_v33  ;;  %v1068_v23 = vld [vmem:[%s1253_s29 + $0x10] ss:$0 sps:$4 sm:$0xff]   ;;  %s968_s29 = sshll.u32 %s1426_s13, 3 }
  0x23   : > { %741 = vmatpush1.bf16.msra.mxu0 %v1014_v26  ;;  %s170_s9 = scalar_lea.vmem %s1424_s3, %s968_s29 }
  0x24   : > { %742 = vmatprep.subr.bf16.mxu0 %v1018_v27  ;;  %v257_v27 = vlaneseq }
  0x25   : > { %700 = vmatpush1.bf16.msra.mxu1 %v1053_v38 }
  0x26   : > { %701 = vmatprep.subr.bf16.mxu1 %v1057_v39  ;;  %v258_v29 = vshrl.u32 %v257_v27, 7 }
  0x27   : > { %743 = vmatpush1.bf16.msra.mxu0 %v1020_v30 }
  0x28   : > { %744 = vmatprep.subr.bf16.mxu0 %v1024_v31  ;;  %v259_v30 = vsub.s32 0, %v258_v29  ;;  %v255_v31 = vld [vmem:[%s1423_s2] sm:$0x3]  ;;  %v263_v32 = vsub.s32 1, %v258_v29 }
  0x29   : > { %702 = vmatpush1.bf16.msra.mxu1 %v1059_v42 }
  0x2a   : > { %703 = vmatprep.subr.bf16.mxu1 %v1063_v43  ;;  %v260_v33 = vrot.slane %v255_v31, %v259_v30  ;;  %v264_v34 = vrot.slane %v255_v31, %v263_v32 }
  0x2b   : > { %745 = vmatpush1.bf16.msra.mxu0 %v1026_v35 }
  0x2c   : > { %746 = vmatprep.subr.bf16.mxu0 %v1030_v37 }
  0x2d   : > { %704 = vmatpush1.bf16.msra.mxu1 %v1065_v46 }
  0x2e   : > { %705 = vmatprep.subr.bf16.mxu1 %v1072_v47 }
  0x2f   : > { %747 = vmatpush1.bf16.msra.mxu0 %v1032_v40 }
  0x30   : > { %748 = vmatprep.subr.bf16.mxu0 %v1036_v41 }
  0x31   : > { %706 = vmatpush1.bf16.msra.mxu1 %v1074_v50 }
  0x32   : > { %707 = vmatprep.subr.bf16.mxu1 %v1078_v51 }
  0x33   : > { %749 = vmatpush1.bf16.msra.mxu0 %v1038_v44 }
  0x34   : > { %750 = vmatprep.subr.bf16.mxu0 %v1042_v45 }
  0x35   : > { %708 = vmatpush1.bf16.msra.mxu1 %v1080_v54 }
  0x36   : > { %709 = vmatprep.subr.bf16.mxu1 %v1084_v56 }
  0x37   : > { %751 = vmatpush1.bf16.msra.mxu0 %v1044_v48 }
  0x38   : > { %752 = vmatprep.subr.bf16.mxu0 %v1048_v49 }
  0x39   : > { %710 = vmatpush1.bf16.msra.mxu1 %v1086_v60 }
  0x3a   : > { %711 = vmatprep.subr.bf16.mxu1 %v1090_v61 }
  0x3b   : > { %753 = vmatpush1.bf16.msra.mxu0 %v1050_v52 }
  0x3c   : > { %754 = vmatprep.subr.bf16.mxu0 %v1054_v53 }
  0x3d   : > { %712 = vmatpush1.bf16.msra.mxu1 %v1092_v0 }
  0x3e   : > { %713 = vmatprep.subr.bf16.mxu1 %v1096_v2 }
  0x3f   : > { %755 = vmatpush1.bf16.msra.mxu0 %v1056_v58 }
  0x40   : > { %756 = vmatprep.subr.bf16.mxu0 %v1060_v59 }
  0x41   : > { %714 = vmatpush1.bf16.msra.mxu1 %v1098_v5 }
  0x42   : > { %715 = vmatprep.subr.bf16.mxu1 %v1102_v6 }
  0x43   : > { %757 = vmatpush1.bf16.msra.mxu0 %v1062_v62 }
  0x44   : > { %767 = vmatprep.subr.bf16.mxu0 %v1071_v63 }
  0x45   : > { %716 = vmatpush1.bf16.msra.mxu1 %v1104_v10 }
  0x46   : > { %759 = vmatmul.mubr.bf16.vlgmr.msra.gmra.mrb[0].mxu0 %v882_v1 }
  0x47   : > { %768 = vmatpush1.bf16.msra.mxu0 %v1069_v3  ;;  %799 = vmatprep.mubr.bf16.mxu0 %v1121_v8 }
  0x48   : > { %769 = vmatprep.subr.bf16.mxu0 %v1077_v4  ;;  %718 = vmatmul.mubr.bf16.vlgmr.msra.gmra.mrb[0].mxu1 %v880_v13 }
  0x4b   : > { %770 = vmatpush1.bf16.msra.mxu0 %v1075_v7 }
  0x4c   : > { %771 = vmatprep.subr.bf16.mxu0 %v1083_v9 }
  0x4f   : > { %772 = vmatpush1.bf16.msra.mxu0 %v1081_v11 }
  0x50   : > { %773 = vmatprep.subr.bf16.mxu0 %v1089_v12 }
  0x53   : > { %774 = vmatpush1.bf16.msra.mxu0 %v1087_v14 }
  0x54   : > { %775 = vmatprep.subr.bf16.mxu0 %v1095_v15 }
  0x57   : > { %776 = vmatpush1.bf16.msra.mxu0 %v1093_v16 }
  0x58   : > { %777 = vmatprep.subr.bf16.mxu0 %v1101_v17 }
  0x5b   : > { %778 = vmatpush1.bf16.msra.mxu0 %v1099_v18 }
  0x5c   : > { %779 = vmatprep.subr.bf16.mxu0 %v1107_v19 }
  0x5f   : > { %780 = vmatpush1.bf16.msra.mxu0 %v1105_v20 }
  0x60   : > { %781 = vmatprep.subr.bf16.mxu0 %v1112_v21 }
  0x63   : > { %782 = vmatpush1.bf16.msra.mxu0 %v1110_v22 }
  0x66   : > { %800 = vmatmul.mubr.bf16.vlgmr.msra.gmra.mrb[0].mxu0 %v1068_v23 }
 0x11b   : > { %v719_v24 = vpop.f32.mrb[0].mxu1 }
 0x11c   : > { %v721_v25 = vpop.f32.mrb[1].mxu1  ;;  %v720_v35 = vadd.f32 %v719_v24, %v260_v33 }
 0x11d   : > { %v723_v26 = vpop.f32.mrb[2].mxu1  ;;  %v722_v36 = vadd.f32 %v721_v25, %v264_v34 }
 0x11e   : > { %v724_v28 = vpop.f32.mrb[3].mxu1 }
 0x139   : > { %v801_v37 = vpop.f32.mrb[0].mxu0 }
 0x13a   : > { %v971_v38 = vadd.f32 %v801_v37, %v720_v35  ;;  %v803_v39 = vpop.f32.mrb[1].mxu0 }
 0x13b   : > { %v973_v40 = vadd.f32 %v803_v39, %v722_v36  ;;  %v805_v41 = vpop.f32.mrb[2].mxu0 }
 0x13c   : > { %v806_v42 = vpop.f32.mrb[3].mxu0 }
 0x13d   : > { %v969_v43 = vpack.c.bf16 %v973_v40, %v971_v38 }
 0x13f   : > { %816 = vst [vmem:[%s170_s9] sm:$0xff] %v969_v43 }
 0x140 PF: > { %s13_s12 = sadd.s32 1, %s1119_s12  }
 0x141   : > { %p10_p4 = scmp.ge.s32.totalorder %s13_s12, 4  }
 0x143   :  { %12 = sbr.rel (!%p10_p4) target bundleno = 1 (0x1), region = 62 }

// kernel: _lvsm_head_compute.15
= control target key start
LH: loop header
LB: loop body
LE: loop exit
PB: predicated region body
PF: predicated region fallthrough
CT: control target
= control target key end

     0   :  { %s1573_s18 = smov 0   ;;  %s1996_s0 = inlined_call_operand.vmem [shape: bf16[48,256], index: 0, kind: input, shape index: {}]   ;;  %s1997_s1 = inlined_call_operand.vmem [shape: f32[1,256], index: 1, kind: input, shape index: {}]   ;;  %s1998_s2 = inlined_call_operand.vmem [shape: f32[1,256], index: 2, kind: input, shape index: {}]   ;;  %s1999_s3 = inlined_call_operand.vmem [shape: bf16[256,768], index: 3, kind: input, shape index: {}]   ;;  %s2000_s4 = inlined_call_operand.vmem [shape: f32[1,768], index: 4, kind: input, shape index: {}]   ;;  %s2001_s5 = inlined_call_operand.vmem [shape: bf16[48,768], index: 5, kind: output, shape index: {}]  }
   0x1 LB: > { %s1219_s19 = sadd.s32 4294967295, %s1541_s18   ;;  %p1223_p0 = scmp.ge.s32.totalorder %s1541_s18, 1  ;;  %s1541_s18 = sphi %s1573_s18, %s15_s18  }
   0x2   : > { %p189_p1 = scmp.lt.s32.totalorder %s1541_s18, 3 }
   0x4   : > { %p190_p2 = pnand %p1223_p0, %p189_p1 }
   0x5   : > { %s219_s20 = smul.u32 (!%p190_p2), 3, %s1219_s19  ;;  %v1385_v12 = vld [vmem:[%s1999_s3 + $0x4] ss:$24 sps:$4 sm:$0xff] (!%p190_p2)   ;;  %v1389_v14 = vld [vmem:[%s1999_s3] ss:$24 sps:$4 sm:$0xff] (!%p190_p2)  }
   0x6   : > { %193 = sbr.rel (%p190_p2) target bundleno = 626 (0x272), region = 40  ;;  %v1387_v13 = vld [vmem:[%s1999_s3 + $0xc] ss:$24 sps:$4 sm:$0xff] (!%p190_p2)   ;;  %v1390_v15 = vld [vmem:[%s1999_s3 + $0x8] ss:$24 sps:$4 sm:$0xff] (!%p190_p2)   ;;  %939 = vmatprep.subr.bf16.mxu0 (!%p190_p2), %v1385_v12 }
   0x7   : > { %p220_p3 = scmp.lt.s32.totalorder (!%p190_p2), %s219_s20, 5  ;;  %v1391_v16 = vld [vmem:[%s1999_s3 + $0x34] ss:$24 sps:$4 sm:$0xff] (!%p190_p2)   ;;  %990 = vmatprep.subr.bf16.mxu1 (!%p190_p2), %v1387_v13  ;;  %940 = vmatpush1.bf16.msra.mxu0 (!%p190_p2), %v1389_v14  ;;  %v1395_v18 = vld [vmem:[%s1999_s3 + $0x30] ss:$24 sps:$4 sm:$0xff] (!%p190_p2)  }
   0x8   : > { %v1393_v17 = vld [vmem:[%s1999_s3 + $0x3c] ss:$24 sps:$4 sm:$0xff] (!%p190_p2)   ;;  %991 = vmatpush1.bf16.msra.mxu1 (!%p190_p2), %v1390_v15  ;;  %v1396_v19 = vld [vmem:[%s1999_s3 + $0x38] ss:$24 sps:$4 sm:$0xff] (!%p190_p2)   ;;  %941 = vmatprep.subr.bf16.mxu0 (!%p190_p2), %v1391_v16  ;;  %v1399_v21 = vld [vmem:[%s1999_s3 + $0x6c] ss:$24 sps:$4 sm:$0xff] (!%p190_p2)  }
   0x9   : > { %992 = vmatprep.subr.bf16.mxu1 (!%p190_p2), %v1393_v17  ;;  %v1397_v20 = vld [vmem:[%s1999_s3 + $0x64] ss:$24 sps:$4 sm:$0xff] (!%p190_p2)   ;;  %v1401_v22 = vld [vmem:[%s1999_s3 + $0x60] ss:$24 sps:$4 sm:$0xff] (!%p190_p2)   ;;  %v1403_v24 = vld [vmem:[%s1999_s3 + $0x94] ss:$24 sps:$4 sm:$0xff] (!%p190_p2)  }
   0xa   : > { %v1402_v23 = vld [vmem:[%s1999_s3 + $0x68] ss:$24 sps:$4 sm:$0xff] (!%p190_p2)   ;;  %v1405_v25 = vld [vmem:[%s1999_s3 + $0x9c] ss:$24 sps:$4 sm:$0xff] (!%p190_p2)   ;;  %v1408_v27 = vld [vmem:[%s1999_s3 + $0x98] ss:$24 sps:$4 sm:$0xff] (!%p190_p2)  }
   0xb   : > { %942 = vmatpush1.bf16.msra.mxu0 (!%p190_p2), %v1395_v18  ;;  %v1407_v26 = vld [vmem:[%s1999_s3 + $0x90] ss:$24 sps:$4 sm:$0xff] (!%p190_p2)   ;;  %v1409_v28 = vld [vmem:[%s1999_s3 + $0xc4] ss:$24 sps:$4 sm:$0xff] (!%p190_p2)   ;;  %v1413_v30 = vld [vmem:[%s1999_s3 + $0xc0] ss:$24 sps:$4 sm:$0xff] (!%p190_p2)  }
   0xc   : > { %993 = vmatpush1.bf16.msra.mxu1 (!%p190_p2), %v1396_v19  ;;  %943 = vmatprep.subr.bf16.mxu0 (!%p190_p2), %v1397_v20  ;;  %v1411_v29 = vld [vmem:[%s1999_s3 + $0xcc] ss:$24 sps:$4 sm:$0xff] (!%p190_p2)   ;;  %v1414_v31 = vld [vmem:[%s1999_s3 + $0xc8] ss:$24 sps:$4 sm:$0xff] (!%p190_p2)   ;;  %v1417_v33 = vld [vmem:[%s1999_s3 + $0xfc] ss:$24 sps:$4 sm:$0xff] (!%p190_p2)  }
   0xd   : > { %s2003_s20 = smov (!%p220_p3, %s219_s20), 5  ;;  %994 = vmatprep.subr.bf16.mxu1 %v1399_v21  ;;  %v1415_v32 = vld [vmem:[%s1999_s3 + $0xf4] ss:$24 sps:$4 sm:$0xff]   ;;  %v1419_v34 = vld [vmem:[%s1999_s3 + $0xf0] ss:$24 sps:$4 sm:$0xff]  }
   0xe   : > { %s1334_s21 = sshll.u32 %s2003_s20, 3  ;;  %v1420_v35 = vld [vmem:[%s1999_s3 + $0xf8] ss:$24 sps:$4 sm:$0xff]   ;;  %v1421_v36 = vld [vmem:[%s1999_s3 + $0x124] ss:$24 sps:$4 sm:$0xff]   ;;  %s1376_s14 = smul.u32 24, %s2003_s20 }
   0xf   : > { %s224_s24 = scalar_lea.vmem %s1996_s0, %s1334_s21  ;;  %944 = vmatpush1.bf16.msra.mxu0 %v1401_v22  ;;  %v1423_v37 = vld [vmem:[%s1999_s3 + $0x12c] ss:$24 sps:$4 sm:$0xff]   ;;  %v1425_v38 = vld [vmem:[%s1999_s3 + $0x120] ss:$24 sps:$4 sm:$0xff]   ;;  %v1429_v41 = vld [vmem:[%s1999_s3 + $0x15c] ss:$24 sps:$4 sm:$0xff]  }
  0x10   : > { %v1587_v0 = vld [vmem:[%s224_s24] sm:$0xff]  ;;  %v1589_v1 = vld [vmem:[%s224_s24 + $0x10] sm:$0xff]  ;;  %v1591_v2 = vld [vmem:[%s224_s24 + $0x8] sm:$0xff]  ;;  %995 = vmatpush1.bf16.msra.mxu1 %v1402_v23  ;;  %945 = vmatprep.subr.bf16.mxu0 %v1403_v24  ;;  %s1980_s17 = scalar_lea.vmem %s2001_s5, %s1376_s14 }
  0x11   : > { %v236_v3 = vunpack.c.l.bf16 %v1587_v0  ;;  %v237_v4 = vunpack.c.h.bf16 %v1587_v0  ;;  %v240_v5 = vunpack.c.l.bf16 %v1589_v1  ;;  %v241_v6 = vunpack.c.h.bf16 %v1589_v1  ;;  %996 = vmatprep.subr.bf16.mxu1 %v1405_v25  ;;  %v1426_v39 = vld [vmem:[%s1999_s3 + $0x128] ss:$24 sps:$4 sm:$0xff]   ;;  %v1427_v40 = vld [vmem:[%s1999_s3 + $0x154] ss:$24 sps:$4 sm:$0xff]   ;;  %v1432_v43 = vld [vmem:[%s1999_s3 + $0x158] ss:$24 sps:$4 sm:$0xff]  }
  0x12   : > { %v238_v7 = vunpack.c.l.bf16 %v1591_v2  ;;  %v239_v8 = vunpack.c.h.bf16 %v1591_v2  ;;  %v1431_v42 = vld [vmem:[%s1999_s3 + $0x150] ss:$24 sps:$4 sm:$0xff]   ;;  %v1433_v44 = vld [vmem:[%s1999_s3 + $0x184] ss:$24 sps:$4 sm:$0xff]   ;;  %v1437_v46 = vld [vmem:[%s1999_s3 + $0x180] ss:$24 sps:$4 sm:$0xff]  }
  0x13   : > { %v242_v9 = vadd.f32 %v237_v4, %v236_v3  ;;  %v248_v10 = vadd.f32 %v241_v6, %v240_v5  ;;  %946 = vmatpush1.bf16.msra.mxu0 %v1407_v26  ;;  %v1435_v45 = vld [vmem:[%s1999_s3 + $0x18c] ss:$24 sps:$4 sm:$0xff]   ;;  %v1438_v47 = vld [vmem:[%s1999_s3 + $0x188] ss:$24 sps:$4 sm:$0xff]   ;;  %v1441_v49 = vld [vmem:[%s1999_s3 + $0x1bc] ss:$24 sps:$4 sm:$0xff]  }
  0x14   : > { %v245_v11 = vadd.f32 %v239_v8, %v238_v7  ;;  %997 = vmatpush1.bf16.msra.mxu1 %v1408_v27  ;;  %947 = vmatprep.subr.bf16.mxu0 %v1409_v28  ;;  %v1439_v48 = vld [vmem:[%s1999_s3 + $0x1b4] ss:$24 sps:$4 sm:$0xff]   ;;  %v1444_v2 = vld [vmem:[%s1999_s3 + $0x1b8] ss:$24 sps:$4 sm:$0xff]   ;;  %v1450_v12 = vld [vmem:[%s1999_s3 + $0x1e8] ss:$24 sps:$4 sm:$0xff]  }
  0x15   : > { %243 = vadd.xlane.f32.xlu0 %v242_v9  ;;  %249 = vadd.xlane.f32.xlu1 %v248_v10  ;;  %v1447_v10 = vld [vmem:[%s1999_s3 + $0x1ec] ss:$24 sps:$4 sm:$0xff]   ;;  %v1453_v14 = vld [vmem:[%s1999_s3 + $0x21c] ss:$24 sps:$4 sm:$0xff]   ;;  %v1455_v15 = vld [vmem:[%s1999_s3 + $0x210] ss:$24 sps:$4 sm:$0xff]  }
  0x16   : > { %998 = vmatprep.subr.bf16.mxu1 %v1411_v29  ;;  %v1451_v13 = vld [vmem:[%s1999_s3 + $0x214] ss:$24 sps:$4 sm:$0xff]   ;;  %v1456_v16 = vld [vmem:[%s1999_s3 + $0x218] ss:$24 sps:$4 sm:$0xff]   ;;  %v1457_v17 = vld [vmem:[%s1999_s3 + $0x244] ss:$24 sps:$4 sm:$0xff]  }
  0x17   : > { %948 = vmatpush1.bf16.msra.mxu0 %v1413_v30  ;;  %v1459_v18 = vld [vmem:[%s1999_s3 + $0x24c] ss:$24 sps:$4 sm:$0xff]   ;;  %v1461_v19 = vld [vmem:[%s1999_s3 + $0x240] ss:$24 sps:$4 sm:$0xff]   ;;  %v1465_v22 = vld [vmem:[%s1999_s3 + $0x27c] ss:$24 sps:$4 sm:$0xff]  }
  0x18   : > { %999 = vmatpush1.bf16.msra.mxu1 %v1414_v31  ;;  %949 = vmatprep.subr.bf16.mxu0 %v1415_v32  ;;  %v1462_v20 = vld [vmem:[%s1999_s3 + $0x248] ss:$24 sps:$4 sm:$0xff]   ;;  %v1463_v21 = vld [vmem:[%s1999_s3 + $0x274] ss:$24 sps:$4 sm:$0xff]   ;;  %v1468_v24 = vld [vmem:[%s1999_s3 + $0x278] ss:$24 sps:$4 sm:$0xff]  }
  0x19   : > { %246 = vadd.xlane.f32.xlu0 %v245_v11  ;;  %1000 = vmatprep.subr.bf16.mxu1 %v1417_v33  ;;  %v1449_v11 = vld [vmem:[%s1999_s3 + $0x1e0] ss:$24 sps:$4 sm:$0xff]   ;;  %v1467_v23 = vld [vmem:[%s1999_s3 + $0x270] ss:$24 sps:$4 sm:$0xff]   ;;  %v1469_v25 = vld [vmem:[%s1999_s3 + $0x2a4] ss:$24 sps:$4 sm:$0xff]  }
  0x1a   : > { %v1471_v26 = vld [vmem:[%s1999_s3 + $0x2ac] ss:$24 sps:$4 sm:$0xff]   ;;  %v1473_v27 = vld [vmem:[%s1999_s3 + $0x2a0] ss:$24 sps:$4 sm:$0xff]   ;;  %v1477_v30 = vld [vmem:[%s1999_s3 + $0x2dc] ss:$24 sps:$4 sm:$0xff]  }
  0x1b   : > { %950 = vmatpush1.bf16.msra.mxu0 %v1419_v34  ;;  %v1474_v28 = vld [vmem:[%s1999_s3 + $0x2a8] ss:$24 sps:$4 sm:$0xff]   ;;  %v1475_v29 = vld [vmem:[%s1999_s3 + $0x2d4] ss:$24 sps:$4 sm:$0xff]   ;;  %v1480_v32 = vld [vmem:[%s1999_s3 + $0x2d8] ss:$24 sps:$4 sm:$0xff]  }
  0x1c   : > { %1001 = vmatpush1.bf16.msra.mxu1 %v1420_v35  ;;  %951 = vmatprep.subr.bf16.mxu0 %v1421_v36  ;;  %v1479_v31 = vld [vmem:[%s1999_s3 + $0x2d0] ss:$24 sps:$4 sm:$0xff]   ;;  %v1483_v33 = vld [vmem:[%s1999_s3 + $0x14] ss:$24 sps:$4 sm:$0xff]  }
  0x1d   : > { %1002 = vmatprep.subr.bf16.mxu1 %v1423_v37 }
  0x1f   : > { %952 = vmatpush1.bf16.msra.mxu0 %v1425_v38 }
  0x20   : > { %1003 = vmatpush1.bf16.msra.mxu1 %v1426_v39  ;;  %953 = vmatprep.subr.bf16.mxu0 %v1427_v40 }
  0x21   : > { %1004 = vmatprep.subr.bf16.mxu1 %v1429_v41  ;;  %v293_v41 = vlaneseq }
  0x23   : > { %954 = vmatpush1.bf16.msra.mxu0 %v1431_v42 }
  0x24   : > { %1005 = vmatpush1.bf16.msra.mxu1 %v1432_v43  ;;  %955 = vmatprep.subr.bf16.mxu0 %v1433_v44  ;;  %v1842_v44 = vshrl.u32 %v293_v41, 7  ;;  %v1525_v41 = vld [vmem:[%s1999_s3 + $0x2b4] ss:$24 sps:$4 sm:$0xff]  }
  0x25   : > { %1006 = vmatprep.subr.bf16.mxu1 %v1435_v45 }
  0x26   : > { %v1845_v45 = vsub.s32 1, %v1842_v44 }
  0x27   : > { %956 = vmatpush1.bf16.msra.mxu0 %v1437_v46  ;;  %v1848_v46 = vsub.s32 0, %v1842_v44 }
  0x28   : > { %1007 = vmatpush1.bf16.msra.mxu1 %v1438_v47  ;;  %957 = vmatprep.subr.bf16.mxu0 %v1439_v48  ;;  %v291_v47 = vld [vmem:[%s1997_s1] sm:$0x3] }
  0x29   : > { %1008 = vmatprep.subr.bf16.mxu1 %v1441_v49 }
  0x2c   : > { %1009 = vmatpush1.bf16.msra.mxu1 %v1444_v2 }
  0x2d   : > { %1010 = vmatprep.subr.bf16.mxu1 %v1447_v10 }
  0x30   : > { %1011 = vmatpush1.bf16.msra.mxu1 %v1450_v12 }
  0x31   : > { %1012 = vmatprep.subr.bf16.mxu1 %v1453_v14  ;;  %v1484_v14 = vld [vmem:[%s1999_s3 + $0x40] ss:$24 sps:$4 sm:$0xff]  }
  0x34   : > { %1013 = vmatpush1.bf16.msra.mxu1 %v1456_v16 }
  0x35   : > { %1014 = vmatprep.subr.bf16.mxu1 %v1459_v18 }
  0x38   : > { %1015 = vmatpush1.bf16.msra.mxu1 %v1462_v20  ;;  %v1490_v20 = vld [vmem:[%s1999_s3 + $0xa0] ss:$24 sps:$4 sm:$0xff]  }
  0x39   : > { %1016 = vmatprep.subr.bf16.mxu1 %v1465_v22  ;;  %v1493_v22 = vld [vmem:[%s1999_s3 + $0xd0] ss:$24 sps:$4 sm:$0xff]  }
  0x3c   : > { %1017 = vmatpush1.bf16.msra.mxu1 %v1468_v24  ;;  %v1496_v24 = vld [vmem:[%s1999_s3 + $0x100] ss:$24 sps:$4 sm:$0xff]  }
  0x3d   : > { %1018 = vmatprep.subr.bf16.mxu1 %v1471_v26  ;;  %v1499_v26 = vld [vmem:[%s1999_s3 + $0x130] ss:$24 sps:$4 sm:$0xff]  }
  0x40   : > { %1019 = vmatpush1.bf16.msra.mxu1 %v1474_v28  ;;  %v1502_v28 = vld [vmem:[%s1999_s3 + $0x160] ss:$24 sps:$4 sm:$0xff]  }
  0x41   : > { %1020 = vmatprep.subr.bf16.mxu1 %v1477_v30  ;;  %v1505_v30 = vld [vmem:[%s1999_s3 + $0x190] ss:$24 sps:$4 sm:$0xff]  }
  0x44   : > { %1021 = vmatpush1.bf16.msra.mxu1 %v1480_v32  ;;  %v1508_v32 = vld [vmem:[%s1999_s3 + $0x1c0] ss:$24 sps:$4 sm:$0xff]  }
  0x45   : > { %1344 = vmatprep.subr.bf16.mxu1 %v1483_v33 }
  0xa2   : > { %v244_v50 = vpop.xlane.xlu0 %243  ;;  %v250_v51 = vpop.xlane.xlu1 %249 }
  0xa3   : > { %v252_v52 = vmul.f32 0.00390625, %v244_v50  ;;  %v254_v53 = vmul.f32 0.00390625, %v250_v51  ;;  %v300_v50 = vrot.slane %v291_v47, %v1845_v45  ;;  %v309_v51 = vld [vmem:[%s1998_s2] sm:$0x3] }
  0xa5   : > { %v1727_v54 = vsub.f32 %v236_v3, %v252_v52  ;;  %v1731_v55 = vsub.f32 %v237_v4, %v252_v52  ;;  %v1735_v56 = vsub.f32 %v240_v5, %v254_v53  ;;  %v1739_v57 = vsub.f32 %v241_v6, %v254_v53 }
  0xa6   : > { %v247_v58 = vpop.xlane.xlu0 %246  ;;  %v296_v53 = vrot.slane %v291_v47, %v1848_v46  ;;  %v1526_v47 = vld [vmem:[%s1999_s3 + $0x2e0] ss:$24 sps:$4 sm:$0xff]  }
  0xa7   : > { %v253_v59 = vmul.f32 0.00390625, %v247_v58  ;;  %v261_v60 = vmul.f32 %v1727_v54, %v1727_v54  ;;  %v262_v61 = vmul.f32 %v1731_v55, %v1731_v55  ;;  %v265_v62 = vmul.f32 %v1735_v56, %v1735_v56 }
  0xa8   : > { %v266_v63 = vmul.f32 %v1739_v57, %v1739_v57 }
  0xa9   : > { %v1751_v0 = vsub.f32 %v238_v7, %v253_v59  ;;  %v1755_v1 = vsub.f32 %v239_v8, %v253_v59  ;;  %v267_v3 = vadd.f32 %v262_v61, %v261_v60  ;;  %v1443_v7 = vld [vmem:[%s1999_s3 + $0x1b0] ss:$24 sps:$4 sm:$0xff]   ;;  %v1445_v8 = vld [vmem:[%s1999_s3 + $0x1e4] ss:$24 sps:$4 sm:$0xff]   ;;  %v318_v60 = vrot.slane %v309_v51, %v1845_v45 }
  0xaa   : > { %v273_v4 = vadd.f32 %v266_v63, %v265_v62  ;;  %958 = vmatpush1.bf16.msra.mxu0 %v1443_v7  ;;  %v314_v61 = vrot.slane %v309_v51, %v1848_v46 }
  0xab   : > { %268 = vadd.xlane.f32.xlu1 %v267_v3  ;;  %v263_v5 = vmul.f32 %v1751_v0, %v1751_v0  ;;  %v264_v6 = vmul.f32 %v1755_v1, %v1755_v1  ;;  %959 = vmatprep.subr.bf16.mxu0 %v1445_v8 }
  0xad   : > { %v270_v9 = vadd.f32 %v264_v6, %v263_v5 }
  0xae   : > { %960 = vmatpush1.bf16.msra.mxu0 %v1449_v11 }
  0xaf   : > { %274 = vadd.xlane.f32.xlu1 %v273_v4  ;;  %271 = vadd.xlane.f32.xlu0 %v270_v9 }
  0xb0   : > { %961 = vmatprep.subr.bf16.mxu0 %v1451_v13 }
  0xb2   : > { %962 = vmatpush1.bf16.msra.mxu0 %v1455_v15  ;;  %v1489_v15 = vld [vmem:[%s1999_s3 + $0x74] ss:$24 sps:$4 sm:$0xff]  }
  0xb3   : > { %963 = vmatprep.subr.bf16.mxu0 %v1457_v17  ;;  %v1487_v17 = vld [vmem:[%s1999_s3 + $0x70] ss:$24 sps:$4 sm:$0xff]  }
  0xb6   : > { %964 = vmatpush1.bf16.msra.mxu0 %v1461_v19  ;;  %v1492_v19 = vld [vmem:[%s1999_s3 + $0xa4] ss:$24 sps:$4 sm:$0xff]  }
  0xb7   : > { %965 = vmatprep.subr.bf16.mxu0 %v1463_v21  ;;  %v1495_v21 = vld [vmem:[%s1999_s3 + $0xd4] ss:$24 sps:$4 sm:$0xff]  }
  0xba   : > { %966 = vmatpush1.bf16.msra.mxu0 %v1467_v23  ;;  %v1498_v23 = vld [vmem:[%s1999_s3 + $0x104] ss:$24 sps:$4 sm:$0xff]  }
  0xbb   : > { %967 = vmatprep.subr.bf16.mxu0 %v1469_v25  ;;  %v1501_v25 = vld [vmem:[%s1999_s3 + $0x134] ss:$24 sps:$4 sm:$0xff]  }
  0xbe   : > { %968 = vmatpush1.bf16.msra.mxu0 %v1473_v27  ;;  %v1504_v27 = vld [vmem:[%s1999_s3 + $0x164] ss:$24 sps:$4 sm:$0xff]  }
  0xbf   : > { %969 = vmatprep.subr.bf16.mxu0 %v1475_v29  ;;  %v1507_v29 = vld [vmem:[%s1999_s3 + $0x194] ss:$24 sps:$4 sm:$0xff]  }
  0xc2   : > { %970 = vmatpush1.bf16.msra.mxu0 %v1479_v31  ;;  %v1510_v31 = vld [vmem:[%s1999_s3 + $0x1c4] ss:$24 sps:$4 sm:$0xff]  }
  0xc3   : > { %1041 = vmatprep.subr.bf16.mxu0 %v1483_v33  ;;  %v1513_v33 = vld [vmem:[%s1999_s3 + $0x1f4] ss:$24 sps:$4 sm:$0xff]  }
 0x138   : > { %v269_v34 = vpop.xlane.xlu1 %268 }
 0x139   : > { %v276_v35 = vmul.f32 0.00390625, %v269_v34  ;;  %v1511_v34 = vld [vmem:[%s1999_s3 + $0x1f0] ss:$24 sps:$4 sm:$0xff]  }
 0x13b   : > { %v279_v36 = vadd.f32 1e-05, %v276_v35  ;;  %v1516_v35 = vld [vmem:[%s1999_s3 + $0x224] ss:$24 sps:$4 sm:$0xff]  }
 0x13c   : > { %v275_v37 = vpop.xlane.xlu1 %274  ;;  %v272_v38 = vpop.xlane.xlu0 %271 }
 0x13d   : > { %1529 = vrsqrt.f32 %v279_v36  ;;  %v278_v39 = vmul.f32 0.00390625, %v275_v37  ;;  %v277_v40 = vmul.f32 0.00390625, %v272_v38  ;;  %v1514_v36 = vld [vmem:[%s1999_s3 + $0x220] ss:$24 sps:$4 sm:$0xff]   ;;  %v1519_v37 = vld [vmem:[%s1999_s3 + $0x254] ss:$24 sps:$4 sm:$0xff]  }
 0x13e   : > { %v1517_v38 = vld [vmem:[%s1999_s3 + $0x250] ss:$24 sps:$4 sm:$0xff]  }
 0x13f   : > { %v281_v42 = vadd.f32 1e-05, %v278_v39  ;;  %v280_v43 = vadd.f32 1e-05, %v277_v40  ;;  %v1522_v39 = vld [vmem:[%s1999_s3 + $0x284] ss:$24 sps:$4 sm:$0xff]  }
 0x140   : > { %v1520_v40 = vld [vmem:[%s1999_s3 + $0x280] ss:$24 sps:$4 sm:$0xff]  }
 0x141   : > { %1531 = vrsqrt.f32 %v281_v42  ;;  %v1523_v42 = vld [vmem:[%s1999_s3 + $0x2b0] ss:$24 sps:$4 sm:$0xff]  }
 0x142   : > { %1533 = vrsqrt.f32 %v280_v43  ;;  %v1528_v43 = vld [vmem:[%s1999_s3 + $0x2e4] ss:$24 sps:$4 sm:$0xff]  }
 0x147   : > { %v1530_v48 = vpop.eup %1529 }
 0x148   : > { %v286_v49 = vmul.f32 %v1530_v48, %v1731_v55  ;;  %v285_v52 = vmul.f32 %v1530_v48, %v1727_v54  ;;  %v439_v48 = vsub.s32 2, %v1842_v44 }
 0x14a   : > { %v304_v63 = vmul.f32 %v300_v50, %v286_v49  ;;  %v303_v4 = vmul.f32 %v296_v53, %v285_v52  ;;  %v427_v49 = vld [vmem:[%s2000_s4] sm:$0x3f] }
 0x14b   : > { %v1532_v58 = vpop.eup %1531  ;;  %v432_v51 = vrot.slane %v427_v49, %v1848_v46  ;;  %v440_v52 = vrot.slane %v427_v49, %v439_v48 }
 0x14c   : > { %v1534_v59 = vpop.eup %1533  ;;  %v290_v62 = vmul.f32 %v1532_v58, %v1739_v57  ;;  %v289_v54 = vmul.f32 %v1532_v58, %v1735_v56  ;;  %v322_v7 = vadd.f32 %v318_v60, %v304_v63  ;;  %v321_v8 = vadd.f32 %v314_v61, %v303_v4  ;;  %v1481_v57 = vld [vmem:[%s1999_s3 + $0x10] ss:$24 sps:$4 sm:$0xff]  }
 0x14d   : > { %v288_v55 = vmul.f32 %v1534_v59, %v1755_v1  ;;  %v287_v3 = vmul.f32 %v1534_v59, %v1751_v0  ;;  %v1486_v0 = vld [vmem:[%s1999_s3 + $0x44] ss:$24 sps:$4 sm:$0xff]  }
 0x14e   : > { %v308_v5 = vmul.f32 %v300_v50, %v290_v62  ;;  %v307_v13 = vmul.f32 %v296_v53, %v289_v54 }
 0x14f   : > { %v306_v6 = vmul.f32 %v300_v50, %v288_v55  ;;  %v305_v9 = vmul.f32 %v296_v53, %v287_v3  ;;  %v443_v50 = vsub.s32 3, %v1842_v44  ;;  %v436_v53 = vrot.slane %v427_v49, %v1845_v45 }
 0x150   : > { %v326_v11 = vadd.f32 %v318_v60, %v308_v5  ;;  %v325_v16 = vadd.f32 %v314_v61, %v307_v13 }
 0x151   : > { %v324_v2 = vadd.f32 %v318_v60, %v306_v6  ;;  %v323_v10 = vadd.f32 %v314_v61, %v305_v9  ;;  %v444_v58 = vrot.slane %v427_v49, %v443_v50 }
 0x152   : > { %v330_v56 = vpack.c.bf16 %v326_v11, %v326_v11  ;;  %v1885_v18 = vpack.c.bf16 %v325_v16, %v325_v16 }
 0x153   : > { %v328_v12 = vpack.c.bf16 %v324_v2, %v322_v7  ;;  %v1869_v1 = vpack.c.bf16 %v323_v10, %v321_v8 }
 0x155   : > { %971 = vmatprep.mubr.bf16.mxu0 %v328_v12  ;;  %1022 = vmatprep.mubr.bf16.mxu1 %v328_v12 }
 0x156   : > { %972 = vmatmul.mubr.bf16.vlgmr.msra.gmra.mrb[0].mxu0 %v1869_v1  ;;  %1023 = vmatmul.mubr.bf16.vlgmr.msra.gmra.mrb[0].mxu1 %v1869_v1 }
 0x157   : > { %1042 = vmatpush1.bf16.msra.mxu0 %v1481_v57  ;;  %1360 = vmatpush1.bf16.msra.mxu1 %v1481_v57 }
 0x158   : > { %981 = vmatprep.mubr.bf16.mxu0 %v330_v56  ;;  %1032 = vmatprep.mubr.bf16.mxu1 %v330_v56 }
 0x159   : > { %1043 = vmatprep.subr.bf16.mxu0 %v1486_v0  ;;  %1345 = vmatprep.subr.bf16.mxu1 %v1486_v0 }
 0x15b   : > { %1044 = vmatpush1.bf16.msra.mxu0 %v1484_v14  ;;  %1361 = vmatpush1.bf16.msra.mxu1 %v1484_v14 }
 0x15c   : > { %1045 = vmatprep.subr.bf16.mxu0 %v1489_v15  ;;  %1346 = vmatprep.subr.bf16.mxu1 %v1489_v15 }
 0x15e   : > { %982 = vmatmul.mubr.bf16.gmra.mrb[4].mxu0 %v1885_v18  ;;  %1033 = vmatmul.mubr.bf16.gmra.mrb[4].mxu1 %v1885_v18 }
 0x15f   : > { %1046 = vmatpush1.bf16.msra.mxu0 %v1487_v17  ;;  %1362 = vmatpush1.bf16.msra.mxu1 %v1487_v17 }
 0x160   : > { %1073 = vmatprep.mubr.bf16.mxu0 %v328_v12  ;;  %1083 = vmatprep.mubr.bf16.mxu1 %v330_v56 }
 0x161   : > { %1047 = vmatprep.subr.bf16.mxu0 %v1492_v19  ;;  %1347 = vmatprep.subr.bf16.mxu1 %v1492_v19 }
 0x163   : > { %1048 = vmatpush1.bf16.msra.mxu0 %v1490_v20  ;;  %1363 = vmatpush1.bf16.msra.mxu1 %v1490_v20 }
 0x164   : > { %1049 = vmatprep.subr.bf16.mxu0 %v1495_v21  ;;  %1348 = vmatprep.subr.bf16.mxu1 %v1495_v21 }
 0x167   : > { %1050 = vmatpush1.bf16.msra.mxu0 %v1493_v22  ;;  %1364 = vmatpush1.bf16.msra.mxu1 %v1493_v22 }
 0x168   : > { %1051 = vmatprep.subr.bf16.mxu0 %v1498_v23  ;;  %1349 = vmatprep.subr.bf16.mxu1 %v1498_v23  ;;  %v447_v23 = vsub.s32 4, %v1842_v44 }
 0x16b   : > { %1052 = vmatpush1.bf16.msra.mxu0 %v1496_v24  ;;  %1365 = vmatpush1.bf16.msra.mxu1 %v1496_v24  ;;  %v451_v24 = vsub.s32 5, %v1842_v44 }
 0x16c   : > { %1053 = vmatprep.subr.bf16.mxu0 %v1501_v25  ;;  %1350 = vmatprep.subr.bf16.mxu1 %v1501_v25  ;;  %v448_v25 = vrot.slane %v427_v49, %v447_v23 }
 0x16f   : > { %1054 = vmatpush1.bf16.msra.mxu0 %v1499_v26  ;;  %1366 = vmatpush1.bf16.msra.mxu1 %v1499_v26  ;;  %v452_v26 = vrot.slane %v427_v49, %v451_v24 }
 0x170   : > { %1055 = vmatprep.subr.bf16.mxu0 %v1504_v27  ;;  %1351 = vmatprep.subr.bf16.mxu1 %v1504_v27 }
 0x173   : > { %1056 = vmatpush1.bf16.msra.mxu0 %v1502_v28  ;;  %1367 = vmatpush1.bf16.msra.mxu1 %v1502_v28 }
 0x174   : > { %1057 = vmatprep.subr.bf16.mxu0 %v1507_v29  ;;  %1352 = vmatprep.subr.bf16.mxu1 %v1507_v29 }
 0x177   : > { %1058 = vmatpush1.bf16.msra.mxu0 %v1505_v30  ;;  %1368 = vmatpush1.bf16.msra.mxu1 %v1505_v30 }
 0x178   : > { %1059 = vmatprep.subr.bf16.mxu0 %v1510_v31  ;;  %1353 = vmatprep.subr.bf16.mxu1 %v1510_v31 }
 0x17b   : > { %1060 = vmatpush1.bf16.msra.mxu0 %v1508_v32  ;;  %1369 = vmatpush1.bf16.msra.mxu1 %v1508_v32 }
 0x17c   : > { %1061 = vmatprep.subr.bf16.mxu0 %v1513_v33  ;;  %1354 = vmatprep.subr.bf16.mxu1 %v1513_v33 }
 0x17f   : > { %1062 = vmatpush1.bf16.msra.mxu0 %v1511_v34  ;;  %1370 = vmatpush1.bf16.msra.mxu1 %v1511_v34 }
 0x180   : > { %1063 = vmatprep.subr.bf16.mxu0 %v1516_v35  ;;  %1355 = vmatprep.subr.bf16.mxu1 %v1516_v35 }
 0x183   : > { %1064 = vmatpush1.bf16.msra.mxu0 %v1514_v36  ;;  %1371 = vmatpush1.bf16.msra.mxu1 %v1514_v36 }
 0x184   : > { %1065 = vmatprep.subr.bf16.mxu0 %v1519_v37  ;;  %1356 = vmatprep.subr.bf16.mxu1 %v1519_v37 }
 0x187   : > { %1066 = vmatpush1.bf16.msra.mxu0 %v1517_v38  ;;  %1372 = vmatpush1.bf16.msra.mxu1 %v1517_v38 }
 0x188   : > { %1067 = vmatprep.subr.bf16.mxu0 %v1522_v39  ;;  %1357 = vmatprep.subr.bf16.mxu1 %v1522_v39 }
 0x18b   : > { %1068 = vmatpush1.bf16.msra.mxu0 %v1520_v40  ;;  %1373 = vmatpush1.bf16.msra.mxu1 %v1520_v40 }
 0x18c   : > { %1069 = vmatprep.subr.bf16.mxu0 %v1525_v41  ;;  %1358 = vmatprep.subr.bf16.mxu1 %v1525_v41 }
 0x18f   : > { %1070 = vmatpush1.bf16.msra.mxu0 %v1523_v42  ;;  %1374 = vmatpush1.bf16.msra.mxu1 %v1523_v42 }
 0x190   : > { %1071 = vmatprep.subr.bf16.mxu0 %v1528_v43  ;;  %1359 = vmatprep.subr.bf16.mxu1 %v1528_v43 }
 0x193   : > { %1072 = vmatpush1.bf16.msra.mxu0 %v1526_v47  ;;  %1375 = vmatpush1.bf16.msra.mxu1 %v1526_v47 }
 0x196   : > { %1074 = vmatmul.mubr.bf16.vlgmr.msra.gmra.mrb[8].mxu0 %v1869_v1  ;;  %1084 = vmatmul.mubr.bf16.vlgmr.msra.gmra.mrb[8].mxu1 %v1885_v18 }
 0x229   : > { %v973_v59 = vpop.f32.mrb[0].mxu0  ;;  %v1024_v60 = vpop.f32.mrb[0].mxu1 }
 0x22a   : > { %v974_v61 = vadd.f32 %v973_v59, %v432_v51  ;;  %v1025_v62 = vadd.f32 %v1024_v60, %v440_v52  ;;  %v975_v55 = vpop.f32.mrb[1].mxu0  ;;  %v1026_v63 = vpop.f32.mrb[1].mxu1 }
 0x22b   : > { %v976_v3 = vadd.f32 %v975_v55, %v436_v53  ;;  %v1027_v4 = vadd.f32 %v1026_v63, %v444_v58  ;;  %v977_v5 = vpop.f32.mrb[2].mxu0  ;;  %v1028_v6 = vpop.f32.mrb[2].mxu1 }
 0x22c   : > { %v978_v45 = vadd.f32 %v977_v5, %v432_v51  ;;  %v1029_v46 = vadd.f32 %v1028_v6, %v440_v52  ;;  %v979_v9 = vpop.f32.mrb[3].mxu0  ;;  %v1030_v54 = vpop.f32.mrb[3].mxu1 }
 0x22d   : > { %v1335_v7 = vpack.c.bf16 %v976_v3, %v974_v61  ;;  %v1336_v2 = vpack.c.bf16 %v1027_v4, %v1025_v62  ;;  %v980_v8 = vadd.f32 %v979_v9, %v436_v53  ;;  %v1031_v10 = vadd.f32 %v1030_v54, %v444_v58 }
 0x22f   : > { %1152 = vst [vmem:[%s1980_s17] sm:$0xff] %v1335_v7  ;;  %1153 = vst [vmem:[%s1980_s17 + $0x8] sm:$0xff] %v1336_v2  ;;  %v1338_v11 = vpack.c.bf16 %v980_v8, %v978_v45  ;;  %v1339_v12 = vpack.c.bf16 %v1031_v10, %v1029_v46 }
 0x231   : > { %1155 = vst [vmem:[%s1980_s17 + $0x18] sm:$0xff] %v1338_v11  ;;  %1156 = vst [vmem:[%s1980_s17 + $0x20] sm:$0xff] %v1339_v12  ;;  %v983_v57 = vpop.f32.mrb[4].mxu0  ;;  %v1034_v1 = vpop.f32.mrb[4].mxu1 }
 0x232   : > { %v984_v13 = vadd.f32 %v983_v57, %v432_v51  ;;  %v1035_v0 = vadd.f32 %v1034_v1, %v440_v52  ;;  %v985_v56 = vpop.f32.mrb[5].mxu0  ;;  %v1036_v14 = vpop.f32.mrb[5].mxu1 }
 0x233   : > { %v986_v15 = vadd.f32 %v985_v56, %v436_v53  ;;  %v1037_v16 = vadd.f32 %v1036_v14, %v444_v58  ;;  %v987_v17 = vpop.f32.mrb[6].mxu0  ;;  %v1038_v18 = vpop.f32.mrb[6].mxu1 }
 0x234   : > { %v988_v19 = vpop.f32.mrb[7].mxu0  ;;  %v1039_v20 = vpop.f32.mrb[7].mxu1 }
 0x235   : > { %v1341_v21 = vpack.c.bf16 %v986_v15, %v984_v13  ;;  %v1342_v22 = vpack.c.bf16 %v1037_v16, %v1035_v0 }
 0x237   : > { %1158 = vst [vmem:[%s1980_s17 + $0x30] sm:$0xff] %v1341_v21  ;;  %1159 = vst [vmem:[%s1980_s17 + $0x38] sm:$0xff] %v1342_v22 }
 0x269   : > { %v1075_v27 = vpop.f32.mrb[8].mxu0  ;;  %v1085_v28 = vpop.f32.mrb[8].mxu1 }
 0x26a   : > { %v1076_v29 = vadd.f32 %v1075_v27, %v448_v25  ;;  %v1086_v30 = vadd.f32 %v1085_v28, %v448_v25  ;;  %v1077_v31 = vpop.f32.mrb[9].mxu0  ;;  %v1087_v32 = vpop.f32.mrb[9].mxu1 }
 0x26b   : > { %v1078_v33 = vadd.f32 %v1077_v31, %v452_v26  ;;  %v1088_v34 = vadd.f32 %v1087_v32, %v452_v26  ;;  %v1079_v35 = vpop.f32.mrb[10].mxu0  ;;  %v1089_v36 = vpop.f32.mrb[10].mxu1 }
 0x26c   : > { %v1080_v37 = vadd.f32 %v1079_v35, %v448_v25  ;;  %v1081_v38 = vpop.f32.mrb[11].mxu0  ;;  %v1090_v39 = vpop.f32.mrb[11].mxu1 }
 0x26d   : > { %v1337_v40 = vpack.c.bf16 %v1078_v33, %v1076_v29  ;;  %v1343_v44 = vpack.c.bf16 %v1088_v34, %v1086_v30  ;;  %v1082_v41 = vadd.f32 %v1081_v38, %v452_v26 }
 0x26f   : > { %1154 = vst [vmem:[%s1980_s17 + $0x10] sm:$0xff] %v1337_v40  ;;  %1160 = vst [vmem:[%s1980_s17 + $0x40] sm:$0xff] %v1343_v44  ;;  %v1340_v42 = vpack.c.bf16 %v1082_v41, %v1080_v37 }
 0x271   : > { %1157 = vst [vmem:[%s1980_s17 + $0x28] sm:$0xff] %v1340_v42 }
 0x272 PF: > { %s15_s18 = sadd.s32 1, %s1541_s18  }
 0x273   : > { %p12_p4 = scmp.ge.s32.totalorder %s15_s18, 4  }
 0x275   :  { %14 = sbr.rel (!%p12_p4) target bundleno = 1 (0x1), region = 70 }

// kernel: _lvsm_head_compute.16
= control target key start
LH: loop header
LB: loop body
LE: loop exit
PB: predicated region body
PF: predicated region fallthrough
CT: control target
= control target key end

     0   :  { %s570_s6 = smov 0   ;;  %s613_s0 = inlined_call_operand.vmem [shape: bf16[4,12,768], index: 0, kind: input, shape index: {}]   ;;  %s614_s1 = inlined_call_operand.vmem [shape: bf16[4,12,256], index: 1, kind: output, shape index: {}]  }
   0x1 LB: > { %s462_s7 = sadd.s32 4294967295, %s556_s6   ;;  %p466_p0 = scmp.ge.s32.totalorder %s556_s6, 1  ;;  %s556_s6 = sphi %s570_s6, %s11_s6  }
   0x2   : > { %p87_p1 = scmp.lt.s32.totalorder %s556_s6, 5 }
   0x4   : > { %p88_p2 = pnand %p466_p0, %p87_p1 }
   0x5   : > { %p107_p3 = scmp.lt.s32.totalorder (!%p88_p2), %s462_s7, 3  ;;  %v558_v0 = vmov (!%p88_p2), 0.0   ;;  %vm559_vm0 = vmmov (!%p88_p2), 0   ;;  %vm179_vm1 = vcmask (!%p88_p2), 97280   ;;  %vm183_vm2 = vcmask (!%p88_p2), 93184  }
   0x6   : > { %91 = sbr.rel (%p88_p2) target bundleno = 1316 (0x524), region = 24  ;;  %493 = vmatprep.subr.bf16.mxu0 (!%p88_p2), %v558_v0  ;;  %495 = vmatprep.mubr.msk.bf16.mxu0 (!%p88_p2), %vm559_vm0, %v558_v0  ;;  %vm212_vm3 = vcmask (!%p88_p2), 1045504  }
   0x7   : > { %499 = vmatprep.subr.bf16.mxu1 (!%p88_p2), %v558_v0  ;;  %501 = vmatprep.mubr.msk.bf16.mxu1 (!%p88_p2), %vm559_vm0, %v558_v0 }
   0xd   : > { %s616_s7 = smov (!%p107_p3, %s462_s7), 3 }
   0xe   : > { %s517_s8 = smul.u32 48, %s616_s7  ;;  %s482_s12 = sshll.u32 %s616_s7, 4 }
   0xf   : > { %s116_s15 = scalar_lea.vmem %s614_s1, %s482_s12 }
  0x10   : > { %s586_s11 = scalar_lea.vmem %s613_s0, %s517_s8 }
  0x11   : > { %v528_v1 = vld [vmem:[%s586_s11 + $0x8] ss:$24 sps:$4 sm:$0x3f]   ;;  %v531_v22 = vld [vmem:[%s586_s11 + $0x14] ss:$24 sps:$4 sm:$0x3f]  }
  0x12   : > { %494 = vmatpush3.bf16.xpose.msra.mxu0 %v528_v1  ;;  %v529_v2 = vld [vmem:[%s586_s11] ss:$24 sps:$4 sm:$0x3f]   ;;  %v530_v21 = vld [vmem:[%s586_s11 + $0x10] ss:$24 sps:$4 sm:$0x3f]  }
  0x13   : > { %511 = vmatprep.subr.bf16.mxu0 %v558_v0  ;;  %v214_v23 = vsel %vm212_vm3, %v530_v21, 0  ;;  %v351_v24 = vsel %vm212_vm3, %v531_v22, 0  ;;  %v532_v31 = vld [vmem:[%s586_s11 + $0xc] ss:$24 sps:$4 sm:$0x3f]  }
  0x14   : > { %500 = vmatpush3.bf16.msra.mxu1 %v214_v23  ;;  %v533_v33 = vld [vmem:[%s586_s11 + $0x4] ss:$24 sps:$4 sm:$0x3f]  }
  0x15   : > { %505 = vmatprep.subr.bf16.mxu1 %v558_v0 }
  0x19   : > { %496 = vmatmul.mubr.bf16.vlgmr.msra.gmra.mrb[0].mxu0 %v529_v2 }
  0x1a   : > { %513 = vmatprep.mubr.msk.bf16.mxu0 %vm559_vm0, %v558_v0  ;;  %512 = vmatpush3.bf16.msra.mxu0 %v351_v24 }
  0xec   : > { %v170_v3 = vpop.f32.mrb[0].mxu0 }
  0xed   : > { %v177_v4 = vmul.f32 0.088388346, %v170_v3  ;;  %v497_v5 = vpop.f32.mrb[1].mxu0 }
  0xee   : > { %v173_v6 = vpop.f32.mrb[2].mxu0 }
  0xef   : > { %v178_v7 = vmul.f32 0.088388346, %v173_v6  ;;  %v498_v8 = vpop.f32.mrb[3].mxu0  ;;  %v180_v9 = vsel %vm179_vm1, %v177_v4, -inf }
  0xf0   : > { %181 = vmax.xlane.f32.xlu0 %v180_v9 }
  0xf1   : > { %v184_v10 = vsel %vm183_vm2, %v178_v7, -inf }
  0xf4   : > { %185 = vmax.xlane.f32.xlu0 %v184_v10 }
 0x17d   : > { %v182_v11 = vpop.xlane.xlu0 %181 }
 0x17e   : > { %v187_v12 = vsub.f32 %v177_v4, %v182_v11 }
 0x180   : > { %v189_v13 = vmul.f32 1.442695, %v187_v12 }
 0x181   : > { %v186_v14 = vpop.xlane.xlu0 %185 }
 0x182   : > { %534 = vpow2.f32 %v189_v13  ;;  %v188_v15 = vsub.f32 %v178_v7, %v186_v14 }
 0x184   : > { %v191_v16 = vmul.f32 1.442695, %v188_v15 }
 0x186   : > { %536 = vpow2.f32 %v191_v16 }
 0x18c   : > { %v535_v17 = vpop.eup %534 }
 0x18d   : > { %v193_v18 = vsel %vm179_vm1, %v535_v17, 0.0 }
 0x18e   : > { %194 = vadd.xlane.f32.xlu1 %v193_v18 }
 0x190   : > { %v537_v19 = vpop.eup %536 }
 0x191   : > { %v196_v20 = vsel %vm183_vm2, %v537_v19, 0.0 }
 0x192   : > { %197 = vadd.xlane.f32.xlu1 %v196_v20 }
 0x21b   : > { %v195_v25 = vpop.xlane.xlu1 %194 }
 0x21c   : > { %538 = vrcp.f32 %v195_v25 }
 0x21f   : > { %v198_v26 = vpop.xlane.xlu1 %197 }
 0x220   : > { %540 = vrcp.f32 %v198_v26 }
 0x226   : > { %v539_v27 = vpop.eup %538 }
 0x227   : > { %v201_v29 = vmul.f32 %v539_v27, %v535_v17 }
 0x22a   : > { %v541_v28 = vpop.eup %540 }
 0x22b   : > { %v202_v30 = vmul.f32 %v541_v28, %v537_v19 }
 0x22d   : > { %v203_v32 = vpack.c.bf16 %v202_v30, %v201_v29 }
 0x22f   : > { %502 = vmatmul.mubr.msk.bf16.vlgmr.msra.gmra.mrb[0].mxu1 %vm179_vm1, %v203_v32 }
 0x230   : > { %506 = vmatpush3.bf16.xpose.msra.mxu1 %v532_v31  ;;  %507 = vmatprep.mubr.msk.bf16.mxu1 %vm559_vm0, %v558_v0 }
 0x237   : > { %508 = vmatmul.mubr.bf16.vlgmr.msra.gmra.mrb[4].mxu1 %v533_v33 }
 0x302   : > { %v250_v34 = vpop.f32.mrb[0].mxu1 }
 0x303   : > { %v503_v35 = vpop.f32.mrb[1].mxu1 }
 0x304   : > { %v253_v36 = vpop.f32.mrb[2].mxu1 }
 0x305   : > { %v504_v37 = vpop.f32.mrb[3].mxu1 }
 0x30a   : > { %v310_v38 = vpop.f32.mrb[4].mxu1 }
 0x30b   : > { %v317_v39 = vmul.f32 0.088388346, %v310_v38  ;;  %v509_v40 = vpop.f32.mrb[5].mxu1 }
 0x30c   : > { %v313_v41 = vpop.f32.mrb[6].mxu1 }
 0x30d   : > { %v318_v42 = vmul.f32 0.088388346, %v313_v41  ;;  %v510_v43 = vpop.f32.mrb[7].mxu1  ;;  %v319_v44 = vsel %vm179_vm1, %v317_v39, -inf }
 0x30e   : > { %320 = vmax.xlane.f32.xlu0 %v319_v44 }
 0x30f   : > { %v322_v45 = vsel %vm183_vm2, %v318_v42, -inf }
 0x310   : > { %323 = vmax.xlane.f32.xlu1 %v322_v45 }
 0x39b   : > { %v321_v46 = vpop.xlane.xlu0 %320 }
 0x39c   : > { %v325_v47 = vsub.f32 %v317_v39, %v321_v46 }
 0x39d   : > { %v324_v48 = vpop.xlane.xlu1 %323 }
 0x39e   : > { %v327_v49 = vmul.f32 1.442695, %v325_v47  ;;  %v326_v50 = vsub.f32 %v318_v42, %v324_v48 }
 0x3a0   : > { %542 = vpow2.f32 %v327_v49  ;;  %v329_v51 = vmul.f32 1.442695, %v326_v50 }
 0x3a2   : > { %544 = vpow2.f32 %v329_v51 }
 0x3aa   : > { %v543_v52 = vpop.eup %542 }
 0x3ab   : > { %v331_v53 = vsel %vm179_vm1, %v543_v52, 0.0 }
 0x3ac   : > { %v545_v54 = vpop.eup %544  ;;  %332 = vadd.xlane.f32.xlu0 %v331_v53 }
 0x3ad   : > { %v334_v55 = vsel %vm183_vm2, %v545_v54, 0.0 }
 0x3ae   : > { %335 = vadd.xlane.f32.xlu1 %v334_v55 }
 0x439   : > { %v333_v56 = vpop.xlane.xlu0 %332 }
 0x43a   : > { %546 = vrcp.f32 %v333_v56 }
 0x43b   : > { %v336_v57 = vpop.xlane.xlu1 %335 }
 0x43c   : > { %548 = vrcp.f32 %v336_v57 }
 0x444   : > { %v547_v58 = vpop.eup %546 }
 0x445   : > { %v339_v60 = vmul.f32 %v547_v58, %v543_v52 }
 0x446   : > { %v549_v59 = vpop.eup %548 }
 0x447   : > { %v340_v61 = vmul.f32 %v549_v59, %v545_v54 }
 0x449   : > { %v341_v62 = vpack.c.bf16 %v340_v61, %v339_v60 }
 0x44b   : > { %514 = vmatmul.mubr.msk.bf16.vlgmr.msra.gmra.mrb[4].mxu0 %vm179_vm1, %v341_v62 }
 0x51e   : > { %v387_v63 = vpop.f32.mrb[4].mxu0 }
 0x51f   : > { %v483_v0 = vpack.c.bf16 %v387_v63, %v250_v34  ;;  %v515_v1 = vpop.f32.mrb[5].mxu0 }
 0x520   : > { %v390_v2 = vpop.f32.mrb[6].mxu0 }
 0x521   : > { %405 = vst [vmem:[%s116_s15] sm:$0xff] %v483_v0  ;;  %v484_v3 = vpack.c.bf16 %v390_v2, %v253_v36  ;;  %v516_v4 = vpop.f32.mrb[7].mxu0 }
 0x523   : > { %406 = vst [vmem:[%s116_s15 + $0x8] sm:$0x33] %v484_v3 }
 0x524 PF: > { %s11_s6 = sadd.s32 1, %s556_s6  }
 0x525   : > { %p8_p4 = scmp.ge.s32.totalorder %s11_s6, 6  }
 0x527   :  { %10 = sbr.rel (!%p8_p4) target bundleno = 1 (0x1), region = 54 }

// kernel: _lvsm_head_compute.17
= control target key start
LH: loop header
LB: loop body
LE: loop exit
PB: predicated region body
PF: predicated region fallthrough
CT: control target
= control target key end

     0   :  { %s798_s15 = smov 0   ;;  %s933_s0 = inlined_call_operand.vmem [shape: bf16[48,256], index: 0, kind: input, shape index: {}]   ;;  %s934_s1 = inlined_call_operand.vmem [shape: bf16[256,256], index: 1, kind: input, shape index: {}]   ;;  %s935_s2 = inlined_call_operand.vmem [shape: f32[1,256], index: 2, kind: input, shape index: {}]   ;;  %s936_s3 = inlined_call_operand.vmem [shape: bf16[48,256], index: 3, kind: input, shape index: {}]   ;;  %s937_s4 = inlined_call_operand.vmem [shape: bf16[48,256], index: 4, kind: output, shape index: {}]  }
   0x1 LB: > { %s614_s16 = sadd.s32 4294967295, %s771_s15   ;;  %p618_p0 = scmp.ge.s32.totalorder %s771_s15, 1  ;;  %s771_s15 = sphi %s798_s15, %s14_s15  }
   0x2   : > { %p176_p1 = scmp.lt.s32.totalorder %s771_s15, 3 }
   0x4   : > { %p177_p2 = pnand %p618_p0, %p176_p1 }
   0x5   : > { %v712_v0 = vld [vmem:[%s934_s1 + $0x4] ss:$8 sps:$4 sm:$0xff] (!%p177_p2)   ;;  %v714_v1 = vld [vmem:[%s934_s1] ss:$8 sps:$4 sm:$0xff] (!%p177_p2)   ;;  %v715_v2 = vld [vmem:[%s934_s1 + $0x14] ss:$8 sps:$4 sm:$0xff] (!%p177_p2)   ;;  %v268_v37 = vlaneseq (!%p177_p2) }
   0x6   : > { %180 = sbr.rel (%p177_p2) target bundleno = 292 (0x124), region = 36  ;;  %455 = vmatprep.subr.bf16.mxu0 (!%p177_p2), %v712_v0  ;;  %672 = vmatprep.subr.bf16.mxu1 (!%p177_p2), %v712_v0  ;;  %v717_v3 = vld [vmem:[%s934_s1 + $0x10] ss:$8 sps:$4 sm:$0xff] (!%p177_p2)   ;;  %v718_v4 = vld [vmem:[%s934_s1 + $0x24] ss:$8 sps:$4 sm:$0xff] (!%p177_p2)  }
   0x7   : > { %456 = vmatpush1.bf16.msra.mxu0 (!%p177_p2), %v714_v1  ;;  %688 = vmatpush1.bf16.msra.mxu1 (!%p177_p2), %v714_v1  ;;  %s210_s27 = smul.u32 (!%p177_p2), 3, %s614_s16  ;;  %v720_v5 = vld [vmem:[%s934_s1 + $0x20] ss:$8 sps:$4 sm:$0xff] (!%p177_p2)   ;;  %v721_v6 = vld [vmem:[%s934_s1 + $0x34] ss:$8 sps:$4 sm:$0xff] (!%p177_p2)   ;;  %v269_v38 = vshrl.u32 (!%p177_p2), %v268_v37, 7 }
   0x8   : > { %457 = vmatprep.subr.bf16.mxu0 (!%p177_p2), %v715_v2  ;;  %673 = vmatprep.subr.bf16.mxu1 (!%p177_p2), %v715_v2  ;;  %v723_v7 = vld [vmem:[%s934_s1 + $0x30] ss:$8 sps:$4 sm:$0xff] (!%p177_p2)   ;;  %v724_v8 = vld [vmem:[%s934_s1 + $0x44] ss:$8 sps:$4 sm:$0xff] (!%p177_p2)   ;;  %v726_v9 = vld [vmem:[%s934_s1 + $0x40] ss:$8 sps:$4 sm:$0xff] (!%p177_p2)  }
   0x9   : > { %p211_p3 = scmp.lt.s32.totalorder (!%p177_p2), %s210_s27, 5  ;;  %v727_v10 = vld [vmem:[%s934_s1 + $0x54] ss:$8 sps:$4 sm:$0xff] (!%p177_p2)   ;;  %v729_v11 = vld [vmem:[%s934_s1 + $0x50] ss:$8 sps:$4 sm:$0xff] (!%p177_p2)   ;;  %v270_v39 = vsub.s32 (!%p177_p2), 0, %v269_v38 }
   0xa   : > { %v730_v12 = vld [vmem:[%s934_s1 + $0x64] ss:$8 sps:$4 sm:$0xff] (!%p177_p2)   ;;  %v732_v15 = vld [vmem:[%s934_s1 + $0x60] ss:$8 sps:$4 sm:$0xff] (!%p177_p2)   ;;  %v733_v17 = vld [vmem:[%s934_s1 + $0x74] ss:$8 sps:$4 sm:$0xff] (!%p177_p2)  }
   0xb   : > { %458 = vmatpush1.bf16.msra.mxu0 (!%p177_p2), %v717_v3  ;;  %689 = vmatpush1.bf16.msra.mxu1 (!%p177_p2), %v717_v3  ;;  %v735_v18 = vld [vmem:[%s934_s1 + $0x70] ss:$8 sps:$4 sm:$0xff] (!%p177_p2)   ;;  %v736_v19 = vld [vmem:[%s934_s1 + $0x84] ss:$8 sps:$4 sm:$0xff] (!%p177_p2)   ;;  %v738_v20 = vld [vmem:[%s934_s1 + $0x80] ss:$8 sps:$4 sm:$0xff] (!%p177_p2)  }
   0xc   : > { %459 = vmatprep.subr.bf16.mxu0 (!%p177_p2), %v718_v4  ;;  %674 = vmatprep.subr.bf16.mxu1 (!%p177_p2), %v718_v4  ;;  %v739_v21 = vld [vmem:[%s934_s1 + $0x94] ss:$8 sps:$4 sm:$0xff] (!%p177_p2)   ;;  %v741_v22 = vld [vmem:[%s934_s1 + $0x90] ss:$8 sps:$4 sm:$0xff] (!%p177_p2)   ;;  %v742_v23 = vld [vmem:[%s934_s1 + $0xa4] ss:$8 sps:$4 sm:$0xff] (!%p177_p2)  }
   0xd   : > { %s939_s27 = smov (!%p211_p3, %s210_s27), 5  ;;  %v744_v24 = vld [vmem:[%s934_s1 + $0xa0] ss:$8 sps:$4 sm:$0xff]   ;;  %v745_v25 = vld [vmem:[%s934_s1 + $0xb4] ss:$8 sps:$4 sm:$0xff]   ;;  %v274_v41 = vsub.s32 1, %v269_v38 }
   0xe   : > { %s839_s14 = sshll.u32 %s939_s27, 3  ;;  %v747_v26 = vld [vmem:[%s934_s1 + $0xb0] ss:$8 sps:$4 sm:$0xff]   ;;  %v748_v27 = vld [vmem:[%s934_s1 + $0xc4] ss:$8 sps:$4 sm:$0xff]  }
   0xf   : > { %460 = vmatpush1.bf16.msra.mxu0 %v720_v5  ;;  %690 = vmatpush1.bf16.msra.mxu1 %v720_v5  ;;  %s848_s20 = scalar_lea.vmem %s933_s0, %s839_s14  ;;  %v750_v28 = vld [vmem:[%s934_s1 + $0xc0] ss:$8 sps:$4 sm:$0xff]   ;;  %v751_v29 = vld [vmem:[%s934_s1 + $0xd4] ss:$8 sps:$4 sm:$0xff]   ;;  %v753_v30 = vld [vmem:[%s934_s1 + $0xd0] ss:$8 sps:$4 sm:$0xff]   ;;  %s222_s16 = scalar_lea.vmem %s936_s3, %s839_s14 }
  0x10   : > { %461 = vmatprep.subr.bf16.mxu0 %v721_v6  ;;  %675 = vmatprep.subr.bf16.mxu1 %v721_v6  ;;  %v762_v13 = vld [vmem:[%s848_s20 + $0x4] ss:$8 sps:$4 sm:$0xff]   ;;  %v855_v14 = vld [vmem:[%s848_s20 + $0x10] sm:$0xff]  ;;  %v756_v32 = vld [vmem:[%s934_s1 + $0xe0] ss:$8 sps:$4 sm:$0xff]   ;;  %s229_s21 = scalar_lea.vmem %s937_s4, %s839_s14 }
  0x11   : > { %v628_v16 = vcombine.high %v855_v14, %v855_v14  ;;  %487 = vmatprep.mubr.bf16.mxu0 %v762_v13  ;;  %v754_v31 = vld [vmem:[%s934_s1 + $0xe4] ss:$8 sps:$4 sm:$0xff]   ;;  %v757_v33 = vld [vmem:[%s934_s1 + $0xf4] ss:$8 sps:$4 sm:$0xff]   ;;  %v759_v34 = vld [vmem:[%s934_s1 + $0xf0] ss:$8 sps:$4 sm:$0xff]   ;;  %v627_v36 = vcombine.low %v855_v14, %v855_v14 }
  0x12   : > { %v760_v35 = vld [vmem:[%s848_s20] ss:$8 sps:$4 sm:$0xff]   ;;  %v508_v43 = vld [vmem:[%s222_s16 + $0x10] sm:$0xff] }
  0x13   : > { %462 = vmatpush1.bf16.msra.mxu0 %v723_v7  ;;  %691 = vmatpush1.bf16.msra.mxu1 %v723_v7  ;;  %v266_v40 = vld [vmem:[%s935_s2] sm:$0x3]  ;;  %v507_v46 = vld [vmem:[%s222_s16 + $0x8] sm:$0xff]  ;;  %v513_v48 = vunpack.c.l.bf16 %v508_v43  ;;  %v514_v52 = vunpack.c.h.bf16 %v508_v43 }
  0x14   : > { %463 = vmatprep.subr.bf16.mxu0 %v724_v8  ;;  %676 = vmatprep.subr.bf16.mxu1 %v724_v8  ;;  %v506_v42 = vld [vmem:[%s222_s16] sm:$0xff]  ;;  %v271_v44 = vrot.slane %v266_v40, %v270_v39  ;;  %v275_v45 = vrot.slane %v266_v40, %v274_v41  ;;  %v511_v57 = vunpack.c.l.bf16 %v507_v46  ;;  %v512_v62 = vunpack.c.h.bf16 %v507_v46 }
  0x15   : > { %497 = vmatprep.mubr.bf16.mxu1 %v628_v16  ;;  %v509_v47 = vunpack.c.l.bf16 %v506_v42  ;;  %v510_v51 = vunpack.c.h.bf16 %v506_v42 }
  0x17   : > { %464 = vmatpush1.bf16.msra.mxu0 %v726_v9  ;;  %692 = vmatpush1.bf16.msra.mxu1 %v726_v9 }
  0x18   : > { %465 = vmatprep.subr.bf16.mxu0 %v727_v10  ;;  %677 = vmatprep.subr.bf16.mxu1 %v727_v10 }
  0x1b   : > { %466 = vmatpush1.bf16.msra.mxu0 %v729_v11  ;;  %693 = vmatpush1.bf16.msra.mxu1 %v729_v11 }
  0x1c   : > { %467 = vmatprep.subr.bf16.mxu0 %v730_v12  ;;  %678 = vmatprep.subr.bf16.mxu1 %v730_v12 }
  0x1f   : > { %468 = vmatpush1.bf16.msra.mxu0 %v732_v15  ;;  %694 = vmatpush1.bf16.msra.mxu1 %v732_v15 }
  0x20   : > { %469 = vmatprep.subr.bf16.mxu0 %v733_v17  ;;  %679 = vmatprep.subr.bf16.mxu1 %v733_v17 }
  0x23   : > { %470 = vmatpush1.bf16.msra.mxu0 %v735_v18  ;;  %695 = vmatpush1.bf16.msra.mxu1 %v735_v18 }
  0x24   : > { %471 = vmatprep.subr.bf16.mxu0 %v736_v19  ;;  %680 = vmatprep.subr.bf16.mxu1 %v736_v19 }
  0x27   : > { %472 = vmatpush1.bf16.msra.mxu0 %v738_v20  ;;  %696 = vmatpush1.bf16.msra.mxu1 %v738_v20 }
  0x28   : > { %473 = vmatprep.subr.bf16.mxu0 %v739_v21  ;;  %681 = vmatprep.subr.bf16.mxu1 %v739_v21 }
  0x2b   : > { %474 = vmatpush1.bf16.msra.mxu0 %v741_v22  ;;  %697 = vmatpush1.bf16.msra.mxu1 %v741_v22 }
  0x2c   : > { %475 = vmatprep.subr.bf16.mxu0 %v742_v23  ;;  %682 = vmatprep.subr.bf16.mxu1 %v742_v23 }
  0x2f   : > { %476 = vmatpush1.bf16.msra.mxu0 %v744_v24  ;;  %698 = vmatpush1.bf16.msra.mxu1 %v744_v24 }
  0x30   : > { %477 = vmatprep.subr.bf16.mxu0 %v745_v25  ;;  %683 = vmatprep.subr.bf16.mxu1 %v745_v25 }
  0x33   : > { %478 = vmatpush1.bf16.msra.mxu0 %v747_v26  ;;  %699 = vmatpush1.bf16.msra.mxu1 %v747_v26 }
  0x34   : > { %479 = vmatprep.subr.bf16.mxu0 %v748_v27  ;;  %684 = vmatprep.subr.bf16.mxu1 %v748_v27 }
  0x37   : > { %480 = vmatpush1.bf16.msra.mxu0 %v750_v28  ;;  %700 = vmatpush1.bf16.msra.mxu1 %v750_v28 }
  0x38   : > { %481 = vmatprep.subr.bf16.mxu0 %v751_v29  ;;  %685 = vmatprep.subr.bf16.mxu1 %v751_v29 }
  0x3b   : > { %482 = vmatpush1.bf16.msra.mxu0 %v753_v30  ;;  %701 = vmatpush1.bf16.msra.mxu1 %v753_v30 }
  0x3c   : > { %483 = vmatprep.subr.bf16.mxu0 %v754_v31  ;;  %686 = vmatprep.subr.bf16.mxu1 %v754_v31 }
  0x3f   : > { %484 = vmatpush1.bf16.msra.mxu0 %v756_v32  ;;  %702 = vmatpush1.bf16.msra.mxu1 %v756_v32 }
  0x40   : > { %485 = vmatprep.subr.bf16.mxu0 %v757_v33  ;;  %687 = vmatprep.subr.bf16.mxu1 %v757_v33 }
  0x43   : > { %486 = vmatpush1.bf16.msra.mxu0 %v759_v34  ;;  %703 = vmatpush1.bf16.msra.mxu1 %v759_v34 }
  0x46   : > { %488 = vmatmul.mubr.bf16.vlgmr.msra.gmra.mrb[0].mxu0 %v760_v35  ;;  %498 = vmatmul.mubr.bf16.vlgmr.msra.gmra.mrb[0].mxu1 %v627_v36 }
 0x119   : > { %v489_v49 = vpop.f32.mrb[0].mxu0  ;;  %v499_v50 = vpop.f32.mrb[0].mxu1 }
 0x11a   : > { %v490_v53 = vadd.f32 %v489_v49, %v271_v44  ;;  %v500_v54 = vadd.f32 %v499_v50, %v271_v44  ;;  %v491_v55 = vpop.f32.mrb[1].mxu0  ;;  %v501_v56 = vpop.f32.mrb[1].mxu1 }
 0x11b   : > { %v492_v58 = vadd.f32 %v491_v55, %v275_v45  ;;  %v502_v59 = vadd.f32 %v501_v56, %v275_v45  ;;  %v493_v60 = vpop.f32.mrb[2].mxu0  ;;  %v503_v61 = vpop.f32.mrb[2].mxu1 }
 0x11c   : > { %v515_v63 = vadd.f32 %v509_v47, %v490_v53  ;;  %v519_v0 = vadd.f32 %v513_v48, %v500_v54  ;;  %v494_v1 = vadd.f32 %v493_v60, %v271_v44  ;;  %v495_v2 = vpop.f32.mrb[3].mxu0  ;;  %v504_v3 = vpop.f32.mrb[3].mxu1 }
 0x11d   : > { %v516_v4 = vadd.f32 %v510_v51, %v492_v58  ;;  %v520_v5 = vadd.f32 %v514_v52, %v502_v59  ;;  %v496_v6 = vadd.f32 %v495_v2, %v275_v45 }
 0x11e   : > { %v517_v7 = vadd.f32 %v511_v57, %v494_v1 }
 0x11f   : > { %v669_v8 = vpack.c.bf16 %v516_v4, %v515_v63  ;;  %v671_v9 = vpack.c.bf16 %v520_v5, %v519_v0  ;;  %v518_v10 = vadd.f32 %v512_v62, %v496_v6 }
 0x121   : > { %541 = vst [vmem:[%s229_s21] sm:$0xff] %v669_v8  ;;  %543 = vst [vmem:[%s229_s21 + $0x10] sm:$0xff] %v671_v9  ;;  %v670_v11 = vpack.c.bf16 %v518_v10, %v517_v7 }
 0x123   : > { %542 = vst [vmem:[%s229_s21 + $0x8] sm:$0xff] %v670_v11 }
 0x124 PF: > { %s14_s15 = sadd.s32 1, %s771_s15  }
 0x125   : > { %p11_p4 = scmp.ge.s32.totalorder %s14_s15, 4  }
 0x127   :  { %13 = sbr.rel (!%p11_p4) target bundleno = 1 (0x1), region = 69 }

// kernel: _lvsm_head_compute.18
= control target key start
LH: loop header
LB: loop body
LE: loop exit
PB: predicated region body
PF: predicated region fallthrough
CT: control target
= control target key end

     0   :  { %s1312_s18 = smov 0   ;;  %s1712_s0 = inlined_call_operand.vmem [shape: bf16[48,256], index: 0, kind: input, shape index: {}]   ;;  %s1713_s1 = inlined_call_operand.vmem [shape: f32[1,256], index: 1, kind: input, shape index: {}]   ;;  %s1714_s2 = inlined_call_operand.vmem [shape: f32[1,256], index: 2, kind: input, shape index: {}]   ;;  %s1715_s3 = inlined_call_operand.vmem [shape: bf16[256,512], index: 3, kind: input, shape index: {}]   ;;  %s1716_s4 = inlined_call_operand.vmem [shape: f32[1,512], index: 4, kind: input, shape index: {}]   ;;  %s1717_s5 = inlined_call_operand.vmem [shape: bf16[48,512], index: 5, kind: output, shape index: {}]  }
   0x1 LB: > { %s1051_s19 = sadd.s32 4294967295, %s1280_s18   ;;  %p1055_p0 = scmp.ge.s32.totalorder %s1280_s18, 1  ;;  %s1280_s18 = sphi %s1312_s18, %s15_s18  }
   0x2   : > { %p189_p1 = scmp.lt.s32.totalorder %s1280_s18, 3 }
   0x4   : > { %p190_p2 = pnand %p1055_p0, %p189_p1 }
   0x5   : > { %s219_s20 = smul.u32 (!%p190_p2), 3, %s1051_s19  ;;  %v1148_v12 = vld [vmem:[%s1715_s3 + $0x4] ss:$16 sps:$4 sm:$0xff] (!%p190_p2)   ;;  %v1150_v13 = vld [vmem:[%s1715_s3 + $0xc] ss:$16 sps:$4 sm:$0xff] (!%p190_p2)  }
   0x6   : > { %193 = sbr.rel (%p190_p2) target bundleno = 601 (0x259), region = 40  ;;  %v1152_v14 = vld [vmem:[%s1715_s3] ss:$16 sps:$4 sm:$0xff] (!%p190_p2)   ;;  %v1153_v15 = vld [vmem:[%s1715_s3 + $0x8] ss:$16 sps:$4 sm:$0xff] (!%p190_p2)   ;;  %737 = vmatprep.subr.bf16.mxu0 (!%p190_p2), %v1148_v12  ;;  %788 = vmatprep.subr.bf16.mxu1 (!%p190_p2), %v1150_v13 }
   0x7   : > { %p220_p3 = scmp.lt.s32.totalorder (!%p190_p2), %s219_s20, 5  ;;  %v1154_v16 = vld [vmem:[%s1715_s3 + $0x24] ss:$16 sps:$4 sm:$0xff] (!%p190_p2)   ;;  %v1156_v17 = vld [vmem:[%s1715_s3 + $0x2c] ss:$16 sps:$4 sm:$0xff] (!%p190_p2)   ;;  %738 = vmatpush1.bf16.msra.mxu0 (!%p190_p2), %v1152_v14  ;;  %789 = vmatpush1.bf16.msra.mxu1 (!%p190_p2), %v1153_v15 }
   0x8   : > { %v1158_v18 = vld [vmem:[%s1715_s3 + $0x20] ss:$16 sps:$4 sm:$0xff] (!%p190_p2)   ;;  %v1159_v19 = vld [vmem:[%s1715_s3 + $0x28] ss:$16 sps:$4 sm:$0xff] (!%p190_p2)   ;;  %739 = vmatprep.subr.bf16.mxu0 (!%p190_p2), %v1154_v16  ;;  %790 = vmatprep.subr.bf16.mxu1 (!%p190_p2), %v1156_v17  ;;  %v1160_v20 = vld [vmem:[%s1715_s3 + $0x44] ss:$16 sps:$4 sm:$0xff] (!%p190_p2)  }
   0x9   : > { %v1162_v21 = vld [vmem:[%s1715_s3 + $0x4c] ss:$16 sps:$4 sm:$0xff] (!%p190_p2)   ;;  %v1164_v22 = vld [vmem:[%s1715_s3 + $0x40] ss:$16 sps:$4 sm:$0xff] (!%p190_p2)   ;;  %v1165_v23 = vld [vmem:[%s1715_s3 + $0x48] ss:$16 sps:$4 sm:$0xff] (!%p190_p2)  }
   0xa   : > { %v1166_v24 = vld [vmem:[%s1715_s3 + $0x64] ss:$16 sps:$4 sm:$0xff] (!%p190_p2)   ;;  %v1168_v25 = vld [vmem:[%s1715_s3 + $0x6c] ss:$16 sps:$4 sm:$0xff] (!%p190_p2)   ;;  %v1170_v26 = vld [vmem:[%s1715_s3 + $0x60] ss:$16 sps:$4 sm:$0xff] (!%p190_p2)  }
   0xb   : > { %740 = vmatpush1.bf16.msra.mxu0 (!%p190_p2), %v1158_v18  ;;  %791 = vmatpush1.bf16.msra.mxu1 (!%p190_p2), %v1159_v19  ;;  %v1171_v27 = vld [vmem:[%s1715_s3 + $0x68] ss:$16 sps:$4 sm:$0xff] (!%p190_p2)   ;;  %v1172_v28 = vld [vmem:[%s1715_s3 + $0x84] ss:$16 sps:$4 sm:$0xff] (!%p190_p2)   ;;  %v1174_v29 = vld [vmem:[%s1715_s3 + $0x8c] ss:$16 sps:$4 sm:$0xff] (!%p190_p2)  }
   0xc   : > { %741 = vmatprep.subr.bf16.mxu0 (!%p190_p2), %v1160_v20  ;;  %792 = vmatprep.subr.bf16.mxu1 (!%p190_p2), %v1162_v21  ;;  %v1176_v30 = vld [vmem:[%s1715_s3 + $0x80] ss:$16 sps:$4 sm:$0xff] (!%p190_p2)   ;;  %v1177_v31 = vld [vmem:[%s1715_s3 + $0x88] ss:$16 sps:$4 sm:$0xff] (!%p190_p2)   ;;  %v1178_v32 = vld [vmem:[%s1715_s3 + $0xa4] ss:$16 sps:$4 sm:$0xff] (!%p190_p2)  }
   0xd   : > { %s1719_s20 = smov (!%p220_p3, %s219_s20), 5  ;;  %v1180_v33 = vld [vmem:[%s1715_s3 + $0xac] ss:$16 sps:$4 sm:$0xff]   ;;  %v1182_v34 = vld [vmem:[%s1715_s3 + $0xa0] ss:$16 sps:$4 sm:$0xff]  }
   0xe   : > { %s1132_s21 = sshll.u32 %s1719_s20, 3  ;;  %v1183_v35 = vld [vmem:[%s1715_s3 + $0xa8] ss:$16 sps:$4 sm:$0xff]   ;;  %v1184_v36 = vld [vmem:[%s1715_s3 + $0xc4] ss:$16 sps:$4 sm:$0xff]  }
   0xf   : > { %s224_s24 = scalar_lea.vmem %s1712_s0, %s1132_s21  ;;  %742 = vmatpush1.bf16.msra.mxu0 %v1164_v22  ;;  %793 = vmatpush1.bf16.msra.mxu1 %v1165_v23  ;;  %v1186_v37 = vld [vmem:[%s1715_s3 + $0xcc] ss:$16 sps:$4 sm:$0xff]   ;;  %v1188_v38 = vld [vmem:[%s1715_s3 + $0xc0] ss:$16 sps:$4 sm:$0xff]   ;;  %v1189_v39 = vld [vmem:[%s1715_s3 + $0xc8] ss:$16 sps:$4 sm:$0xff]  }
  0x10   : > { %v1326_v0 = vld [vmem:[%s224_s24] sm:$0xff]  ;;  %v1328_v1 = vld [vmem:[%s224_s24 + $0x10] sm:$0xff]  ;;  %v1330_v2 = vld [vmem:[%s224_s24 + $0x8] sm:$0xff]  ;;  %743 = vmatprep.subr.bf16.mxu0 %v1166_v24  ;;  %794 = vmatprep.subr.bf16.mxu1 %v1168_v25  ;;  %s1133_s21 = sshll.u32 %s1719_s20, 4 }
  0x11   : > { %v236_v3 = vunpack.c.l.bf16 %v1326_v0  ;;  %v237_v4 = vunpack.c.h.bf16 %v1326_v0  ;;  %v240_v5 = vunpack.c.l.bf16 %v1328_v1  ;;  %v241_v6 = vunpack.c.h.bf16 %v1328_v1  ;;  %v1190_v40 = vld [vmem:[%s1715_s3 + $0xe4] ss:$16 sps:$4 sm:$0xff]   ;;  %v1192_v41 = vld [vmem:[%s1715_s3 + $0xec] ss:$16 sps:$4 sm:$0xff]   ;;  %v1194_v42 = vld [vmem:[%s1715_s3 + $0xe0] ss:$16 sps:$4 sm:$0xff]   ;;  %s1692_s24 = scalar_lea.vmem %s1717_s5, %s1133_s21 }
  0x12   : > { %v238_v7 = vunpack.c.l.bf16 %v1330_v2  ;;  %v239_v8 = vunpack.c.h.bf16 %v1330_v2  ;;  %v1195_v43 = vld [vmem:[%s1715_s3 + $0xe8] ss:$16 sps:$4 sm:$0xff]   ;;  %v1196_v44 = vld [vmem:[%s1715_s3 + $0x104] ss:$16 sps:$4 sm:$0xff]   ;;  %v1198_v45 = vld [vmem:[%s1715_s3 + $0x10c] ss:$16 sps:$4 sm:$0xff]  }
  0x13   : > { %v242_v9 = vadd.f32 %v237_v4, %v236_v3  ;;  %v248_v10 = vadd.f32 %v241_v6, %v240_v5  ;;  %744 = vmatpush1.bf16.msra.mxu0 %v1170_v26  ;;  %795 = vmatpush1.bf16.msra.mxu1 %v1171_v27  ;;  %v1200_v46 = vld [vmem:[%s1715_s3 + $0x100] ss:$16 sps:$4 sm:$0xff]   ;;  %v1201_v47 = vld [vmem:[%s1715_s3 + $0x108] ss:$16 sps:$4 sm:$0xff]   ;;  %v1204_v2 = vld [vmem:[%s1715_s3 + $0x12c] ss:$16 sps:$4 sm:$0xff]  }
  0x14   : > { %v245_v11 = vadd.f32 %v239_v8, %v238_v7  ;;  %745 = vmatprep.subr.bf16.mxu0 %v1172_v28  ;;  %796 = vmatprep.subr.bf16.mxu1 %v1174_v29  ;;  %v1213_v12 = vld [vmem:[%s1715_s3 + $0x148] ss:$16 sps:$4 sm:$0xff]   ;;  %v1214_v13 = vld [vmem:[%s1715_s3 + $0x164] ss:$16 sps:$4 sm:$0xff]   ;;  %v1216_v14 = vld [vmem:[%s1715_s3 + $0x16c] ss:$16 sps:$4 sm:$0xff]  }
  0x15   : > { %243 = vadd.xlane.f32.xlu0 %v242_v9  ;;  %249 = vadd.xlane.f32.xlu1 %v248_v10  ;;  %v1208_v9 = vld [vmem:[%s1715_s3 + $0x144] ss:$16 sps:$4 sm:$0xff]   ;;  %v1210_v10 = vld [vmem:[%s1715_s3 + $0x14c] ss:$16 sps:$4 sm:$0xff]   ;;  %v1218_v15 = vld [vmem:[%s1715_s3 + $0x160] ss:$16 sps:$4 sm:$0xff]  }
  0x16   : > { %v1219_v16 = vld [vmem:[%s1715_s3 + $0x168] ss:$16 sps:$4 sm:$0xff]   ;;  %v1220_v17 = vld [vmem:[%s1715_s3 + $0x184] ss:$16 sps:$4 sm:$0xff]   ;;  %v1222_v18 = vld [vmem:[%s1715_s3 + $0x18c] ss:$16 sps:$4 sm:$0xff]  }
  0x17   : > { %746 = vmatpush1.bf16.msra.mxu0 %v1176_v30  ;;  %797 = vmatpush1.bf16.msra.mxu1 %v1177_v31  ;;  %v1224_v19 = vld [vmem:[%s1715_s3 + $0x180] ss:$16 sps:$4 sm:$0xff]   ;;  %v1225_v20 = vld [vmem:[%s1715_s3 + $0x188] ss:$16 sps:$4 sm:$0xff]   ;;  %v1226_v21 = vld [vmem:[%s1715_s3 + $0x1a4] ss:$16 sps:$4 sm:$0xff]  }
  0x18   : > { %747 = vmatprep.subr.bf16.mxu0 %v1178_v32  ;;  %798 = vmatprep.subr.bf16.mxu1 %v1180_v33  ;;  %v1228_v22 = vld [vmem:[%s1715_s3 + $0x1ac] ss:$16 sps:$4 sm:$0xff]   ;;  %v1230_v23 = vld [vmem:[%s1715_s3 + $0x1a0] ss:$16 sps:$4 sm:$0xff]   ;;  %v1231_v24 = vld [vmem:[%s1715_s3 + $0x1a8] ss:$16 sps:$4 sm:$0xff]  }
  0x19   : > { %246 = vadd.xlane.f32.xlu0 %v245_v11  ;;  %v1212_v11 = vld [vmem:[%s1715_s3 + $0x140] ss:$16 sps:$4 sm:$0xff]   ;;  %v1232_v25 = vld [vmem:[%s1715_s3 + $0x1c4] ss:$16 sps:$4 sm:$0xff]   ;;  %v1234_v26 = vld [vmem:[%s1715_s3 + $0x1cc] ss:$16 sps:$4 sm:$0xff]  }
  0x1a   : > { %v1236_v27 = vld [vmem:[%s1715_s3 + $0x1c0] ss:$16 sps:$4 sm:$0xff]   ;;  %v1237_v28 = vld [vmem:[%s1715_s3 + $0x1c8] ss:$16 sps:$4 sm:$0xff]   ;;  %v1238_v29 = vld [vmem:[%s1715_s3 + $0x1e4] ss:$16 sps:$4 sm:$0xff]  }
  0x1b   : > { %748 = vmatpush1.bf16.msra.mxu0 %v1182_v34  ;;  %799 = vmatpush1.bf16.msra.mxu1 %v1183_v35  ;;  %v1240_v30 = vld [vmem:[%s1715_s3 + $0x1ec] ss:$16 sps:$4 sm:$0xff]   ;;  %v1242_v31 = vld [vmem:[%s1715_s3 + $0x1e0] ss:$16 sps:$4 sm:$0xff]   ;;  %v1243_v32 = vld [vmem:[%s1715_s3 + $0x1e8] ss:$16 sps:$4 sm:$0xff]  }
  0x1c   : > { %749 = vmatprep.subr.bf16.mxu0 %v1184_v36  ;;  %800 = vmatprep.subr.bf16.mxu1 %v1186_v37 }
  0x1f   : > { %750 = vmatpush1.bf16.msra.mxu0 %v1188_v38  ;;  %801 = vmatpush1.bf16.msra.mxu1 %v1189_v39  ;;  %v293_v38 = vlaneseq }
  0x20   : > { %751 = vmatprep.subr.bf16.mxu0 %v1190_v40  ;;  %802 = vmatprep.subr.bf16.mxu1 %v1192_v41 }
  0x23   : > { %752 = vmatpush1.bf16.msra.mxu0 %v1194_v42  ;;  %803 = vmatpush1.bf16.msra.mxu1 %v1195_v43  ;;  %v294_v43 = vshrl.u32 %v293_v38, 7 }
  0x24   : > { %753 = vmatprep.subr.bf16.mxu0 %v1196_v44  ;;  %804 = vmatprep.subr.bf16.mxu1 %v1198_v45  ;;  %v291_v45 = vld [vmem:[%s1713_s1] sm:$0x3] }
  0x25   : > { %v299_v44 = vsub.s32 1, %v294_v43 }
  0x27   : > { %754 = vmatpush1.bf16.msra.mxu0 %v1200_v46  ;;  %805 = vmatpush1.bf16.msra.mxu1 %v1201_v47  ;;  %v295_v46 = vsub.s32 0, %v294_v43 }
  0x28   : > { %806 = vmatprep.subr.bf16.mxu1 %v1204_v2 }
  0xa2   : > { %v244_v48 = vpop.xlane.xlu0 %243  ;;  %v250_v49 = vpop.xlane.xlu1 %249 }
  0xa3   : > { %v252_v50 = vmul.f32 0.00390625, %v244_v48  ;;  %v254_v51 = vmul.f32 0.00390625, %v250_v49  ;;  %v300_v49 = vrot.slane %v291_v45, %v299_v44 }
  0xa5   : > { %v1460_v52 = vsub.f32 %v236_v3, %v252_v50  ;;  %v1464_v53 = vsub.f32 %v237_v4, %v252_v50  ;;  %v1468_v54 = vsub.f32 %v240_v5, %v254_v51  ;;  %v1472_v55 = vsub.f32 %v241_v6, %v254_v51  ;;  %v1202_v6 = vld [vmem:[%s1715_s3 + $0x124] ss:$16 sps:$4 sm:$0xff]   ;;  %v309_v51 = vld [vmem:[%s1714_s2] sm:$0x3] }
  0xa6   : > { %v247_v56 = vpop.xlane.xlu0 %246  ;;  %755 = vmatprep.subr.bf16.mxu0 %v1202_v6  ;;  %v296_v50 = vrot.slane %v291_v45, %v295_v46 }
  0xa7   : > { %v253_v57 = vmul.f32 0.00390625, %v247_v56  ;;  %v261_v58 = vmul.f32 %v1460_v52, %v1460_v52  ;;  %v262_v59 = vmul.f32 %v1464_v53, %v1464_v53  ;;  %v265_v60 = vmul.f32 %v1468_v54, %v1468_v54 }
  0xa8   : > { %v266_v61 = vmul.f32 %v1472_v55, %v1472_v55 }
  0xa9   : > { %v1484_v62 = vsub.f32 %v238_v7, %v253_v57  ;;  %v1488_v63 = vsub.f32 %v239_v8, %v253_v57  ;;  %v267_v0 = vadd.f32 %v262_v59, %v261_v58  ;;  %v1206_v7 = vld [vmem:[%s1715_s3 + $0x120] ss:$16 sps:$4 sm:$0xff]   ;;  %v1207_v8 = vld [vmem:[%s1715_s3 + $0x128] ss:$16 sps:$4 sm:$0xff]  }
  0xaa   : > { %v273_v1 = vadd.f32 %v266_v61, %v265_v60  ;;  %756 = vmatpush1.bf16.msra.mxu0 %v1206_v7  ;;  %807 = vmatpush1.bf16.msra.mxu1 %v1207_v8  ;;  %v318_v60 = vrot.slane %v309_v51, %v299_v44 }
  0xab   : > { %268 = vadd.xlane.f32.xlu1 %v267_v0  ;;  %v263_v3 = vmul.f32 %v1484_v62, %v1484_v62  ;;  %v264_v4 = vmul.f32 %v1488_v63, %v1488_v63  ;;  %757 = vmatprep.subr.bf16.mxu0 %v1208_v9 }
  0xac   : > { %808 = vmatprep.subr.bf16.mxu1 %v1210_v10 }
  0xad   : > { %v270_v5 = vadd.f32 %v264_v4, %v263_v3 }
  0xae   : > { %758 = vmatpush1.bf16.msra.mxu0 %v1212_v11  ;;  %809 = vmatpush1.bf16.msra.mxu1 %v1213_v12 }
  0xaf   : > { %274 = vadd.xlane.f32.xlu1 %v273_v1  ;;  %271 = vadd.xlane.f32.xlu0 %v270_v5  ;;  %v314_v1 = vrot.slane %v309_v51, %v295_v46 }
  0xb0   : > { %759 = vmatprep.subr.bf16.mxu0 %v1214_v13  ;;  %810 = vmatprep.subr.bf16.mxu1 %v1216_v14  ;;  %v407_v14 = vsub.s32 2, %v294_v43 }
  0xb2   : > { %760 = vmatpush1.bf16.msra.mxu0 %v1218_v15  ;;  %811 = vmatpush1.bf16.msra.mxu1 %v1219_v16  ;;  %v411_v15 = vsub.s32 3, %v294_v43 }
  0xb3   : > { %761 = vmatprep.subr.bf16.mxu0 %v1220_v17  ;;  %812 = vmatprep.subr.bf16.mxu1 %v1222_v18 }
  0xb6   : > { %762 = vmatpush1.bf16.msra.mxu0 %v1224_v19  ;;  %813 = vmatpush1.bf16.msra.mxu1 %v1225_v20 }
  0xb7   : > { %763 = vmatprep.subr.bf16.mxu0 %v1226_v21  ;;  %814 = vmatprep.subr.bf16.mxu1 %v1228_v22 }
  0xba   : > { %764 = vmatpush1.bf16.msra.mxu0 %v1230_v23  ;;  %815 = vmatpush1.bf16.msra.mxu1 %v1231_v24 }
  0xbb   : > { %765 = vmatprep.subr.bf16.mxu0 %v1232_v25  ;;  %816 = vmatprep.subr.bf16.mxu1 %v1234_v26 }
  0xbe   : > { %766 = vmatpush1.bf16.msra.mxu0 %v1236_v27  ;;  %817 = vmatpush1.bf16.msra.mxu1 %v1237_v28 }
  0xbf   : > { %767 = vmatprep.subr.bf16.mxu0 %v1238_v29  ;;  %818 = vmatprep.subr.bf16.mxu1 %v1240_v30 }
  0xc2   : > { %768 = vmatpush1.bf16.msra.mxu0 %v1242_v31  ;;  %819 = vmatpush1.bf16.msra.mxu1 %v1243_v32 }
 0x138   : > { %v269_v33 = vpop.xlane.xlu1 %268 }
 0x139   : > { %v276_v34 = vmul.f32 0.00390625, %v269_v33 }
 0x13b   : > { %v279_v35 = vadd.f32 1e-05, %v276_v34 }
 0x13c   : > { %v275_v36 = vpop.xlane.xlu1 %274  ;;  %v272_v37 = vpop.xlane.xlu0 %271 }
 0x13d   : > { %1244 = vrsqrt.f32 %v279_v35  ;;  %v278_v39 = vmul.f32 0.00390625, %v275_v36  ;;  %v277_v40 = vmul.f32 0.00390625, %v272_v37 }
 0x13f   : > { %v281_v41 = vadd.f32 1e-05, %v278_v39  ;;  %v280_v42 = vadd.f32 1e-05, %v277_v40 }
 0x141   : > { %1246 = vrsqrt.f32 %v281_v41 }
 0x142   : > { %1248 = vrsqrt.f32 %v280_v42 }
 0x147   : > { %v1245_v47 = vpop.eup %1244 }
 0x148   : > { %v286_v48 = vmul.f32 %v1245_v47, %v1464_v53  ;;  %v285_v56 = vmul.f32 %v1245_v47, %v1460_v52 }
 0x14a   : > { %v304_v59 = vmul.f32 %v300_v49, %v286_v48  ;;  %v303_v53 = vmul.f32 %v296_v50, %v285_v56 }
 0x14b   : > { %v1247_v57 = vpop.eup %1246 }
 0x14c   : > { %v1249_v58 = vpop.eup %1248  ;;  %v290_v61 = vmul.f32 %v1247_v57, %v1472_v55  ;;  %v322_v2 = vadd.f32 %v318_v60, %v304_v59  ;;  %v289_v7 = vmul.f32 %v1247_v57, %v1468_v54  ;;  %v321_v52 = vadd.f32 %v314_v1, %v303_v53  ;;  %v395_v54 = vld [vmem:[%s1716_s4] sm:$0xf] }
 0x14d   : > { %v288_v0 = vmul.f32 %v1249_v58, %v1488_v63  ;;  %v287_v3 = vmul.f32 %v1249_v58, %v1484_v62  ;;  %v1593_v16 = vrot.slane %v395_v54, %v295_v46  ;;  %v1595_v17 = vrot.slane %v395_v54, %v407_v14 }
 0x14e   : > { %v308_v4 = vmul.f32 %v300_v49, %v290_v61  ;;  %v307_v13 = vmul.f32 %v296_v50, %v289_v7  ;;  %v1597_v18 = vrot.slane %v395_v54, %v299_v44  ;;  %v1599_v19 = vrot.slane %v395_v54, %v411_v15 }
 0x14f   : > { %v306_v5 = vmul.f32 %v300_v49, %v288_v0  ;;  %v305_v6 = vmul.f32 %v296_v50, %v287_v3 }
 0x150   : > { %v326_v10 = vadd.f32 %v318_v60, %v308_v4  ;;  %v325_v62 = vadd.f32 %v314_v1, %v307_v13 }
 0x151   : > { %v324_v8 = vadd.f32 %v318_v60, %v306_v5  ;;  %v323_v9 = vadd.f32 %v314_v1, %v305_v6 }
 0x152   : > { %v330_v55 = vpack.c.bf16 %v326_v10, %v326_v10  ;;  %v329_v63 = vpack.c.bf16 %v325_v62, %v325_v62 }
 0x153   : > { %v328_v11 = vpack.c.bf16 %v324_v8, %v322_v2  ;;  %v327_v12 = vpack.c.bf16 %v323_v9, %v321_v52 }
 0x155   : > { %769 = vmatprep.mubr.bf16.mxu0 %v328_v11  ;;  %820 = vmatprep.mubr.bf16.mxu1 %v328_v11 }
 0x156   : > { %770 = vmatmul.mubr.bf16.vlgmr.msra.gmra.mrb[0].mxu0 %v327_v12  ;;  %821 = vmatmul.mubr.bf16.vlgmr.msra.gmra.mrb[0].mxu1 %v327_v12 }
 0x157   : > { %779 = vmatprep.mubr.bf16.mxu0 %v330_v55  ;;  %830 = vmatprep.mubr.bf16.mxu1 %v330_v55 }
 0x15e   : > { %780 = vmatmul.mubr.bf16.gmra.mrb[4].mxu0 %v329_v63  ;;  %831 = vmatmul.mubr.bf16.gmra.mrb[4].mxu1 %v329_v63 }
 0x229   : > { %v771_v20 = vpop.f32.mrb[0].mxu0  ;;  %v822_v21 = vpop.f32.mrb[0].mxu1 }
 0x22a   : > { %v1602_v22 = vadd.f32 %v771_v20, %v1593_v16  ;;  %v1605_v23 = vadd.f32 %v822_v21, %v1595_v17  ;;  %v773_v24 = vpop.f32.mrb[1].mxu0  ;;  %v824_v25 = vpop.f32.mrb[1].mxu1 }
 0x22b   : > { %v1608_v26 = vadd.f32 %v773_v24, %v1597_v18  ;;  %v1611_v27 = vadd.f32 %v824_v25, %v1599_v19  ;;  %v775_v28 = vpop.f32.mrb[2].mxu0  ;;  %v826_v29 = vpop.f32.mrb[2].mxu1 }
 0x22c   : > { %v839_v30 = vmul.f32 %v1602_v22, %v1602_v22  ;;  %v841_v31 = vmul.f32 %v1605_v23, %v1605_v23  ;;  %v1618_v32 = vadd.f32 %v775_v28, %v1593_v16  ;;  %v1621_v33 = vadd.f32 %v826_v29, %v1595_v17  ;;  %v777_v34 = vpop.f32.mrb[3].mxu0  ;;  %v828_v35 = vpop.f32.mrb[3].mxu1 }
 0x22d   : > { %v840_v36 = vmul.f32 %v1608_v26, %v1608_v26  ;;  %v842_v37 = vmul.f32 %v1611_v27, %v1611_v27  ;;  %v1628_v38 = vadd.f32 %v777_v34, %v1597_v18  ;;  %v1631_v39 = vadd.f32 %v828_v35, %v1599_v19 }
 0x22e   : > { %v851_v40 = vmul.f32 %v839_v30, %v1602_v22  ;;  %v853_v41 = vmul.f32 %v841_v31, %v1605_v23  ;;  %v843_v42 = vmul.f32 %v1618_v32, %v1618_v32  ;;  %v845_v43 = vmul.f32 %v1621_v33, %v1621_v33 }
 0x22f   : > { %v852_v44 = vmul.f32 %v840_v36, %v1608_v26  ;;  %v854_v45 = vmul.f32 %v842_v37, %v1611_v27  ;;  %v844_v46 = vmul.f32 %v1628_v38, %v1628_v38  ;;  %v846_v47 = vmul.f32 %v1631_v39, %v1631_v39 }
 0x230   : > { %v863_v48 = vmul.f32 0.044715, %v851_v40  ;;  %v865_v49 = vmul.f32 0.044715, %v853_v41  ;;  %v855_v50 = vmul.f32 %v843_v42, %v1618_v32  ;;  %v857_v51 = vmul.f32 %v845_v43, %v1621_v33 }
 0x231   : > { %v864_v56 = vmul.f32 0.044715, %v852_v44  ;;  %v866_v57 = vmul.f32 0.044715, %v854_v45  ;;  %v856_v58 = vmul.f32 %v844_v46, %v1628_v38  ;;  %v858_v59 = vmul.f32 %v846_v47, %v1631_v39  ;;  %v781_v60 = vpop.f32.mrb[4].mxu0  ;;  %v832_v61 = vpop.f32.mrb[4].mxu1 }
 0x232   : > { %v875_v0 = vadd.f32 %v863_v48, %v1602_v22  ;;  %v877_v1 = vadd.f32 %v865_v49, %v1605_v23  ;;  %v867_v3 = vmul.f32 0.044715, %v855_v50  ;;  %v869_v53 = vmul.f32 0.044715, %v857_v51  ;;  %v783_v4 = vpop.f32.mrb[5].mxu0  ;;  %v834_v5 = vpop.f32.mrb[5].mxu1 }
 0x233   : > { %v876_v6 = vadd.f32 %v864_v56, %v1608_v26  ;;  %v878_v2 = vadd.f32 %v866_v57, %v1611_v27  ;;  %v868_v7 = vmul.f32 0.044715, %v856_v58  ;;  %v870_v8 = vmul.f32 0.044715, %v858_v59  ;;  %v785_v52 = vpop.f32.mrb[6].mxu0  ;;  %v836_v9 = vpop.f32.mrb[6].mxu1 }
 0x234   : > { %v887_v10 = vmul.f32 0.7978846, %v875_v0  ;;  %v889_v11 = vmul.f32 0.7978846, %v877_v1  ;;  %v879_v12 = vadd.f32 %v867_v3, %v1618_v32  ;;  %v881_v13 = vadd.f32 %v869_v53, %v1621_v33  ;;  %v786_v55 = vpop.f32.mrb[7].mxu0  ;;  %v837_v62 = vpop.f32.mrb[7].mxu1 }
 0x235   : > { %v888_v63 = vmul.f32 0.7978846, %v876_v6  ;;  %v890_v14 = vmul.f32 0.7978846, %v878_v2  ;;  %v880_v54 = vadd.f32 %v868_v7, %v1628_v38  ;;  %v882_v15 = vadd.f32 %v870_v8, %v1631_v39 }
 0x236   : > { %1250 = vtanh.f32 %v887_v10  ;;  %v891_v20 = vmul.f32 0.7978846, %v879_v12  ;;  %v1658_v21 = vadd.f32 %v781_v60, %v1593_v16  ;;  %v893_v24 = vmul.f32 0.7978846, %v881_v13 }
 0x237   : > { %1252 = vtanh.f32 %v889_v11  ;;  %v892_v25 = vmul.f32 0.7978846, %v880_v54  ;;  %v1661_v28 = vadd.f32 %v832_v61, %v1595_v17  ;;  %v1666_v30 = vadd.f32 %v783_v4, %v1597_v18 }
 0x238   : > { %1254 = vtanh.f32 %v888_v63  ;;  %v847_v29 = vmul.f32 %v1658_v21, %v1658_v21  ;;  %v1669_v31 = vadd.f32 %v834_v5, %v1599_v19  ;;  %v894_v34 = vmul.f32 0.7978846, %v882_v15 }
 0x239   : > { %1256 = vtanh.f32 %v890_v14  ;;  %v849_v16 = vmul.f32 %v1661_v28, %v1661_v28  ;;  %v848_v17 = vmul.f32 %v1666_v30, %v1666_v30 }
 0x23a   : > { %1258 = vtanh.f32 %v891_v20  ;;  %v859_v35 = vmul.f32 %v847_v29, %v1658_v21  ;;  %v850_v36 = vmul.f32 %v1669_v31, %v1669_v31 }
 0x23b   : > { %1260 = vtanh.f32 %v893_v24  ;;  %v861_v18 = vmul.f32 %v849_v16, %v1661_v28  ;;  %v860_v37 = vmul.f32 %v848_v17, %v1666_v30 }
 0x23c   : > { %1262 = vtanh.f32 %v892_v25  ;;  %v871_v19 = vmul.f32 0.044715, %v859_v35  ;;  %v862_v40 = vmul.f32 %v850_v36, %v1669_v31 }
 0x23d   : > { %1264 = vtanh.f32 %v894_v34  ;;  %v873_v41 = vmul.f32 0.044715, %v861_v18  ;;  %v872_v43 = vmul.f32 0.044715, %v860_v37 }
 0x23e   : > { %v883_v42 = vadd.f32 %v871_v19, %v1658_v21  ;;  %v874_v44 = vmul.f32 0.044715, %v862_v40 }
 0x23f   : > { %v885_v45 = vadd.f32 %v873_v41, %v1661_v28  ;;  %v884_v48 = vadd.f32 %v872_v43, %v1666_v30 }
 0x240   : > { %v1251_v46 = vpop.eup %1250  ;;  %v895_v47 = vmul.f32 0.7978846, %v883_v42  ;;  %v886_v49 = vadd.f32 %v874_v44, %v1669_v31 }
 0x241   : > { %v1253_v50 = vpop.eup %1252  ;;  %v911_v51 = vadd.f32 1.0, %v1251_v46  ;;  %v897_v56 = vmul.f32 0.7978846, %v885_v45  ;;  %v896_v59 = vmul.f32 0.7978846, %v884_v48 }
 0x242   : > { %v1255_v57 = vpop.eup %1254  ;;  %v913_v58 = vadd.f32 1.0, %v1253_v50  ;;  %1266 = vtanh.f32 %v895_v47  ;;  %v898_v60 = vmul.f32 0.7978846, %v886_v49 }
 0x243   : > { %v1257_v61 = vpop.eup %1256  ;;  %v923_v0 = vmul.f32 0.5, %v911_v51  ;;  %v912_v1 = vadd.f32 1.0, %v1255_v57  ;;  %1268 = vtanh.f32 %v897_v56 }
 0x244   : > { %v1259_v3 = vpop.eup %1258  ;;  %v925_v53 = vmul.f32 0.5, %v913_v58  ;;  %v914_v4 = vadd.f32 1.0, %v1257_v61  ;;  %1270 = vtanh.f32 %v896_v59 }
 0x245   : > { %v1261_v5 = vpop.eup %1260  ;;  %v935_v6 = vmul.f32 %v923_v0, %v1602_v22  ;;  %v924_v2 = vmul.f32 0.5, %v912_v1  ;;  %v915_v7 = vadd.f32 1.0, %v1259_v3  ;;  %1272 = vtanh.f32 %v898_v60 }
 0x246   : > { %v1263_v8 = vpop.eup %1262  ;;  %v937_v52 = vmul.f32 %v925_v53, %v1605_v23  ;;  %v926_v9 = vmul.f32 0.5, %v914_v4  ;;  %v917_v10 = vadd.f32 1.0, %v1261_v5 }
 0x247   : > { %v1265_v11 = vpop.eup %1264  ;;  %v936_v12 = vmul.f32 %v924_v2, %v1608_v26  ;;  %v927_v13 = vmul.f32 0.5, %v915_v7  ;;  %v916_v55 = vadd.f32 1.0, %v1263_v8 }
 0x248   : > { %v938_v22 = vmul.f32 %v926_v9, %v1611_v27  ;;  %v929_v62 = vmul.f32 0.5, %v917_v10  ;;  %v918_v63 = vadd.f32 1.0, %v1265_v11 }
 0x249   : > { %v1134_v14 = vpack.c.bf16 %v936_v12, %v935_v6  ;;  %v939_v23 = vmul.f32 %v927_v13, %v1618_v32  ;;  %v928_v54 = vmul.f32 0.5, %v916_v55 }
 0x24a   : > { %v1135_v15 = vpack.c.bf16 %v938_v22, %v937_v52  ;;  %v941_v26 = vmul.f32 %v929_v62, %v1621_v33  ;;  %v930_v20 = vmul.f32 0.5, %v918_v63 }
 0x24b   : > { %987 = vst [vmem:[%s1692_s24] sm:$0xff] %v1134_v14  ;;  %v940_v24 = vmul.f32 %v928_v54, %v1628_v38 }
 0x24c   : > { %v1267_v25 = vpop.eup %1266  ;;  %988 = vst [vmem:[%s1692_s24 + $0x8] sm:$0xff] %v1135_v15  ;;  %v942_v29 = vmul.f32 %v930_v20, %v1631_v39 }
 0x24d   : > { %v1269_v27 = vpop.eup %1268  ;;  %v1136_v34 = vpack.c.bf16 %v940_v24, %v939_v23  ;;  %v919_v16 = vadd.f32 1.0, %v1267_v25 }
 0x24e   : > { %v1271_v35 = vpop.eup %1270  ;;  %v1137_v17 = vpack.c.bf16 %v942_v29, %v941_v26  ;;  %v921_v32 = vadd.f32 1.0, %v1269_v27 }
 0x24f   : > { %v1273_v36 = vpop.eup %1272  ;;  %989 = vst [vmem:[%s1692_s24 + $0x10] sm:$0xff] %v1136_v34  ;;  %v931_v33 = vmul.f32 0.5, %v919_v16  ;;  %v920_v18 = vadd.f32 1.0, %v1271_v35 }
 0x250   : > { %990 = vst [vmem:[%s1692_s24 + $0x18] sm:$0xff] %v1137_v17  ;;  %v933_v19 = vmul.f32 0.5, %v921_v32  ;;  %v922_v37 = vadd.f32 1.0, %v1273_v36 }
 0x251   : > { %v943_v38 = vmul.f32 %v931_v33, %v1658_v21  ;;  %v932_v40 = vmul.f32 0.5, %v920_v18 }
 0x252   : > { %v945_v39 = vmul.f32 %v933_v19, %v1661_v28  ;;  %v934_v41 = vmul.f32 0.5, %v922_v37 }
 0x253   : > { %v944_v42 = vmul.f32 %v932_v40, %v1666_v30 }
 0x254   : > { %v946_v43 = vmul.f32 %v934_v41, %v1669_v31 }
 0x255   : > { %v1138_v44 = vpack.c.bf16 %v944_v42, %v943_v38 }
 0x256   : > { %v1139_v45 = vpack.c.bf16 %v946_v43, %v945_v39 }
 0x257   : > { %991 = vst [vmem:[%s1692_s24 + $0x20] sm:$0xff] %v1138_v44 }
 0x258   : > { %992 = vst [vmem:[%s1692_s24 + $0x28] sm:$0xff] %v1139_v45 }
 0x259 PF: > { %s15_s18 = sadd.s32 1, %s1280_s18  }
 0x25a   : > { %p12_p4 = scmp.ge.s32.totalorder %s15_s18, 4  }
 0x25c   :  { %14 = sbr.rel (!%p12_p4) target bundleno = 1 (0x1), region = 70 }

// kernel: _lvsm_head_compute.19
= control target key start
LH: loop header
LB: loop body
LE: loop exit
PB: predicated region body
PF: predicated region fallthrough
CT: control target
= control target key end

     0   :  { %s1126_s15 = smov 0   ;;  %s1359_s0 = inlined_call_operand.vmem [shape: bf16[48,512], index: 0, kind: input, shape index: {}]   ;;  %s1360_s1 = inlined_call_operand.vmem [shape: bf16[512,256], index: 1, kind: input, shape index: {}]   ;;  %s1361_s2 = inlined_call_operand.vmem [shape: f32[1,256], index: 2, kind: input, shape index: {}]   ;;  %s1362_s3 = inlined_call_operand.vmem [shape: bf16[48,256], index: 3, kind: input, shape index: {}]   ;;  %s1363_s4 = inlined_call_operand.vmem [shape: bf16[48,256], index: 4, kind: output, shape index: {}]  }
   0x1 LB: > { %s877_s16 = sadd.s32 4294967295, %s1099_s15   ;;  %p881_p0 = scmp.ge.s32.totalorder %s1099_s15, 1  ;;  %s1099_s15 = sphi %s1126_s15, %s14_s15  }
   0x2   : > { %p176_p1 = scmp.lt.s32.totalorder %s1099_s15, 3 }
   0x4   : > { %p177_p2 = pnand %p881_p0, %p176_p1 }
   0x5   : > { %v987_v0 = vld [vmem:[%s1360_s1 + $0x4] ss:$8 sps:$4 sm:$0xff] (!%p177_p2)   ;;  %v991_v2 = vld [vmem:[%s1360_s1] ss:$8 sps:$4 sm:$0xff] (!%p177_p2)   ;;  %v993_v4 = vld [vmem:[%s1360_s1 + $0x14] ss:$8 sps:$4 sm:$0xff] (!%p177_p2)  }
   0x6   : > { %180 = sbr.rel (%p177_p2) target bundleno = 300 (0x12c), region = 36  ;;  %v989_v1 = vld [vmem:[%s1360_s1 + $0x104] ss:$8 sps:$4 sm:$0xff] (!%p177_p2)   ;;  %667 = vmatprep.subr.bf16.mxu1 (!%p177_p2), %v987_v0  ;;  %v992_v3 = vld [vmem:[%s1360_s1 + $0x100] ss:$8 sps:$4 sm:$0xff] (!%p177_p2)  }
   0x7   : > { %718 = vmatprep.subr.bf16.mxu0 (!%p177_p2), %v989_v1  ;;  %668 = vmatpush1.bf16.msra.mxu1 (!%p177_p2), %v991_v2  ;;  %v995_v5 = vld [vmem:[%s1360_s1 + $0x114] ss:$8 sps:$4 sm:$0xff] (!%p177_p2)   ;;  %v997_v6 = vld [vmem:[%s1360_s1 + $0x10] ss:$8 sps:$4 sm:$0xff] (!%p177_p2)   ;;  %v999_v8 = vld [vmem:[%s1360_s1 + $0x24] ss:$8 sps:$4 sm:$0xff] (!%p177_p2)  }
   0x8   : > { %719 = vmatpush1.bf16.msra.mxu0 (!%p177_p2), %v992_v3  ;;  %669 = vmatprep.subr.bf16.mxu1 (!%p177_p2), %v993_v4  ;;  %v998_v7 = vld [vmem:[%s1360_s1 + $0x110] ss:$8 sps:$4 sm:$0xff] (!%p177_p2)   ;;  %v1001_v9 = vld [vmem:[%s1360_s1 + $0x124] ss:$8 sps:$4 sm:$0xff] (!%p177_p2)   ;;  %v1003_v10 = vld [vmem:[%s1360_s1 + $0x20] ss:$8 sps:$4 sm:$0xff] (!%p177_p2)  }
   0x9   : > { %720 = vmatprep.subr.bf16.mxu0 (!%p177_p2), %v995_v5  ;;  %v1004_v11 = vld [vmem:[%s1360_s1 + $0x120] ss:$8 sps:$4 sm:$0xff] (!%p177_p2)   ;;  %v1005_v12 = vld [vmem:[%s1360_s1 + $0x34] ss:$8 sps:$4 sm:$0xff] (!%p177_p2)   ;;  %v1009_v14 = vld [vmem:[%s1360_s1 + $0x30] ss:$8 sps:$4 sm:$0xff] (!%p177_p2)  }
   0xa   : > { %v1007_v13 = vld [vmem:[%s1360_s1 + $0x134] ss:$8 sps:$4 sm:$0xff] (!%p177_p2)   ;;  %v1010_v15 = vld [vmem:[%s1360_s1 + $0x130] ss:$8 sps:$4 sm:$0xff] (!%p177_p2)   ;;  %v1011_v16 = vld [vmem:[%s1360_s1 + $0x44] ss:$8 sps:$4 sm:$0xff] (!%p177_p2)  }
   0xb   : > { %670 = vmatpush1.bf16.msra.mxu1 (!%p177_p2), %v997_v6  ;;  %v1013_v17 = vld [vmem:[%s1360_s1 + $0x144] ss:$8 sps:$4 sm:$0xff] (!%p177_p2)   ;;  %v1015_v18 = vld [vmem:[%s1360_s1 + $0x40] ss:$8 sps:$4 sm:$0xff] (!%p177_p2)   ;;  %v1017_v20 = vld [vmem:[%s1360_s1 + $0x54] ss:$8 sps:$4 sm:$0xff] (!%p177_p2)  }
   0xc   : > { %721 = vmatpush1.bf16.msra.mxu0 (!%p177_p2), %v998_v7  ;;  %671 = vmatprep.subr.bf16.mxu1 (!%p177_p2), %v999_v8  ;;  %v1016_v19 = vld [vmem:[%s1360_s1 + $0x140] ss:$8 sps:$4 sm:$0xff] (!%p177_p2)   ;;  %v1019_v21 = vld [vmem:[%s1360_s1 + $0x154] ss:$8 sps:$4 sm:$0xff] (!%p177_p2)   ;;  %v1021_v22 = vld [vmem:[%s1360_s1 + $0x50] ss:$8 sps:$4 sm:$0xff] (!%p177_p2)  }
   0xd   : > { %722 = vmatprep.subr.bf16.mxu0 %v1001_v9  ;;  %v1022_v23 = vld [vmem:[%s1360_s1 + $0x150] ss:$8 sps:$4 sm:$0xff]   ;;  %v1023_v24 = vld [vmem:[%s1360_s1 + $0x64] ss:$8 sps:$4 sm:$0xff]   ;;  %v1027_v26 = vld [vmem:[%s1360_s1 + $0x60] ss:$8 sps:$4 sm:$0xff]  }
   0xe   : > { %v1025_v25 = vld [vmem:[%s1360_s1 + $0x164] ss:$8 sps:$4 sm:$0xff]   ;;  %v1028_v27 = vld [vmem:[%s1360_s1 + $0x160] ss:$8 sps:$4 sm:$0xff]   ;;  %v1029_v28 = vld [vmem:[%s1360_s1 + $0x74] ss:$8 sps:$4 sm:$0xff]  }
   0xf   : > { %672 = vmatpush1.bf16.msra.mxu1 %v1003_v10  ;;  %v1031_v29 = vld [vmem:[%s1360_s1 + $0x174] ss:$8 sps:$4 sm:$0xff]   ;;  %s210_s29 = smul.u32 3, %s877_s16  ;;  %v1033_v30 = vld [vmem:[%s1360_s1 + $0x70] ss:$8 sps:$4 sm:$0xff]   ;;  %v303_v10 = vlaneseq }
  0x10   : > { %723 = vmatpush1.bf16.msra.mxu0 %v1004_v11  ;;  %673 = vmatprep.subr.bf16.mxu1 %v1005_v12  ;;  %v1034_v31 = vld [vmem:[%s1360_s1 + $0x170] ss:$8 sps:$4 sm:$0xff]   ;;  %v1035_v32 = vld [vmem:[%s1360_s1 + $0x84] ss:$8 sps:$4 sm:$0xff]   ;;  %v1039_v34 = vld [vmem:[%s1360_s1 + $0x80] ss:$8 sps:$4 sm:$0xff]  }
  0x11   : > { %724 = vmatprep.subr.bf16.mxu0 %v1007_v13  ;;  %v1037_v33 = vld [vmem:[%s1360_s1 + $0x184] ss:$8 sps:$4 sm:$0xff]   ;;  %p211_p3 = scmp.lt.s32.totalorder %s210_s29, 5  ;;  %v1040_v35 = vld [vmem:[%s1360_s1 + $0x180] ss:$8 sps:$4 sm:$0xff]   ;;  %v304_v11 = vshrl.u32 %v303_v10, 7 }
  0x12   : > { %v1041_v36 = vld [vmem:[%s1360_s1 + $0x94] ss:$8 sps:$4 sm:$0xff]   ;;  %v1045_v38 = vld [vmem:[%s1360_s1 + $0x90] ss:$8 sps:$4 sm:$0xff]   ;;  %v1047_v40 = vld [vmem:[%s1360_s1 + $0xa4] ss:$8 sps:$4 sm:$0xff]  }
  0x13   : > { %674 = vmatpush1.bf16.msra.mxu1 %v1009_v14  ;;  %v1043_v37 = vld [vmem:[%s1360_s1 + $0x194] ss:$8 sps:$4 sm:$0xff]   ;;  %s1365_s29 = smov (!%p211_p3, %s210_s29), 5  ;;  %v1046_v39 = vld [vmem:[%s1360_s1 + $0x190] ss:$8 sps:$4 sm:$0xff]   ;;  %v305_v12 = vsub.s32 0, %v304_v11 }
  0x14   : > { %725 = vmatpush1.bf16.msra.mxu0 %v1010_v15  ;;  %675 = vmatprep.subr.bf16.mxu1 %v1011_v16  ;;  %v1049_v41 = vld [vmem:[%s1360_s1 + $0x1a4] ss:$8 sps:$4 sm:$0xff]   ;;  %s965_s30 = sshll.u32 %s1365_s29, 4  ;;  %v1051_v42 = vld [vmem:[%s1360_s1 + $0xa0] ss:$8 sps:$4 sm:$0xff]   ;;  %s966_s5 = sshll.u32 %s1365_s29, 3 }
  0x15   : > { %726 = vmatprep.subr.bf16.mxu0 %v1013_v17  ;;  %v1052_v43 = vld [vmem:[%s1360_s1 + $0x1a0] ss:$8 sps:$4 sm:$0xff]   ;;  %v1053_v44 = vld [vmem:[%s1360_s1 + $0xb4] ss:$8 sps:$4 sm:$0xff]   ;;  %s1277_s12 = scalar_lea.vmem %s1359_s0, %s965_s30  ;;  %v1057_v46 = vld [vmem:[%s1360_s1 + $0xb0] ss:$8 sps:$4 sm:$0xff]   ;;  %s222_s9 = scalar_lea.vmem %s1362_s3, %s966_s5 }
  0x16   : > { %v1055_v45 = vld [vmem:[%s1360_s1 + $0x1b4] ss:$8 sps:$4 sm:$0xff]   ;;  %v1058_v48 = vld [vmem:[%s1360_s1 + $0x1b0] ss:$8 sps:$4 sm:$0xff]   ;;  %v1059_v49 = vld [vmem:[%s1360_s1 + $0xc4] ss:$8 sps:$4 sm:$0xff]   ;;  %s229_s16 = scalar_lea.vmem %s1363_s4, %s966_s5 }
  0x17   : > { %676 = vmatpush1.bf16.msra.mxu1 %v1015_v18  ;;  %v1085_v47 = vld [vmem:[%s1277_s12 + $0x4] ss:$16 sps:$4 sm:$0xff]   ;;  %v1088_v51 = vld [vmem:[%s1277_s12 + $0xc] ss:$16 sps:$4 sm:$0xff]   ;;  %v1063_v52 = vld [vmem:[%s1360_s1 + $0xc0] ss:$8 sps:$4 sm:$0xff]  }
  0x18   : > { %727 = vmatpush1.bf16.msra.mxu0 %v1016_v19  ;;  %677 = vmatprep.subr.bf16.mxu1 %v1017_v20  ;;  %v1061_v50 = vld [vmem:[%s1360_s1 + $0x1c4] ss:$8 sps:$4 sm:$0xff]   ;;  %v1064_v53 = vld [vmem:[%s1360_s1 + $0x1c0] ss:$8 sps:$4 sm:$0xff]   ;;  %v1065_v54 = vld [vmem:[%s1360_s1 + $0xd4] ss:$8 sps:$4 sm:$0xff]  }
  0x19   : > { %728 = vmatprep.subr.bf16.mxu0 %v1019_v21  ;;  %699 = vmatprep.mubr.bf16.mxu1 %v1085_v47  ;;  %v1067_v55 = vld [vmem:[%s1360_s1 + $0x1d4] ss:$8 sps:$4 sm:$0xff]   ;;  %v1069_v56 = vld [vmem:[%s1360_s1 + $0xd0] ss:$8 sps:$4 sm:$0xff]   ;;  %v1071_v58 = vld [vmem:[%s1360_s1 + $0xe4] ss:$8 sps:$4 sm:$0xff]  }
  0x1a   : > { %750 = vmatprep.mubr.bf16.mxu0 %v1088_v51  ;;  %v1070_v57 = vld [vmem:[%s1360_s1 + $0x1d0] ss:$8 sps:$4 sm:$0xff]   ;;  %v1073_v59 = vld [vmem:[%s1360_s1 + $0x1e4] ss:$8 sps:$4 sm:$0xff]   ;;  %v1075_v60 = vld [vmem:[%s1360_s1 + $0xe0] ss:$8 sps:$4 sm:$0xff]  }
  0x1b   : > { %678 = vmatpush1.bf16.msra.mxu1 %v1021_v22  ;;  %v1076_v61 = vld [vmem:[%s1360_s1 + $0x1e0] ss:$8 sps:$4 sm:$0xff]   ;;  %v1077_v62 = vld [vmem:[%s1360_s1 + $0xf4] ss:$8 sps:$4 sm:$0xff]   ;;  %v1081_v0 = vld [vmem:[%s1360_s1 + $0xf0] ss:$8 sps:$4 sm:$0xff]  }
  0x1c   : > { %729 = vmatpush1.bf16.msra.mxu0 %v1022_v23  ;;  %679 = vmatprep.subr.bf16.mxu1 %v1023_v24  ;;  %v1079_v63 = vld [vmem:[%s1360_s1 + $0x1f4] ss:$8 sps:$4 sm:$0xff]   ;;  %v1082_v1 = vld [vmem:[%s1360_s1 + $0x1f0] ss:$8 sps:$4 sm:$0xff]   ;;  %v235_v2 = vld [vmem:[%s1277_s12 + $0x20] sm:$0xff]  ;;  %v309_v14 = vsub.s32 1, %v304_v11 }
  0x1d   : > { %730 = vmatprep.subr.bf16.mxu0 %v1025_v25  ;;  %v236_v3 = vld [vmem:[%s1277_s12 + $0x28] sm:$0xff]  ;;  %v1083_v4 = vld [vmem:[%s1277_s12] ss:$16 sps:$4 sm:$0xff]   ;;  %v893_v6 = vcombine.high %v235_v2, %v235_v2  ;;  %v892_v8 = vcombine.low %v235_v2, %v235_v2 }
  0x1e   : > { %v1086_v5 = vld [vmem:[%s1277_s12 + $0x8] ss:$16 sps:$4 sm:$0xff]   ;;  %v895_v7 = vcombine.high %v236_v3, %v236_v3  ;;  %v894_v9 = vcombine.low %v236_v3, %v236_v3  ;;  %v301_v13 = vld [vmem:[%s1361_s2] sm:$0x3] }
  0x1f   : > { %680 = vmatpush1.bf16.msra.mxu1 %v1027_v26  ;;  %v306_v15 = vrot.slane %v301_v13, %v305_v12  ;;  %v769_v16 = vld [vmem:[%s222_s9] sm:$0xff]  ;;  %v310_v17 = vrot.slane %v301_v13, %v309_v14  ;;  %v770_v20 = vld [vmem:[%s222_s9 + $0x8] sm:$0xff] }
  0x20   : > { %731 = vmatpush1.bf16.msra.mxu0 %v1028_v27  ;;  %681 = vmatprep.subr.bf16.mxu1 %v1029_v28  ;;  %v772_v22 = vunpack.c.l.bf16 %v769_v16  ;;  %v773_v26 = vunpack.c.h.bf16 %v769_v16 }
  0x21   : > { %732 = vmatprep.subr.bf16.mxu0 %v1031_v29 }
  0x23   : > { %682 = vmatpush1.bf16.msra.mxu1 %v1033_v30 }
  0x24   : > { %733 = vmatpush1.bf16.msra.mxu0 %v1034_v31  ;;  %683 = vmatprep.subr.bf16.mxu1 %v1035_v32  ;;  %v774_v31 = vunpack.c.l.bf16 %v770_v20 }
  0x25   : > { %734 = vmatprep.subr.bf16.mxu0 %v1037_v33 }
  0x27   : > { %684 = vmatpush1.bf16.msra.mxu1 %v1039_v34 }
  0x28   : > { %735 = vmatpush1.bf16.msra.mxu0 %v1040_v35  ;;  %685 = vmatprep.subr.bf16.mxu1 %v1041_v36  ;;  %v775_v36 = vunpack.c.h.bf16 %v770_v20 }
  0x29   : > { %736 = vmatprep.subr.bf16.mxu0 %v1043_v37 }
  0x2b   : > { %686 = vmatpush1.bf16.msra.mxu1 %v1045_v38 }
  0x2c   : > { %737 = vmatpush1.bf16.msra.mxu0 %v1046_v39  ;;  %687 = vmatprep.subr.bf16.mxu1 %v1047_v40 }
  0x2d   : > { %738 = vmatprep.subr.bf16.mxu0 %v1049_v41  ;;  %v771_v41 = vld [vmem:[%s222_s9 + $0x10] sm:$0xff] }
  0x2f   : > { %688 = vmatpush1.bf16.msra.mxu1 %v1051_v42 }
  0x30   : > { %739 = vmatpush1.bf16.msra.mxu0 %v1052_v43  ;;  %689 = vmatprep.subr.bf16.mxu1 %v1053_v44 }
  0x31   : > { %740 = vmatprep.subr.bf16.mxu0 %v1055_v45 }
  0x33   : > { %690 = vmatpush1.bf16.msra.mxu1 %v1057_v46 }
  0x34   : > { %741 = vmatpush1.bf16.msra.mxu0 %v1058_v48  ;;  %691 = vmatprep.subr.bf16.mxu1 %v1059_v49  ;;  %v776_v48 = vunpack.c.l.bf16 %v771_v41 }
  0x35   : > { %742 = vmatprep.subr.bf16.mxu0 %v1061_v50 }
  0x37   : > { %692 = vmatpush1.bf16.msra.mxu1 %v1063_v52 }
  0x38   : > { %743 = vmatpush1.bf16.msra.mxu0 %v1064_v53  ;;  %693 = vmatprep.subr.bf16.mxu1 %v1065_v54  ;;  %v777_v53 = vunpack.c.h.bf16 %v771_v41 }
  0x39   : > { %744 = vmatprep.subr.bf16.mxu0 %v1067_v55 }
  0x3b   : > { %694 = vmatpush1.bf16.msra.mxu1 %v1069_v56 }
  0x3c   : > { %745 = vmatpush1.bf16.msra.mxu0 %v1070_v57  ;;  %695 = vmatprep.subr.bf16.mxu1 %v1071_v58 }
  0x3d   : > { %746 = vmatprep.subr.bf16.mxu0 %v1073_v59 }
  0x3f   : > { %696 = vmatpush1.bf16.msra.mxu1 %v1075_v60 }
  0x40   : > { %747 = vmatpush1.bf16.msra.mxu0 %v1076_v61  ;;  %697 = vmatprep.subr.bf16.mxu1 %v1077_v62 }
  0x41   : > { %748 = vmatprep.subr.bf16.mxu0 %v1079_v63 }
  0x43   : > { %698 = vmatpush1.bf16.msra.mxu1 %v1081_v0 }
  0x44   : > { %749 = vmatpush1.bf16.msra.mxu0 %v1082_v1 }
  0x46   : > { %700 = vmatmul.mubr.bf16.vlgmr.msra.gmra.mrb[0].mxu1 %v1083_v4 }
  0x47   : > { %751 = vmatmul.mubr.bf16.vlgmr.msra.gmra.mrb[0].mxu0 %v1086_v5  ;;  %709 = vmatprep.mubr.bf16.mxu1 %v893_v6 }
  0x48   : > { %760 = vmatprep.mubr.bf16.mxu0 %v895_v7 }
  0x4e   : > { %710 = vmatmul.mubr.bf16.gmra.mrb[4].mxu1 %v892_v8 }
  0x4f   : > { %761 = vmatmul.mubr.bf16.gmra.mrb[4].mxu0 %v894_v9 }
 0x119   : > { %v701_v18 = vpop.f32.mrb[0].mxu1 }
 0x11a   : > { %v752_v19 = vpop.f32.mrb[0].mxu0  ;;  %v702_v21 = vadd.f32 %v701_v18, %v306_v15  ;;  %v703_v23 = vpop.f32.mrb[1].mxu1 }
 0x11b   : > { %v754_v24 = vpop.f32.mrb[1].mxu0  ;;  %v704_v25 = vadd.f32 %v703_v23, %v310_v17  ;;  %v705_v27 = vpop.f32.mrb[2].mxu1 }
 0x11c   : > { %v756_v28 = vpop.f32.mrb[2].mxu0  ;;  %v753_v29 = vadd.f32 %v752_v19, %v702_v21  ;;  %v706_v30 = vadd.f32 %v705_v27, %v306_v15  ;;  %v707_v32 = vpop.f32.mrb[3].mxu1 }
 0x11d   : > { %v758_v33 = vpop.f32.mrb[3].mxu0  ;;  %v755_v34 = vadd.f32 %v754_v24, %v704_v25  ;;  %v708_v35 = vadd.f32 %v707_v32, %v310_v17 }
 0x11e   : > { %v778_v37 = vadd.f32 %v772_v22, %v753_v29  ;;  %v757_v38 = vadd.f32 %v756_v28, %v706_v30 }
 0x11f   : > { %v779_v39 = vadd.f32 %v773_v26, %v755_v34  ;;  %v759_v40 = vadd.f32 %v758_v33, %v708_v35 }
 0x120   : > { %v780_v42 = vadd.f32 %v774_v31, %v757_v38 }
 0x121   : > { %v968_v43 = vpack.c.bf16 %v779_v39, %v778_v37  ;;  %v781_v44 = vadd.f32 %v775_v36, %v759_v40  ;;  %v711_v45 = vpop.f32.mrb[4].mxu1 }
 0x122   : > { %v762_v46 = vpop.f32.mrb[4].mxu0  ;;  %v712_v47 = vadd.f32 %v711_v45, %v306_v15  ;;  %v713_v49 = vpop.f32.mrb[5].mxu1 }
 0x123   : > { %v764_v50 = vpop.f32.mrb[5].mxu0  ;;  %804 = vst [vmem:[%s229_s16] sm:$0xff] %v968_v43  ;;  %v969_v51 = vpack.c.bf16 %v781_v44, %v780_v42  ;;  %v714_v52 = vadd.f32 %v713_v49, %v310_v17  ;;  %v715_v54 = vpop.f32.mrb[6].mxu1 }
 0x124   : > { %v766_v55 = vpop.f32.mrb[6].mxu0  ;;  %v763_v56 = vadd.f32 %v762_v46, %v712_v47  ;;  %v716_v57 = vpop.f32.mrb[7].mxu1 }
 0x125   : > { %v767_v58 = vpop.f32.mrb[7].mxu0  ;;  %805 = vst [vmem:[%s229_s16 + $0x8] sm:$0xff] %v969_v51  ;;  %v765_v59 = vadd.f32 %v764_v50, %v714_v52 }
 0x126   : > { %v782_v60 = vadd.f32 %v776_v48, %v763_v56 }
 0x127   : > { %v783_v61 = vadd.f32 %v777_v53, %v765_v59 }
 0x129   : > { %v970_v62 = vpack.c.bf16 %v783_v61, %v782_v60 }
 0x12b   : > { %806 = vst [vmem:[%s229_s16 + $0x10] sm:$0xff] %v970_v62 }
 0x12c PF: > { %s14_s15 = sadd.s32 1, %s1099_s15  }
 0x12d   : > { %p11_p4 = scmp.ge.s32.totalorder %s14_s15, 4  }
 0x12f   :  { %13 = sbr.rel (!%p11_p4) target bundleno = 1 (0x1), region = 69 }

// kernel: _lvsm_head_compute.25
= control target key start
LH: loop header
LB: loop body
LE: loop exit
PB: predicated region body
PF: predicated region fallthrough
CT: control target
= control target key end

     0   :  { %s747_s18 = smov 0   ;;  %s873_s0 = inlined_call_operand.vmem [shape: bf16[16,256], index: 0, kind: input, shape index: {}]   ;;  %s874_s1 = inlined_call_operand.vmem [shape: f32[1,256], index: 1, kind: input, shape index: {}]   ;;  %s875_s2 = inlined_call_operand.vmem [shape: f32[1,256], index: 2, kind: input, shape index: {}]   ;;  %s876_s3 = inlined_call_operand.vmem [shape: bf16[256,256], index: 3, kind: input, shape index: {}]   ;;  %s877_s4 = inlined_call_operand.vmem [shape: f32[1,256], index: 4, kind: input, shape index: {}]   ;;  %s878_s5 = inlined_call_operand.vmem [shape: f32[16,256], index: 5, kind: output, shape index: {}]  }
   0x1 LB: > { %s596_s19 = sadd.s32 4294967295, %s715_s18   ;;  %p600_p0 = scmp.ge.s32.totalorder %s715_s18, 1  ;;  %s715_s18 = sphi %s747_s18, %s15_s18  }
   0x2   : > { %p187_p1 = scmp.lt.s32.totalorder %s715_s18, 3 }
   0x4   : > { %p188_p2 = pnand %p600_p0, %p187_p1 }
   0x5   : > { %p215_p3 = scmp.lt.s32.totalorder (!%p188_p2), %s596_s19, 1  ;;  %v651_v4 = vld [vmem:[%s876_s3 + $0x4] ss:$8 sps:$4 sm:$0xff] (!%p188_p2)   ;;  %v653_v5 = vld [vmem:[%s876_s3] ss:$8 sps:$4 sm:$0xff] (!%p188_p2)   ;;  %v247_v45 = vlaneseq (!%p188_p2) }
   0x6   : > { %191 = sbr.rel (%p188_p2) target bundleno = 580 (0x244), region = 40  ;;  %v654_v6 = vld [vmem:[%s876_s3 + $0x14] ss:$8 sps:$4 sm:$0xff] (!%p188_p2)   ;;  %479 = vmatprep.subr.bf16.mxu0 (!%p188_p2), %v651_v4  ;;  %v656_v7 = vld [vmem:[%s876_s3 + $0x10] ss:$8 sps:$4 sm:$0xff] (!%p188_p2)  }
   0x7   : > { %480 = vmatpush1.bf16.msra.mxu0 (!%p188_p2), %v653_v5  ;;  %v657_v8 = vld [vmem:[%s876_s3 + $0x24] ss:$8 sps:$4 sm:$0xff] (!%p188_p2)   ;;  %v659_v9 = vld [vmem:[%s876_s3 + $0x20] ss:$8 sps:$4 sm:$0xff] (!%p188_p2)   ;;  %v660_v10 = vld [vmem:[%s876_s3 + $0x34] ss:$8 sps:$4 sm:$0xff] (!%p188_p2)  }
   0x8   : > { %481 = vmatprep.subr.bf16.mxu0 (!%p188_p2), %v654_v6  ;;  %v662_v11 = vld [vmem:[%s876_s3 + $0x30] ss:$8 sps:$4 sm:$0xff] (!%p188_p2)   ;;  %v663_v12 = vld [vmem:[%s876_s3 + $0x44] ss:$8 sps:$4 sm:$0xff] (!%p188_p2)   ;;  %v665_v13 = vld [vmem:[%s876_s3 + $0x40] ss:$8 sps:$4 sm:$0xff] (!%p188_p2)  }
   0x9   : > { %v666_v14 = vld [vmem:[%s876_s3 + $0x54] ss:$8 sps:$4 sm:$0xff] (!%p188_p2)   ;;  %v668_v15 = vld [vmem:[%s876_s3 + $0x50] ss:$8 sps:$4 sm:$0xff] (!%p188_p2)   ;;  %v669_v16 = vld [vmem:[%s876_s3 + $0x64] ss:$8 sps:$4 sm:$0xff] (!%p188_p2)  }
   0xa   : > { %v671_v17 = vld [vmem:[%s876_s3 + $0x60] ss:$8 sps:$4 sm:$0xff] (!%p188_p2)   ;;  %v672_v18 = vld [vmem:[%s876_s3 + $0x74] ss:$8 sps:$4 sm:$0xff] (!%p188_p2)   ;;  %v674_v19 = vld [vmem:[%s876_s3 + $0x70] ss:$8 sps:$4 sm:$0xff] (!%p188_p2)  }
   0xb   : > { %482 = vmatpush1.bf16.msra.mxu0 (!%p188_p2), %v656_v7  ;;  %v675_v20 = vld [vmem:[%s876_s3 + $0x84] ss:$8 sps:$4 sm:$0xff] (!%p188_p2)   ;;  %v677_v21 = vld [vmem:[%s876_s3 + $0x80] ss:$8 sps:$4 sm:$0xff] (!%p188_p2)   ;;  %v678_v22 = vld [vmem:[%s876_s3 + $0x94] ss:$8 sps:$4 sm:$0xff] (!%p188_p2)  }
   0xc   : > { %483 = vmatprep.subr.bf16.mxu0 (!%p188_p2), %v657_v8  ;;  %v680_v23 = vld [vmem:[%s876_s3 + $0x90] ss:$8 sps:$4 sm:$0xff] (!%p188_p2)   ;;  %v681_v31 = vld [vmem:[%s876_s3 + $0xa4] ss:$8 sps:$4 sm:$0xff] (!%p188_p2)   ;;  %v683_v32 = vld [vmem:[%s876_s3 + $0xa0] ss:$8 sps:$4 sm:$0xff] (!%p188_p2)  }
   0xd   : > { %s880_s19 = smov (!%p215_p3, %s596_s19), 1  ;;  %v684_v33 = vld [vmem:[%s876_s3 + $0xb4] ss:$8 sps:$4 sm:$0xff]   ;;  %v686_v34 = vld [vmem:[%s876_s3 + $0xb0] ss:$8 sps:$4 sm:$0xff]   ;;  %v248_v47 = vshrl.u32 %v247_v45, 7 }
   0xe   : > { %s641_s20 = sshll.u32 %s880_s19, 3  ;;  %v687_v35 = vld [vmem:[%s876_s3 + $0xc4] ss:$8 sps:$4 sm:$0xff]   ;;  %v689_v36 = vld [vmem:[%s876_s3 + $0xc0] ss:$8 sps:$4 sm:$0xff]   ;;  %s642_s25 = sshll.u32 %s880_s19, 4 }
   0xf   : > { %s219_s23 = scalar_lea.vmem %s873_s0, %s641_s20  ;;  %484 = vmatpush1.bf16.msra.mxu0 %v659_v9  ;;  %v690_v37 = vld [vmem:[%s876_s3 + $0xd4] ss:$8 sps:$4 sm:$0xff]   ;;  %v692_v38 = vld [vmem:[%s876_s3 + $0xd0] ss:$8 sps:$4 sm:$0xff]   ;;  %v693_v39 = vld [vmem:[%s876_s3 + $0xe4] ss:$8 sps:$4 sm:$0xff]   ;;  %s224_s28 = scalar_lea.vmem %s878_s5, %s642_s25 }
  0x10   : > { %v225_v0 = vld [vmem:[%s219_s23] sm:$0xff]  ;;  %485 = vmatprep.subr.bf16.mxu0 %v660_v10  ;;  %v696_v41 = vld [vmem:[%s876_s3 + $0xf4] ss:$8 sps:$4 sm:$0xff]   ;;  %v698_v42 = vld [vmem:[%s876_s3 + $0xf0] ss:$8 sps:$4 sm:$0xff]   ;;  %v249_v48 = vsub.s32 0, %v248_v47 }
  0x11   : > { %v226_v1 = vunpack.c.l.bf16 %v225_v0  ;;  %v227_v2 = vunpack.c.h.bf16 %v225_v0  ;;  %v695_v40 = vld [vmem:[%s876_s3 + $0xe0] ss:$8 sps:$4 sm:$0xff]   ;;  %v253_v49 = vsub.s32 1, %v248_v47 }
  0x12   : > { %v245_v50 = vld [vmem:[%s874_s1] sm:$0x3] }
  0x13   : > { %v228_v3 = vadd.f32 %v227_v2, %v226_v1  ;;  %486 = vmatpush1.bf16.msra.mxu0 %v662_v11  ;;  %v259_v51 = vld [vmem:[%s875_s2] sm:$0x3]  ;;  %v250_v52 = vrot.slane %v245_v50, %v249_v48  ;;  %v254_v53 = vrot.slane %v245_v50, %v253_v49 }
  0x14   : > { %487 = vmatprep.subr.bf16.mxu0 %v663_v12  ;;  %v264_v56 = vrot.slane %v259_v51, %v249_v48  ;;  %v268_v57 = vrot.slane %v259_v51, %v253_v49 }
  0x15   : > { %229 = vadd.xlane.f32.xlu0 %v228_v3 }
  0x17   : > { %488 = vmatpush1.bf16.msra.mxu0 %v665_v13 }
  0x18   : > { %489 = vmatprep.subr.bf16.mxu0 %v666_v14 }
  0x1b   : > { %490 = vmatpush1.bf16.msra.mxu0 %v668_v15 }
  0x1c   : > { %491 = vmatprep.subr.bf16.mxu0 %v669_v16  ;;  %v521_v16 = vand.u32 127, %v247_v45 }
  0x1f   : > { %492 = vmatpush1.bf16.msra.mxu0 %v671_v17  ;;  %v522_v17 = vadd.s32 128, %v521_v16 }
  0x20   : > { %493 = vmatprep.subr.bf16.mxu0 %v672_v18 }
  0x21   : > { %vm524_vm0 = vcmp.lt.s32.totalorder %v522_v17, 192 }
  0x23   : > { %494 = vmatpush1.bf16.msra.mxu0 %v674_v19 }
  0x24   : > { %495 = vmatprep.subr.bf16.mxu0 %v675_v20 }
  0x27   : > { %496 = vmatpush1.bf16.msra.mxu0 %v677_v21 }
  0x28   : > { %497 = vmatprep.subr.bf16.mxu0 %v678_v22 }
  0x2b   : > { %498 = vmatpush1.bf16.msra.mxu0 %v680_v23 }
  0x2c   : > { %499 = vmatprep.subr.bf16.mxu0 %v681_v31 }
  0x2f   : > { %500 = vmatpush1.bf16.msra.mxu0 %v683_v32 }
  0x30   : > { %501 = vmatprep.subr.bf16.mxu0 %v684_v33 }
  0x33   : > { %502 = vmatpush1.bf16.msra.mxu0 %v686_v34 }
  0x34   : > { %503 = vmatprep.subr.bf16.mxu0 %v687_v35 }
  0x37   : > { %504 = vmatpush1.bf16.msra.mxu0 %v689_v36 }
  0x38   : > { %505 = vmatprep.subr.bf16.mxu0 %v690_v37 }
  0x3b   : > { %506 = vmatpush1.bf16.msra.mxu0 %v692_v38 }
  0x3c   : > { %507 = vmatprep.subr.bf16.mxu0 %v693_v39 }
  0x3f   : > { %508 = vmatpush1.bf16.msra.mxu0 %v695_v40 }
  0x40   : > { %509 = vmatprep.subr.bf16.mxu0 %v696_v41 }
  0x43   : > { %510 = vmatpush1.bf16.msra.mxu0 %v698_v42 }
  0xa2   : > { %v230_v24 = vpop.xlane.xlu0 %229 }
  0xa3   : > { %v232_v25 = vmul.f32 0.00390625, %v230_v24 }
  0xa5   : > { %v233_v26 = vsub.f32 %v226_v1, %v232_v25  ;;  %v234_v27 = vsub.f32 %v227_v2, %v232_v25  ;;  %v307_v1 = vld [vmem:[%s877_s4] sm:$0x3] }
  0xa6   : > { %v312_v2 = vrot.slane %v307_v1, %v249_v48  ;;  %v316_v3 = vrot.slane %v307_v1, %v253_v49 }
  0xa7   : > { %v235_v28 = vmul.f32 %v233_v26, %v233_v26  ;;  %v236_v29 = vmul.f32 %v234_v27, %v234_v27 }
  0xa9   : > { %v237_v30 = vadd.f32 %v236_v29, %v235_v28 }
  0xab   : > { %238 = vadd.xlane.f32.xlu0 %v237_v30 }
 0x138   : > { %v239_v43 = vpop.xlane.xlu0 %238 }
 0x139   : > { %v240_v44 = vmul.f32 0.00390625, %v239_v43 }
 0x13b   : > { %v241_v46 = vadd.f32 1e-05, %v240_v44 }
 0x13d   : > { %699 = vrsqrt.f32 %v241_v46 }
 0x147   : > { %v700_v54 = vpop.eup %699 }
 0x148   : > { %v244_v55 = vmul.f32 %v700_v54, %v234_v27  ;;  %v243_v58 = vmul.f32 %v700_v54, %v233_v26 }
 0x14a   : > { %v258_v59 = vmul.f32 %v254_v53, %v244_v55  ;;  %v257_v60 = vmul.f32 %v250_v52, %v243_v58 }
 0x14c   : > { %v272_v61 = vadd.f32 %v268_v57, %v258_v59  ;;  %v271_v62 = vadd.f32 %v264_v56, %v257_v60 }
 0x14e   : > { %v274_v63 = vpack.c.bf16 %v272_v61, %v272_v61  ;;  %v273_v0 = vpack.c.bf16 %v271_v62, %v271_v62 }
 0x150   : > { %511 = vmatprep.mubr.bf16.mxu0 %v274_v63 }
 0x151   : > { %512 = vmatmul.mubr.bf16.vlgmr.msra.gmra.mrb[0].mxu0 %v273_v0 }
 0x224   : > { %v513_v4 = vpop.f32.mrb[0].mxu0 }
 0x225   : > { %v514_v5 = vadd.f32 %v513_v4, %v312_v2  ;;  %v515_v6 = vpop.f32.mrb[1].mxu0 }
 0x226   : > { %v516_v7 = vadd.f32 %v515_v6, %v316_v3  ;;  %v517_v8 = vpop.f32.mrb[2].mxu0 }
 0x227   : > { %v637_v9 = vmul.f32 -1.442695, %v514_v5  ;;  %v518_v10 = vpop.f32.mrb[3].mxu0 }
 0x228   : > { %v638_v11 = vmul.f32 -1.442695, %v516_v7 }
 0x229   : > { %701 = vpow2.f32 %v637_v9 }
 0x22a   : > { %703 = vpow2.f32 %v638_v11 }
 0x233   : > { %v702_v12 = vpop.eup %701 }
 0x234   : > { %v704_v13 = vpop.eup %703  ;;  %v531_v14 = vadd.f32 1.0, %v702_v12 }
 0x235   : > { %v532_v15 = vadd.f32 1.0, %v704_v13 }
 0x236   : > { %705 = vrcp.f32 %v531_v14 }
 0x237   : > { %707 = vrcp.f32 %v532_v15 }
 0x240   : > { %v706_v18 = vpop.eup %705 }
 0x241   : > { %v708_v19 = vpop.eup %707  ;;  %539 = vst [vmem:[%s224_s28] sm:$0xff] %v706_v18 }
 0x242   : > { %v538_v20 = vsel %vm524_vm0, %v708_v19, %v516_v7 }
 0x243   : > { %540 = vst [vmem:[%s224_s28 + $0x8] sm:$0xff] %v538_v20 }
 0x244 PF: > { %s15_s18 = sadd.s32 1, %s715_s18  }
 0x245   : > { %p12_p4 = scmp.ge.s32.totalorder %s15_s18, 4  }
 0x247   :  { %14 = sbr.rel (!%p12_p4) target bundleno = 1 (0x1), region = 70 }

</bundles_post_ra>
